<compile_context>
chip_gen: v7x
topology: tpu7x:2x2x1
jax: 0.10.0
libtpu: 0.0.40
codegen_flags: <defaults>
</compile_context>

<pallas_src>
import math

import jax
import jax.numpy as jnp
from jax.experimental import pallas as pl
from jax.experimental.pallas import tpu as pltpu

NUM_LAYERS = 5          # 4 hidden (Linear+LN) blocks + final Linear
HIDDEN = 50             # real hidden width
H_PAD = 128             # lane-dense padded hidden width
INPUT_SIZE = 1
OUTPUT_SIZE = 1
LN_EPS = 1e-5
_INV_H = 1.0 / float(HIDDEN)

# Vector-slab row layout (all rows are (1, 128) f32):
#   0: w0 row          1-4: b0..b3        5-12: (g0,be0,g1,be1,g2,be2,g3,be3)
#   13: w4 row         14: b4 (broadcast) 15: zeros (pad to 16 rows = 2 sublane tiles)


def _round_up(n, m):
    return ((n + m - 1) // m) * m


def _relu_ln_gate(h, gamma, beta):
    """relu -> LayerNorm over the 50 real lanes of a 128-wide padded tensor -> relu^3.

    Padded lanes (>= HIDDEN) of `h` are zero on entry (zero-padded weights/bias) and
    zero on exit (gamma/beta are zero there), so full-width sums divided by HIDDEN
    give the exact mean / biased variance over the 50 real features. Stats stay f32.
    """
    h = jnp.maximum(h, 0.0)
    # NOTE: if a bundle dump shows the 2-XLU budget binding on v6e/v7x, these two
    # cross-lane sums can be offloaded to the MXU as dot(h, ones) / dot(h*h, ones).
    s1 = jnp.sum(h, axis=-1, keepdims=True)
    s2 = jnp.sum(h * h, axis=-1, keepdims=True)
    mean = s1 * _INV_H
    var = jnp.maximum(s2 * _INV_H - mean * mean, 0.0)   # one-pass biased variance (f32)
    inv_std = jax.lax.rsqrt(var + LN_EPS)               # EUP rsqrt (free slot)
    h = (h - mean) * inv_std * gamma + beta
    h = jnp.maximum(h, 0.0)
    return h * h * h


def _mlp_kernel(x_ref, w_ref, v_ref, out_ref):
    """Whole forward pass for one (TB, 1) batch tile.

    x_ref : (TB, 1) f32 batch tile
    w_ref : (3, 128, 128) hidden weights (bf16 by default), resident in VMEM
    v_ref : (16, 128) f32 vector slab (see layout above), resident in VMEM
    """
    x = x_ref[...]                                    # (TB, 1) f32
    mm_dtype = w_ref.dtype

    # Layer 0 (K=1): VPU broadcast instead of a degenerate MXU matmul.
    h = x * v_ref[0:1, :] + v_ref[1:2, :]             # (TB,1)*(1,128) -> (TB,128) f32
    h = _relu_ln_gate(h, v_ref[5:6, :], v_ref[6:7, :])

    # Three 128x128 hidden layers on the MXU (fully unrolled); operands cast to bf16
    # at the dot only, accumulation and everything else stays f32.
    for l in range(3):
        w = w_ref[l]                                  # (128, 128) mm_dtype
        b = v_ref[2 + l:3 + l, :]                     # (1, 128) f32
        h = jnp.dot(h.astype(mm_dtype), w,
                    preferred_element_type=jnp.float32) + b
        h = _relu_ln_gate(h, v_ref[7 + 2 * l:8 + 2 * l, :],
                          v_ref[8 + 2 * l:9 + 2 * l, :])

    # Final layer (N=1): lane reduction instead of a degenerate MXU matmul.
    out = jnp.sum(h * v_ref[13:14, :], axis=-1, keepdims=True) + v_ref[14:15, 0:1]
    # TODO(synk): output stays (TB,1) (1-lane masked stores); a lane-dense relayout of the
    # partials would shrink the per-step epilogue slightly but adds an in-kernel transpose.
    out_ref[...] = out.astype(out_ref.dtype)


def _pack_params(params, matmul_dtype):
    """Pack all parameters into (3,128,128) weight stack + (16,128) f32 vector slab."""
    w, b, g, be = params["w"], params["b"], params["gamma"], params["beta"]

    # Shape checks protect the padded-lane-zero invariant (params must be canonical 50-wide).
    assert w[0].shape == (INPUT_SIZE, HIDDEN) and b[0].shape == (1, HIDDEN)
    for i in (1, 2, 3):
        assert w[i].shape == (HIDDEN, HIDDEN) and b[i].shape == (1, HIDDEN)
    assert w[4].shape == (HIDDEN, OUTPUT_SIZE) and b[4].shape == (1, OUTPUT_SIZE)
    for i in range(4):
        assert g[i].shape == (1, HIDDEN) and be[i].shape == (1, HIDDEN)

    def pad_row(a):                                   # (1, n<=128) -> (1, 128), zero pad
        return jnp.pad(a.astype(jnp.float32), ((0, 0), (0, H_PAD - a.shape[1])))

    w_stack = jnp.stack([
        jnp.pad(w[i], ((0, H_PAD - HIDDEN), (0, H_PAD - HIDDEN))) for i in (1, 2, 3)
    ]).astype(matmul_dtype)                           # (3, 128, 128)

    rows = [
        pad_row(w[0]),                                            # 0: w0 row
        pad_row(b[0]), pad_row(b[1]), pad_row(b[2]), pad_row(b[3]),   # 1-4
        pad_row(g[0]), pad_row(be[0]),                            # 5-6
        pad_row(g[1]), pad_row(be[1]),                            # 7-8
        pad_row(g[2]), pad_row(be[2]),                            # 9-10
        pad_row(g[3]), pad_row(be[3]),                            # 11-12
        pad_row(w[4].T),                                          # 13: w4 row
        jnp.broadcast_to(b[4][0, 0].astype(jnp.float32), (1, H_PAD)),  # 14: b4
        jnp.zeros((1, H_PAD), jnp.float32),                       # 15: pad
    ]
    vecs = jnp.concatenate(rows, axis=0)              # (16, 128) f32
    return w_stack, vecs


def normal_multi_layers_forward(x, params, *, tile_batch=2048,
                                matmul_dtype=jnp.bfloat16):
    """x: (batch, INPUT_SIZE) float32. params: dict of canonical weights (see init_params)."""
    batch = x.shape[0]
    assert x.shape[1] == INPUT_SIZE
    x = x.astype(jnp.float32)

    # Batch tile: 8-row aligned, capped at tile_batch, and capped again so the grid has
    # at least 2 tiles whenever the batch allows (keeps both v7x TensorCores busy).
    b_al = _round_up(batch, 8)
    tb = min(_round_up(tile_batch, 8), b_al)
    if b_al > 8:
        tb = min(tb, _round_up(pl.cdiv(b_al, 2), 8))
    b_pad = _round_up(batch, tb)
    if b_pad != batch:
        x = jnp.pad(x, ((0, b_pad - batch), (0, 0)))

    w_stack, vecs = _pack_params(params, matmul_dtype)

    out = pl.pallas_call(
        _mlp_kernel,
        out_shape=jax.ShapeDtypeStruct((b_pad, OUTPUT_SIZE), jnp.float32),
        grid=(b_pad // tb,),
        in_specs=[
            pl.BlockSpec((tb, INPUT_SIZE), lambda i: (i, 0)),     # batch tile
            pl.BlockSpec(w_stack.shape, lambda i: (0, 0, 0)),     # resident weight stack
            pl.BlockSpec(vecs.shape, lambda i: (0, 0)),           # resident vector slab
        ],
        out_specs=pl.BlockSpec((tb, OUTPUT_SIZE), lambda i: (i, 0)),
        compiler_params=pltpu.CompilerParams(
            dimension_semantics=("parallel",)),       # batch tiles across v7x's 2 TCs
    )(x, w_stack, vecs)
    return out[:batch]


def init_params(key):
    """Deterministic init mimicking PyTorch defaults:
       Linear: U(-1/sqrt(fan_in), 1/sqrt(fan_in)) for weight and bias.
       LayerNorm: gamma=1, beta=0. Shapes are the canonical (unpadded) ones."""
    dims = [INPUT_SIZE] + [HIDDEN] * (NUM_LAYERS - 1) + [OUTPUT_SIZE]
    ws, bs = [], []
    for i in range(NUM_LAYERS):
        fan_in, fan_out = dims[i], dims[i + 1]
        key, kw, kb = jax.random.split(key, 3)
        bound = 1.0 / math.sqrt(fan_in)
        # Stored as (in, out): transpose of PyTorch's (out, in) layout.
        ws.append(jax.random.uniform(kw, (fan_in, fan_out), jnp.float32,
                                     minval=-bound, maxval=bound))
        bs.append(jax.random.uniform(kb, (1, fan_out), jnp.float32,
                                     minval=-bound, maxval=bound))
    gammas = [jnp.ones((1, HIDDEN), jnp.float32) for _ in range(NUM_LAYERS - 1)]
    betas = [jnp.zeros((1, HIDDEN), jnp.float32) for _ in range(NUM_LAYERS - 1)]
    return {"w": ws, "b": bs, "gamma": gammas, "beta": betas}


def reference_forward(x, params, matmul_dtype=jnp.float32):
    """Pure-JAX reference of the same forward pass (PyTorch semantics, unpadded).

    `matmul_dtype` applies only to the three 50x50 hidden matmul operands, mirroring the
    kernel's MXU casts; stats and everything else stay f32, and the degenerate first/last
    layers stay f32 like the kernel's VPU paths."""
    hp = jax.lax.Precision.HIGHEST
    h = x.astype(jnp.float32)
    for i in range(NUM_LAYERS - 1):
        w, b = params["w"][i], params["b"][i]
        if i == 0:
            h = jnp.dot(h, w, precision=hp) + b       # K=1: exact either way
        else:
            h = jnp.dot(h.astype(matmul_dtype), w.astype(matmul_dtype),
                        preferred_element_type=jnp.float32, precision=hp) + b
        h = jnp.maximum(h, 0.0)
        mean = jnp.mean(h, axis=-1, keepdims=True)
        var = jnp.mean((h - mean) ** 2, axis=-1, keepdims=True)
        h = (h - mean) / jnp.sqrt(var + LN_EPS)
        h = h * params["gamma"][i] + params["beta"][i]
        h = jnp.maximum(h, 0.0) ** 3
    return jnp.dot(h, params["w"][-1], precision=hp) + params["b"][-1]


if __name__ == "__main__":
    key = jax.random.PRNGKey(0)
    key, kx = jax.random.split(key)

    # Batch deliberately not 8-/tile-aligned so the padding + multi-tile (>=2 tiles via the
    # v7x two-core cap) grid path is exercised.
    batch = 300
    x = jax.random.normal(kx, (batch, INPUT_SIZE), jnp.float32)
    params = init_params(key)

    # Default (bf16 MXU operands) path vs a mixed-precision reference with identical
    # matmul-operand casts -- verifies everything except MXU accumulation order tightly.
    out = jax.block_until_ready(normal_multi_layers_forward(x, params))
    assert out.shape == (batch, OUTPUT_SIZE)
    ref_mixed = reference_forward(x, params, matmul_dtype=jnp.bfloat16)
    err_mixed = float(jnp.max(jnp.abs(out - ref_mixed)))
    assert jnp.allclose(out, ref_mixed, atol=2e-3, rtol=2e-3), err_mixed

    # Full-f32 kernel path vs the exact PyTorch-semantics f32 reference.
    out_f32 = jax.block_until_ready(
        normal_multi_layers_forward(x, params, matmul_dtype=jnp.float32))
    ref_f32 = reference_forward(x, params)
    err_f32 = float(jnp.max(jnp.abs(out_f32 - ref_f32)))
    assert jnp.allclose(out_f32, ref_f32, atol=2e-3, rtol=2e-3), err_f32

    print("KERNEL_OK")
</pallas_src>

<mosaic_0001>
module attributes {stable_mosaic.version = 11 : i64} {
  func.func @_mlp_kernel(%arg0: i32, %arg1: memref<152x1xf32, #tpu.memory_space<vmem>>, %arg2: memref<3x128x128xbf16, #tpu.memory_space<vmem>>, %arg3: memref<16x128xf32, #tpu.memory_space<vmem>>, %arg4: memref<152x1xf32, #tpu.memory_space<vmem>>) attributes {dimension_semantics = [#tpu.dimension_semantics<parallel>], iteration_bounds = array<i64: 2>, scalar_prefetch = 0 : i64, scratch_operands = 0 : i64, tpu.core_type = #tpu.core_type<tc>, window_params = [{transform_indices = @transform_0, window_bounds = array<i64: 152, 1>}, {pipeline_mode = #tpu.pipeline_mode<synchronous>, transform_indices = @transform_1, window_bounds = array<i64: 3, 128, 128>}, {pipeline_mode = #tpu.pipeline_mode<synchronous>, transform_indices = @transform_2, window_bounds = array<i64: 16, 128>}, {transform_indices = @transform_3, window_bounds = array<i64: 152, 1>}]} {
    %c0 = arith.constant 0 : index
    %c0_0 = arith.constant 0 : index
    %0 = vector.load %arg1[%c0, %c0_0] : memref<152x1xf32, #tpu.memory_space<vmem>>, vector<152x1xf32>
    %c0_1 = arith.constant 0 : index
    %c0_2 = arith.constant 0 : index
    %1 = vector.load %arg3[%c0_1, %c0_2] : memref<16x128xf32, #tpu.memory_space<vmem>>, vector<1x128xf32>
    %2 = vector.broadcast %0 : vector<152x1xf32> to vector<152x128xf32>
    %3 = vector.broadcast %1 : vector<1x128xf32> to vector<152x128xf32>
    %4 = arith.mulf %2, %3 : vector<152x128xf32>
    %c1 = arith.constant 1 : index
    %c0_3 = arith.constant 0 : index
    %5 = vector.load %arg3[%c1, %c0_3] : memref<16x128xf32, #tpu.memory_space<vmem>>, vector<1x128xf32>
    %6 = vector.broadcast %5 : vector<1x128xf32> to vector<152x128xf32>
    %7 = arith.addf %4, %6 : vector<152x128xf32>
    %c5 = arith.constant 5 : index
    %c0_4 = arith.constant 0 : index
    %8 = vector.load %arg3[%c5, %c0_4] : memref<16x128xf32, #tpu.memory_space<vmem>>, vector<1x128xf32>
    %c6 = arith.constant 6 : index
    %c0_5 = arith.constant 0 : index
    %9 = vector.load %arg3[%c6, %c0_5] : memref<16x128xf32, #tpu.memory_space<vmem>>, vector<1x128xf32>
    %cst = arith.constant 0.000000e+00 : f32
    %10 = vector.broadcast %cst : f32 to vector<152x128xf32>
    %11 = arith.maximumf %7, %10 : vector<152x128xf32>
    %cst_6 = arith.constant dense<0.000000e+00> : vector<152xf32>
    %12 = vector.multi_reduction <add>, %11, %cst_6 [1] : vector<152x128xf32> to vector<152xf32>
    %13 = vector.shape_cast %12 : vector<152xf32> to vector<152x1xf32>
    %14 = arith.mulf %11, %11 : vector<152x128xf32>
    %cst_7 = arith.constant dense<0.000000e+00> : vector<152xf32>
    %15 = vector.multi_reduction <add>, %14, %cst_7 [1] : vector<152x128xf32> to vector<152xf32>
    %16 = vector.shape_cast %15 : vector<152xf32> to vector<152x1xf32>
    %cst_8 = arith.constant 2.000000e-02 : f32
    %17 = vector.broadcast %cst_8 : f32 to vector<152x1xf32>
    %18 = arith.mulf %13, %17 : vector<152x1xf32>
    %cst_9 = arith.constant 2.000000e-02 : f32
    %19 = vector.broadcast %cst_9 : f32 to vector<152x1xf32>
    %20 = arith.mulf %16, %19 : vector<152x1xf32>
    %21 = arith.mulf %18, %18 : vector<152x1xf32>
    %22 = arith.subf %20, %21 : vector<152x1xf32>
    %cst_10 = arith.constant 0.000000e+00 : f32
    %23 = vector.broadcast %cst_10 : f32 to vector<152x1xf32>
    %24 = arith.maximumf %22, %23 : vector<152x1xf32>
    %cst_11 = arith.constant 9.99999974E-6 : f32
    %25 = vector.broadcast %cst_11 : f32 to vector<152x1xf32>
    %26 = arith.addf %24, %25 : vector<152x1xf32>
    %27 = math.rsqrt %26 : vector<152x1xf32>
    %28 = vector.broadcast %18 : vector<152x1xf32> to vector<152x128xf32>
    %29 = arith.subf %11, %28 : vector<152x128xf32>
    %30 = vector.broadcast %27 : vector<152x1xf32> to vector<152x128xf32>
    %31 = arith.mulf %29, %30 : vector<152x128xf32>
    %32 = vector.broadcast %8 : vector<1x128xf32> to vector<152x128xf32>
    %33 = arith.mulf %31, %32 : vector<152x128xf32>
    %34 = vector.broadcast %9 : vector<1x128xf32> to vector<152x128xf32>
    %35 = arith.addf %33, %34 : vector<152x128xf32>
    %cst_12 = arith.constant 0.000000e+00 : f32
    %36 = vector.broadcast %cst_12 : f32 to vector<152x128xf32>
    %37 = arith.maximumf %35, %36 : vector<152x128xf32>
    %38 = arith.mulf %37, %37 : vector<152x128xf32>
    %39 = arith.mulf %38, %37 : vector<152x128xf32>
    %c0_13 = arith.constant 0 : index
    %c0_14 = arith.constant 0 : index
    %c0_15 = arith.constant 0 : index
    %40 = vector.load %arg2[%c0_13, %c0_14, %c0_15] : memref<3x128x128xbf16, #tpu.memory_space<vmem>>, vector<1x128x128xbf16>
    %41 = vector.shape_cast %40 : vector<1x128x128xbf16> to vector<128x128xbf16>
    %c2 = arith.constant 2 : index
    %c0_16 = arith.constant 0 : index
    %42 = vector.load %arg3[%c2, %c0_16] : memref<16x128xf32, #tpu.memory_space<vmem>>, vector<1x128xf32>
    %43 = arith.truncf %39 : vector<152x128xf32> to vector<152x128xbf16>
    %cst_17 = arith.constant dense<0.000000e+00> : vector<152x128xf32>
    %44 = tpu.matmul %43, %41, %cst_17 {dimension_numbers = #tpu.dot_dimension_numbers<[1], [0], [0], [1], [0, 0, 1, 1], [], []>} : vector<152x128xbf16>, vector<128x128xbf16>, vector<152x128xf32> -> vector<152x128xf32>
    %45 = vector.broadcast %42 : vector<1x128xf32> to vector<152x128xf32>
    %46 = arith.addf %44, %45 : vector<152x128xf32>
    %c7 = arith.constant 7 : index
    %c0_18 = arith.constant 0 : index
    %47 = vector.load %arg3[%c7, %c0_18] : memref<16x128xf32, #tpu.memory_space<vmem>>, vector<1x128xf32>
    %c8 = arith.constant 8 : index
    %c0_19 = arith.constant 0 : index
    %48 = vector.load %arg3[%c8, %c0_19] : memref<16x128xf32, #tpu.memory_space<vmem>>, vector<1x128xf32>
    %cst_20 = arith.constant 0.000000e+00 : f32
    %49 = vector.broadcast %cst_20 : f32 to vector<152x128xf32>
    %50 = arith.maximumf %46, %49 : vector<152x128xf32>
    %cst_21 = arith.constant dense<0.000000e+00> : vector<152xf32>
    %51 = vector.multi_reduction <add>, %50, %cst_21 [1] : vector<152x128xf32> to vector<152xf32>
    %52 = vector.shape_cast %51 : vector<152xf32> to vector<152x1xf32>
    %53 = arith.mulf %50, %50 : vector<152x128xf32>
    %cst_22 = arith.constant dense<0.000000e+00> : vector<152xf32>
    %54 = vector.multi_reduction <add>, %53, %cst_22 [1] : vector<152x128xf32> to vector<152xf32>
    %55 = vector.shape_cast %54 : vector<152xf32> to vector<152x1xf32>
    %cst_23 = arith.constant 2.000000e-02 : f32
    %56 = vector.broadcast %cst_23 : f32 to vector<152x1xf32>
    %57 = arith.mulf %52, %56 : vector<152x1xf32>
    %cst_24 = arith.constant 2.000000e-02 : f32
    %58 = vector.broadcast %cst_24 : f32 to vector<152x1xf32>
    %59 = arith.mulf %55, %58 : vector<152x1xf32>
    %60 = arith.mulf %57, %57 : vector<152x1xf32>
    %61 = arith.subf %59, %60 : vector<152x1xf32>
    %cst_25 = arith.constant 0.000000e+00 : f32
    %62 = vector.broadcast %cst_25 : f32 to vector<152x1xf32>
    %63 = arith.maximumf %61, %62 : vector<152x1xf32>
    %cst_26 = arith.constant 9.99999974E-6 : f32
    %64 = vector.broadcast %cst_26 : f32 to vector<152x1xf32>
    %65 = arith.addf %63, %64 : vector<152x1xf32>
    %66 = math.rsqrt %65 : vector<152x1xf32>
    %67 = vector.broadcast %57 : vector<152x1xf32> to vector<152x128xf32>
    %68 = arith.subf %50, %67 : vector<152x128xf32>
    %69 = vector.broadcast %66 : vector<152x1xf32> to vector<152x128xf32>
    %70 = arith.mulf %68, %69 : vector<152x128xf32>
    %71 = vector.broadcast %47 : vector<1x128xf32> to vector<152x128xf32>
    %72 = arith.mulf %70, %71 : vector<152x128xf32>
    %73 = vector.broadcast %48 : vector<1x128xf32> to vector<152x128xf32>
    %74 = arith.addf %72, %73 : vector<152x128xf32>
    %cst_27 = arith.constant 0.000000e+00 : f32
    %75 = vector.broadcast %cst_27 : f32 to vector<152x128xf32>
    %76 = arith.maximumf %74, %75 : vector<152x128xf32>
    %77 = arith.mulf %76, %76 : vector<152x128xf32>
    %78 = arith.mulf %77, %76 : vector<152x128xf32>
    %c1_28 = arith.constant 1 : index
    %c0_29 = arith.constant 0 : index
    %c0_30 = arith.constant 0 : index
    %79 = vector.load %arg2[%c1_28, %c0_29, %c0_30] : memref<3x128x128xbf16, #tpu.memory_space<vmem>>, vector<1x128x128xbf16>
    %80 = vector.shape_cast %79 : vector<1x128x128xbf16> to vector<128x128xbf16>
    %c3 = arith.constant 3 : index
    %c0_31 = arith.constant 0 : index
    %81 = vector.load %arg3[%c3, %c0_31] : memref<16x128xf32, #tpu.memory_space<vmem>>, vector<1x128xf32>
    %82 = arith.truncf %78 : vector<152x128xf32> to vector<152x128xbf16>
    %cst_32 = arith.constant dense<0.000000e+00> : vector<152x128xf32>
    %83 = tpu.matmul %82, %80, %cst_32 {dimension_numbers = #tpu.dot_dimension_numbers<[1], [0], [0], [1], [0, 0, 1, 1], [], []>} : vector<152x128xbf16>, vector<128x128xbf16>, vector<152x128xf32> -> vector<152x128xf32>
    %84 = vector.broadcast %81 : vector<1x128xf32> to vector<152x128xf32>
    %85 = arith.addf %83, %84 : vector<152x128xf32>
    %c9 = arith.constant 9 : index
    %c0_33 = arith.constant 0 : index
    %86 = vector.load %arg3[%c9, %c0_33] : memref<16x128xf32, #tpu.memory_space<vmem>>, vector<1x128xf32>
    %c10 = arith.constant 10 : index
    %c0_34 = arith.constant 0 : index
    %87 = vector.load %arg3[%c10, %c0_34] : memref<16x128xf32, #tpu.memory_space<vmem>>, vector<1x128xf32>
    %cst_35 = arith.constant 0.000000e+00 : f32
    %88 = vector.broadcast %cst_35 : f32 to vector<152x128xf32>
    %89 = arith.maximumf %85, %88 : vector<152x128xf32>
    %cst_36 = arith.constant dense<0.000000e+00> : vector<152xf32>
    %90 = vector.multi_reduction <add>, %89, %cst_36 [1] : vector<152x128xf32> to vector<152xf32>
    %91 = vector.shape_cast %90 : vector<152xf32> to vector<152x1xf32>
    %92 = arith.mulf %89, %89 : vector<152x128xf32>
    %cst_37 = arith.constant dense<0.000000e+00> : vector<152xf32>
    %93 = vector.multi_reduction <add>, %92, %cst_37 [1] : vector<152x128xf32> to vector<152xf32>
    %94 = vector.shape_cast %93 : vector<152xf32> to vector<152x1xf32>
    %cst_38 = arith.constant 2.000000e-02 : f32
    %95 = vector.broadcast %cst_38 : f32 to vector<152x1xf32>
    %96 = arith.mulf %91, %95 : vector<152x1xf32>
    %cst_39 = arith.constant 2.000000e-02 : f32
    %97 = vector.broadcast %cst_39 : f32 to vector<152x1xf32>
    %98 = arith.mulf %94, %97 : vector<152x1xf32>
    %99 = arith.mulf %96, %96 : vector<152x1xf32>
    %100 = arith.subf %98, %99 : vector<152x1xf32>
    %cst_40 = arith.constant 0.000000e+00 : f32
    %101 = vector.broadcast %cst_40 : f32 to vector<152x1xf32>
    %102 = arith.maximumf %100, %101 : vector<152x1xf32>
    %cst_41 = arith.constant 9.99999974E-6 : f32
    %103 = vector.broadcast %cst_41 : f32 to vector<152x1xf32>
    %104 = arith.addf %102, %103 : vector<152x1xf32>
    %105 = math.rsqrt %104 : vector<152x1xf32>
    %106 = vector.broadcast %96 : vector<152x1xf32> to vector<152x128xf32>
    %107 = arith.subf %89, %106 : vector<152x128xf32>
    %108 = vector.broadcast %105 : vector<152x1xf32> to vector<152x128xf32>
    %109 = arith.mulf %107, %108 : vector<152x128xf32>
    %110 = vector.broadcast %86 : vector<1x128xf32> to vector<152x128xf32>
    %111 = arith.mulf %109, %110 : vector<152x128xf32>
    %112 = vector.broadcast %87 : vector<1x128xf32> to vector<152x128xf32>
    %113 = arith.addf %111, %112 : vector<152x128xf32>
    %cst_42 = arith.constant 0.000000e+00 : f32
    %114 = vector.broadcast %cst_42 : f32 to vector<152x128xf32>
    %115 = arith.maximumf %113, %114 : vector<152x128xf32>
    %116 = arith.mulf %115, %115 : vector<152x128xf32>
    %117 = arith.mulf %116, %115 : vector<152x128xf32>
    %c2_43 = arith.constant 2 : index
    %c0_44 = arith.constant 0 : index
    %c0_45 = arith.constant 0 : index
    %118 = vector.load %arg2[%c2_43, %c0_44, %c0_45] : memref<3x128x128xbf16, #tpu.memory_space<vmem>>, vector<1x128x128xbf16>
    %119 = vector.shape_cast %118 : vector<1x128x128xbf16> to vector<128x128xbf16>
    %c4 = arith.constant 4 : index
    %c0_46 = arith.constant 0 : index
    %120 = vector.load %arg3[%c4, %c0_46] : memref<16x128xf32, #tpu.memory_space<vmem>>, vector<1x128xf32>
    %121 = arith.truncf %117 : vector<152x128xf32> to vector<152x128xbf16>
    %cst_47 = arith.constant dense<0.000000e+00> : vector<152x128xf32>
    %122 = tpu.matmul %121, %119, %cst_47 {dimension_numbers = #tpu.dot_dimension_numbers<[1], [0], [0], [1], [0, 0, 1, 1], [], []>} : vector<152x128xbf16>, vector<128x128xbf16>, vector<152x128xf32> -> vector<152x128xf32>
    %123 = vector.broadcast %120 : vector<1x128xf32> to vector<152x128xf32>
    %124 = arith.addf %122, %123 : vector<152x128xf32>
    %c11 = arith.constant 11 : index
    %c0_48 = arith.constant 0 : index
    %125 = vector.load %arg3[%c11, %c0_48] : memref<16x128xf32, #tpu.memory_space<vmem>>, vector<1x128xf32>
    %c12 = arith.constant 12 : index
    %c0_49 = arith.constant 0 : index
    %126 = vector.load %arg3[%c12, %c0_49] : memref<16x128xf32, #tpu.memory_space<vmem>>, vector<1x128xf32>
    %cst_50 = arith.constant 0.000000e+00 : f32
    %127 = vector.broadcast %cst_50 : f32 to vector<152x128xf32>
    %128 = arith.maximumf %124, %127 : vector<152x128xf32>
    %cst_51 = arith.constant dense<0.000000e+00> : vector<152xf32>
    %129 = vector.multi_reduction <add>, %128, %cst_51 [1] : vector<152x128xf32> to vector<152xf32>
    %130 = vector.shape_cast %129 : vector<152xf32> to vector<152x1xf32>
    %131 = arith.mulf %128, %128 : vector<152x128xf32>
    %cst_52 = arith.constant dense<0.000000e+00> : vector<152xf32>
    %132 = vector.multi_reduction <add>, %131, %cst_52 [1] : vector<152x128xf32> to vector<152xf32>
    %133 = vector.shape_cast %132 : vector<152xf32> to vector<152x1xf32>
    %cst_53 = arith.constant 2.000000e-02 : f32
    %134 = vector.broadcast %cst_53 : f32 to vector<152x1xf32>
    %135 = arith.mulf %130, %134 : vector<152x1xf32>
    %cst_54 = arith.constant 2.000000e-02 : f32
    %136 = vector.broadcast %cst_54 : f32 to vector<152x1xf32>
    %137 = arith.mulf %133, %136 : vector<152x1xf32>
    %138 = arith.mulf %135, %135 : vector<152x1xf32>
    %139 = arith.subf %137, %138 : vector<152x1xf32>
    %cst_55 = arith.constant 0.000000e+00 : f32
    %140 = vector.broadcast %cst_55 : f32 to vector<152x1xf32>
    %141 = arith.maximumf %139, %140 : vector<152x1xf32>
    %cst_56 = arith.constant 9.99999974E-6 : f32
    %142 = vector.broadcast %cst_56 : f32 to vector<152x1xf32>
    %143 = arith.addf %141, %142 : vector<152x1xf32>
    %144 = math.rsqrt %143 : vector<152x1xf32>
    %145 = vector.broadcast %135 : vector<152x1xf32> to vector<152x128xf32>
    %146 = arith.subf %128, %145 : vector<152x128xf32>
    %147 = vector.broadcast %144 : vector<152x1xf32> to vector<152x128xf32>
    %148 = arith.mulf %146, %147 : vector<152x128xf32>
    %149 = vector.broadcast %125 : vector<1x128xf32> to vector<152x128xf32>
    %150 = arith.mulf %148, %149 : vector<152x128xf32>
    %151 = vector.broadcast %126 : vector<1x128xf32> to vector<152x128xf32>
    %152 = arith.addf %150, %151 : vector<152x128xf32>
    %cst_57 = arith.constant 0.000000e+00 : f32
    %153 = vector.broadcast %cst_57 : f32 to vector<152x128xf32>
    %154 = arith.maximumf %152, %153 : vector<152x128xf32>
    %155 = arith.mulf %154, %154 : vector<152x128xf32>
    %156 = arith.mulf %155, %154 : vector<152x128xf32>
    %c13 = arith.constant 13 : index
    %c0_58 = arith.constant 0 : index
    %157 = vector.load %arg3[%c13, %c0_58] : memref<16x128xf32, #tpu.memory_space<vmem>>, vector<1x128xf32>
    %158 = vector.broadcast %157 : vector<1x128xf32> to vector<152x128xf32>
    %159 = arith.mulf %156, %158 : vector<152x128xf32>
    %cst_59 = arith.constant dense<0.000000e+00> : vector<152xf32>
    %160 = vector.multi_reduction <add>, %159, %cst_59 [1] : vector<152x128xf32> to vector<152xf32>
    %161 = vector.shape_cast %160 : vector<152xf32> to vector<152x1xf32>
    %c14 = arith.constant 14 : index
    %c0_60 = arith.constant 0 : index
    %162 = vector.load %arg3[%c14, %c0_60] : memref<16x128xf32, #tpu.memory_space<vmem>>, vector<1x1xf32>
    %163 = vector.broadcast %162 : vector<1x1xf32> to vector<152x1xf32>
    %164 = arith.addf %161, %163 : vector<152x1xf32>
    %c0_61 = arith.constant 0 : index
    %c0_62 = arith.constant 0 : index
    %165 = vector.load %arg4[%c0_61, %c0_62] : memref<152x1xf32, #tpu.memory_space<vmem>>, vector<152x1xf32>
    tpu.vector_store %arg4[%c0_61, %c0_62], %164 {strides = array<i32>} : memref<152x1xf32, #tpu.memory_space<vmem>>, vector<152x1xf32>,
    return
  }
  func.func @transform_0(%arg0: i32) -> (i32, i32) {
    %c0_i32 = arith.constant 0 : i32
    %c0_i32_0 = arith.constant 0 : i32
    return %arg0, %c0_i32 : i32, i32
  }
  func.func @transform_1(%arg0: i32) -> (i32, i32, i32) {
    %c0_i32 = arith.constant 0 : i32
    %c0_i32_0 = arith.constant 0 : i32
    %c0_i32_1 = arith.constant 0 : i32
    %c0_i32_2 = arith.constant 0 : i32
    return %c0_i32, %c0_i32_0, %c0_i32_1 : i32, i32, i32
  }
  func.func @transform_2(%arg0: i32) -> (i32, i32) {
    %c0_i32 = arith.constant 0 : i32
    %c0_i32_0 = arith.constant 0 : i32
    %c0_i32_1 = arith.constant 0 : i32
    return %c0_i32, %c0_i32_0 : i32, i32
  }
  func.func @transform_3(%arg0: i32) -> (i32, i32) {
    %c0_i32 = arith.constant 0 : i32
    %c0_i32_0 = arith.constant 0 : i32
    return %arg0, %c0_i32 : i32, i32
  }
}

</mosaic_0001>

<bundles_post_ra>
// kernel: tpu_custom_call.1
= control target key start
LH: loop header
LB: loop body
LE: loop exit
PB: predicated region body
PF: predicated region fallthrough
CT: control target
= control target key end

     0   :  { %s3108_s12 = smov 0   ;;  %s4511_s0 = inlined_call_operand.vmem [shape: f32[304,1], index: 0, kind: input, shape index: {}]   ;;  %s4512_s1 = inlined_call_operand.vmem [shape: bf16[3,128,128], index: 1, kind: input, shape index: {}]   ;;  %s4513_s2 = inlined_call_operand.vmem [shape: f32[16,128], index: 2, kind: input, shape index: {}]   ;;  %s4514_s3 = inlined_call_operand.vmem [shape: f32[304,1], index: 3, kind: output, shape index: {}]  }
   0x1 LB: > { %s2634_s13 = sadd.s32 4294967295, %s3085_s12   ;;  %p2638_p0 = scmp.ge.s32.totalorder %s3085_s12, 1  ;;  %s3085_s12 = sphi %s3108_s12, %s13_s12  }
   0x2   : > { %p138_p1 = scmp.lt.s32.totalorder %s3085_s12, 3 }
   0x4   : > { %p139_p2 = pnand %p2638_p0, %p138_p1 }
   0x6   : > { %142 = sbr.rel (%p139_p2) target bundleno = 1830 (0x726), region = 32 }
   0xd   : > { %s162_s14 = smul.u32 19, %s2634_s13  ;;  %v3087_v0 = vmov 0   ;;  %v3148_v20 = vld [vmem:[%s4513_s2] ss:$0 sm:$0xff]  ;;  %v3153_v21 = vld [vmem:[%s4513_s2 + $0x1] ss:$0 sm:$0xff] }
   0xe   : > { %2902 = vset.pattern.permute.xlu1 %v3087_v0  ;;  %2901 = vset.pattern.permute.xlu0 %v3087_v0  ;;  %vm2558_vm0 = vcmask 7168  }
   0xf   : > { %p163_p3 = scmp.lt.s32.totalorder %s162_s14, 37 }
  0x11   : > { %s4542_s14 = smov (!%p163_p3, %s162_s14), 37 }
  0x12   : > { %s2639_s15 = sshll.u32 %s4542_s14, 3 }
  0x13   : > { %s3124_s18 = scalar_lea.vmem %s4511_s0, %s2639_s15  ;;  %s4468_s27 = scalar_lea.vmem %s4514_s3, %s2639_s15 }
  0x14   : > { %v177_v1 = vld [vmem:[%s3124_s18 + $0x10] sm:$0xff]  ;;  %v175_v2 = vld [vmem:[%s3124_s18] sm:$0xff]  ;;  %v178_v3 = vld [vmem:[%s3124_s18 + $0x18] sm:$0xff] }
  0x15   : > { %207 = vperm.xlu1 %2902, %v177_v1   ;;  %197 = vperm.xlu0 %2901, %v175_v2   ;;  %v176_v4 = vld [vmem:[%s3124_s18 + $0x8] sm:$0xff]  ;;  %v179_v6 = vld [vmem:[%s3124_s18 + $0x20] sm:$0xff]  ;;  %v182_v7 = vld [vmem:[%s3124_s18 + $0x38] sm:$0xff] }
  0x16   : > { %v180_v5 = vld [vmem:[%s3124_s18 + $0x28] sm:$0xff]  ;;  %v181_v8 = vld [vmem:[%s3124_s18 + $0x30] sm:$0xff]  ;;  %v183_v10 = vld [vmem:[%s3124_s18 + $0x40] sm:$0xff] }
  0x17   : > { %v184_v9 = vld [vmem:[%s3124_s18 + $0x48] sm:$0xff]  ;;  %v186_v11 = vld [vmem:[%s3124_s18 + $0x58] sm:$0xff]  ;;  %v185_v12 = vld [vmem:[%s3124_s18 + $0x50] sm:$0xff] }
  0x18   : > { %v188_v13 = vld [vmem:[%s3124_s18 + $0x68] sm:$0xff]  ;;  %v187_v14 = vld [vmem:[%s3124_s18 + $0x60] sm:$0xff]  ;;  %v190_v15 = vld [vmem:[%s3124_s18 + $0x78] sm:$0xff] }
  0x19   : > { %212 = vperm.xlu1 %2902, %v178_v3   ;;  %202 = vperm.xlu0 %2901, %v176_v4   ;;  %v189_v16 = vld [vmem:[%s3124_s18 + $0x70] sm:$0xff]  ;;  %v192_v17 = vld [vmem:[%s3124_s18 + $0x88] sm:$0xff]  ;;  %v191_v18 = vld [vmem:[%s3124_s18 + $0x80] sm:$0xff] }
  0x1a   : > { %v193_v19 = vld [vmem:[%s3124_s18 + $0x90] sm:$0xff] }
  0x1d   : > { %222 = vperm.xlu1 %2902, %v180_v5   ;;  %217 = vperm.xlu0 %2901, %v179_v6  }
  0x21   : > { %232 = vperm.xlu1 %2902, %v182_v7   ;;  %227 = vperm.xlu0 %2901, %v181_v8  }
  0x25   : > { %242 = vperm.xlu1 %2902, %v184_v9   ;;  %237 = vperm.xlu0 %2901, %v183_v10  }
  0x29   : > { %252 = vperm.xlu1 %2902, %v186_v11   ;;  %247 = vperm.xlu0 %2901, %v185_v12  }
  0x2d   : > { %262 = vperm.xlu1 %2902, %v188_v13   ;;  %257 = vperm.xlu0 %2901, %v187_v14  }
  0x31   : > { %272 = vperm.xlu1 %2902, %v190_v15   ;;  %267 = vperm.xlu0 %2901, %v189_v16  }
  0x35   : > { %282 = vperm.xlu1 %2902, %v192_v17   ;;  %277 = vperm.xlu0 %2901, %v191_v18  }
  0x39   : > { %287 = vperm.xlu0 %2901, %v193_v19  }
  0x94   : > { %v208_v22 = vpop.permute.xlu1 %207  ;;  %v198_v23 = vpop.permute.xlu0 %197 }
  0x95   : > { %v294_v24 = vmul.f32 %v3148_v20, %v198_v23  ;;  %v296_v26 = vmul.f32 %v3148_v20, %v208_v22 }
  0x97   : > { %v318_v25 = vadd.f32 %v3153_v21, %v294_v24  ;;  %v320_v34 = vadd.f32 %v3153_v21, %v296_v26 }
  0x98   : > { %v213_v27 = vpop.permute.xlu1 %212  ;;  %v203_v28 = vpop.permute.xlu0 %202 }
  0x99   : > { %v297_v29 = vmul.f32 %v3148_v20, %v213_v27  ;;  %v295_v30 = vmul.f32 %v3148_v20, %v203_v28  ;;  %v3160_v31 = vmax.f32 %v318_v25, 0.0  ;;  %v3180_v48 = vmax.f32 %v320_v34, 0.0 }
  0x9b   : > { %v321_v32 = vadd.f32 %v3153_v21, %v297_v29  ;;  %v319_v33 = vadd.f32 %v3153_v21, %v295_v30  ;;  %358 = vadd.xlane.f32.xlu1 %v3160_v31 }
  0x9c   : > { %v223_v35 = vpop.permute.xlu1 %222  ;;  %v218_v36 = vpop.permute.xlu0 %217 }
  0x9d   : > { %v299_v37 = vmul.f32 %v3148_v20, %v223_v35  ;;  %v298_v38 = vmul.f32 %v3148_v20, %v218_v36  ;;  %v3168_v39 = vmax.f32 %v321_v32, 0.0  ;;  %v3170_v40 = vmax.f32 %v319_v33, 0.0 }
  0x9f   : > { %v323_v41 = vadd.f32 %v3153_v21, %v299_v37  ;;  %364 = vadd.xlane.f32.xlu1 %v3168_v39  ;;  %360 = vadd.xlane.f32.xlu0 %v3170_v40  ;;  %v322_v42 = vadd.f32 %v3153_v21, %v298_v38  ;;  %v397_v35 = vmul.f32 %v3170_v40, %v3170_v40 }
  0xa0   : > { %v233_v43 = vpop.permute.xlu1 %232  ;;  %v228_v44 = vpop.permute.xlu0 %227  ;;  %v396_v37 = vmul.f32 %v3160_v31, %v3160_v31  ;;  %v398_v38 = vmul.f32 %v3180_v48, %v3180_v48 }
  0xa1   : > { %v301_v45 = vmul.f32 %v3148_v20, %v233_v43  ;;  %v300_v46 = vmul.f32 %v3148_v20, %v228_v44  ;;  %v3178_v47 = vmax.f32 %v323_v41, 0.0  ;;  %v3185_v52 = vmax.f32 %v322_v42, 0.0 }
  0xa3   : > { %v325_v49 = vadd.f32 %v3153_v21, %v301_v45  ;;  %368 = vadd.xlane.f32.xlu1 %v3178_v47  ;;  %362 = vadd.xlane.f32.xlu0 %v3180_v48  ;;  %v324_v53 = vadd.f32 %v3153_v21, %v300_v46  ;;  %v400_v42 = vmul.f32 %v3185_v52, %v3185_v52 }
  0xa4   : > { %v243_v50 = vpop.permute.xlu1 %242  ;;  %v238_v51 = vpop.permute.xlu0 %237 }
  0xa5   : > { %v303_v54 = vmul.f32 %v3148_v20, %v243_v50  ;;  %v302_v55 = vmul.f32 %v3148_v20, %v238_v51  ;;  %v3190_v56 = vmax.f32 %v325_v49, 0.0  ;;  %v3200_v0 = vmax.f32 %v324_v53, 0.0  ;;  %v2903_v51 = vld [vmem:[%s4512_s1] sm:$0xff]  }
  0xa6   : > { %2768 = vmatprep.subr.bf16.mxu0 %v2903_v51 }
  0xa7   : > { %v327_v57 = vadd.f32 %v3153_v21, %v303_v54  ;;  %372 = vadd.xlane.f32.xlu1 %v3190_v56  ;;  %366 = vadd.xlane.f32.xlu0 %v3185_v52  ;;  %v326_v58 = vadd.f32 %v3153_v21, %v302_v55  ;;  %v403_v41 = vmul.f32 %v3190_v56, %v3190_v56  ;;  %v2904_v55 = vld [vmem:[%s4512_s1 + $0x8] sm:$0xff]  }
  0xa8   : > { %v253_v59 = vpop.permute.xlu1 %252  ;;  %v248_v60 = vpop.permute.xlu0 %247  ;;  %v402_v44 = vmul.f32 %v3200_v0, %v3200_v0  ;;  %2769 = vmatpush3.bf16.msra.mxu0 %v2903_v51 }
  0xa9   : > { %v305_v61 = vmul.f32 %v3148_v20, %v253_v59  ;;  %v304_v62 = vmul.f32 %v3148_v20, %v248_v60  ;;  %v3198_v63 = vmax.f32 %v327_v57, 0.0  ;;  %v3205_v4 = vmax.f32 %v326_v58, 0.0  ;;  %2770 = vmatprep.subr.bf16.mxu0 %v2904_v55  ;;  %v2905_v60 = vld [vmem:[%s4512_s1 + $0x10] sm:$0xff]  }
  0xab   : > { %v329_v1 = vadd.f32 %v3153_v21, %v305_v61  ;;  %376 = vadd.xlane.f32.xlu1 %v3198_v63  ;;  %370 = vadd.xlane.f32.xlu0 %v3200_v0  ;;  %v328_v5 = vadd.f32 %v3153_v21, %v304_v62  ;;  %v405_v43 = vmul.f32 %v3198_v63, %v3198_v63  ;;  %v2906_v62 = vld [vmem:[%s4512_s1 + $0x18] sm:$0xff]  }
  0xac   : > { %v263_v2 = vpop.permute.xlu1 %262  ;;  %v258_v3 = vpop.permute.xlu0 %257  ;;  %v404_v46 = vmul.f32 %v3205_v4, %v3205_v4  ;;  %2771 = vmatpush3.bf16.msra.mxu0 %v2904_v55 }
  0xad   : > { %v307_v6 = vmul.f32 %v3148_v20, %v263_v2  ;;  %v306_v7 = vmul.f32 %v3148_v20, %v258_v3  ;;  %v3210_v8 = vmax.f32 %v329_v1, 0.0  ;;  %v3220_v16 = vmax.f32 %v328_v5, 0.0  ;;  %2772 = vmatprep.subr.bf16.mxu0 %v2905_v60  ;;  %v2907_v2 = vld [vmem:[%s4512_s1 + $0x20] sm:$0xff]   ;;  %v2908_v3 = vld [vmem:[%s4512_s1 + $0x28] sm:$0xff]   ;;  %v2909_v5 = vld [vmem:[%s4512_s1 + $0x30] sm:$0xff]  }
  0xaf   : > { %v331_v9 = vadd.f32 %v3153_v21, %v307_v6  ;;  %380 = vadd.xlane.f32.xlu1 %v3210_v8  ;;  %374 = vadd.xlane.f32.xlu0 %v3205_v4  ;;  %v330_v10 = vadd.f32 %v3153_v21, %v306_v7  ;;  %v407_v45 = vmul.f32 %v3210_v8, %v3210_v8  ;;  %v2910_v6 = vld [vmem:[%s4512_s1 + $0x38] sm:$0xff]  }
  0xb0   : > { %v273_v11 = vpop.permute.xlu1 %272  ;;  %v268_v12 = vpop.permute.xlu0 %267  ;;  %v406_v50 = vmul.f32 %v3220_v16, %v3220_v16  ;;  %2773 = vmatpush3.bf16.msra.mxu0 %v2905_v60 }
  0xb1   : > { %v309_v13 = vmul.f32 %v3148_v20, %v273_v11  ;;  %v308_v14 = vmul.f32 %v3148_v20, %v268_v12  ;;  %v3218_v15 = vmax.f32 %v331_v9, 0.0  ;;  %v3225_v22 = vmax.f32 %v330_v10, 0.0  ;;  %2774 = vmatprep.subr.bf16.mxu0 %v2906_v62 }
  0xb3   : > { %v333_v17 = vadd.f32 %v3153_v21, %v309_v13  ;;  %384 = vadd.xlane.f32.xlu1 %v3218_v15  ;;  %378 = vadd.xlane.f32.xlu0 %v3220_v16  ;;  %v332_v23 = vadd.f32 %v3153_v21, %v308_v14  ;;  %v409_v49 = vmul.f32 %v3218_v15, %v3218_v15 }
  0xb4   : > { %v283_v18 = vpop.permute.xlu1 %282  ;;  %v278_v19 = vpop.permute.xlu0 %277  ;;  %v408_v54 = vmul.f32 %v3225_v22, %v3225_v22  ;;  %2775 = vmatpush3.bf16.msra.mxu0 %v2906_v62 }
  0xb5   : > { %v311_v24 = vmul.f32 %v3148_v20, %v283_v18  ;;  %v310_v25 = vmul.f32 %v3148_v20, %v278_v19  ;;  %v3230_v26 = vmax.f32 %v333_v17, 0.0  ;;  %v3239_v33 = vmax.f32 %v332_v23, 0.0  ;;  %2776 = vmatprep.subr.bf16.mxu0 %v2907_v2 }
  0xb7   : > { %v335_v27 = vadd.f32 %v3153_v21, %v311_v24  ;;  %388 = vadd.xlane.f32.xlu1 %v3230_v26  ;;  %382 = vadd.xlane.f32.xlu0 %v3225_v22  ;;  %v334_v29 = vadd.f32 %v3153_v21, %v310_v25  ;;  %v411_v53 = vmul.f32 %v3230_v26, %v3230_v26 }
  0xb8   : > { %v288_v28 = vpop.permute.xlu0 %287  ;;  %v410_v57 = vmul.f32 %v3239_v33, %v3239_v33  ;;  %2777 = vmatpush3.bf16.msra.mxu0 %v2907_v2 }
  0xb9   : > { %v312_v30 = vmul.f32 %v3148_v20, %v288_v28  ;;  %v3237_v32 = vmax.f32 %v335_v27, 0.0  ;;  %v3246_v36 = vmax.f32 %v334_v29, 0.0  ;;  %v399_v20 = vmul.f32 %v3168_v39, %v3168_v39  ;;  %2778 = vmatprep.subr.bf16.mxu0 %v2908_v3 }
  0xbb   : > { %4518 = vst [vmem:[#allocation2_spill] sm:$0xff] %v3237_v32  ;;  %v336_v34 = vadd.f32 %v3153_v21, %v312_v30  ;;  %392 = vadd.xlane.f32.xlu1 %v3237_v32  ;;  %386 = vadd.xlane.f32.xlu0 %v3239_v33  ;;  %v401_v21 = vmul.f32 %v3178_v47, %v3178_v47 }
  0xbc   : > { %v412_v58 = vmul.f32 %v3246_v36, %v3246_v36  ;;  %v413_v1 = vmul.f32 %v3237_v32, %v3237_v32  ;;  %2779 = vmatpush3.bf16.msra.mxu0 %v2908_v3 }
  0xbd   : > { %v3287_v59 = vmax.f32 %v336_v34, 0.0  ;;  %2780 = vmatprep.subr.bf16.mxu0 %v2909_v5 }
  0xbf   : > { %417 = vadd.xlane.f32.xlu1 %v397_v35  ;;  %390 = vadd.xlane.f32.xlu0 %v3246_v36  ;;  %v414_v61 = vmul.f32 %v3287_v59, %v3287_v59 }
  0xc0   : > { %2781 = vmatpush3.bf16.msra.mxu0 %v2909_v5 }
  0xc1   : > { %2782 = vmatprep.subr.bf16.mxu0 %v2910_v6 }
  0xc3   : > { %421 = vadd.xlane.f32.xlu1 %v399_v20  ;;  %415 = vadd.xlane.f32.xlu0 %v396_v37 }
  0xc4   : > { %2783 = vmatpush3.bf16.msra.mxu0 %v2910_v6 }
  0xc7   : > { %425 = vadd.xlane.f32.xlu1 %v401_v21  ;;  %419 = vadd.xlane.f32.xlu0 %v398_v38 }
  0xcb   : > { %429 = vadd.xlane.f32.xlu1 %v403_v41  ;;  %423 = vadd.xlane.f32.xlu0 %v400_v42 }
  0xcf   : > { %433 = vadd.xlane.f32.xlu1 %v405_v43  ;;  %427 = vadd.xlane.f32.xlu0 %v402_v44 }
  0xd3   : > { %437 = vadd.xlane.f32.xlu1 %v407_v45  ;;  %431 = vadd.xlane.f32.xlu0 %v404_v46 }
  0xd7   : > { %441 = vadd.xlane.f32.xlu1 %v409_v49  ;;  %435 = vadd.xlane.f32.xlu0 %v406_v50 }
  0xdb   : > { %445 = vadd.xlane.f32.xlu1 %v411_v53  ;;  %439 = vadd.xlane.f32.xlu0 %v408_v54 }
  0xdf   : > { %443 = vadd.xlane.f32.xlu0 %v410_v57  ;;  %447 = vadd.xlane.f32.xlu1 %v412_v58 }
  0xe3   : > { %394 = vadd.xlane.f32.xlu0 %v3287_v59  ;;  %451 = vadd.xlane.f32.xlu1 %v414_v61 }
  0xe7   : > { %449 = vadd.xlane.f32.xlu0 %v413_v1 }
 0x128   : > { %v359_v7 = vpop.xlane.xlu1 %358 }
 0x129   : > { %v3314_v29 = vmul.f32 0.02, %v359_v7 }
 0x12b   : > { %v491_v38 = vmul.f32 %v3314_v29, %v3314_v29 }
 0x12c   : > { %v365_v9 = vpop.xlane.xlu1 %364  ;;  %v361_v10 = vpop.xlane.xlu0 %360 }
 0x12d   : > { %v3320_v35 = vmul.f32 0.02, %v365_v9  ;;  %v3322_v20 = vmul.f32 0.02, %v361_v10 }
 0x12f   : > { %v494_v46 = vmul.f32 %v3320_v35, %v3320_v35  ;;  %v492_v50 = vmul.f32 %v3322_v20, %v3322_v20  ;;  %v587_v53 = vsub.f32 %v3170_v40, %v3322_v20 }
 0x130   : > { %v369_v11 = vpop.xlane.xlu1 %368  ;;  %v363_v12 = vpop.xlane.xlu0 %362 }
 0x131   : > { %v3324_v37 = vmul.f32 0.02, %v369_v11  ;;  %v3326_v21 = vmul.f32 0.02, %v363_v12 }
 0x133   : > { %v496_v54 = vmul.f32 %v3324_v37, %v3324_v37  ;;  %v493_v60 = vmul.f32 %v3326_v21, %v3326_v21 }
 0x134   : > { %v373_v13 = vpop.xlane.xlu1 %372  ;;  %v367_v14 = vpop.xlane.xlu0 %366 }
 0x135   : > { %v3332_v42 = vmul.f32 0.02, %v373_v13  ;;  %v3334_v43 = vmul.f32 0.02, %v367_v14 }
 0x137   : > { %v498_v1 = vmul.f32 %v3332_v42, %v3332_v42  ;;  %v495_v3 = vmul.f32 %v3334_v43, %v3334_v43 }
 0x138   : > { %v377_v17 = vpop.xlane.xlu1 %376  ;;  %v371_v18 = vpop.xlane.xlu0 %370 }
 0x139   : > { %v3348_v55 = vmul.f32 0.02, %v377_v17  ;;  %v3350_v57 = vmul.f32 0.02, %v371_v18 }
 0x13b   : > { %v3370_v13 = vmul.f32 %v3348_v55, %v3348_v55  ;;  %v3376_v17 = vmul.f32 %v3350_v57, %v3350_v57 }
 0x13c   : > { %v381_v19 = vpop.xlane.xlu1 %380  ;;  %v375_v23 = vpop.xlane.xlu0 %374 }
 0x13d   : > { %v3364_v5 = vmul.f32 0.02, %v381_v19  ;;  %v3378_v18 = vmul.f32 0.02, %v375_v23 }
 0x140   : > { %v385_v24 = vpop.xlane.xlu1 %384  ;;  %v379_v25 = vpop.xlane.xlu0 %378 }
 0x141   : > { %v3380_v19 = vmul.f32 0.02, %v385_v24  ;;  %v3390_v14 = vmul.f32 0.02, %v379_v25 }
 0x143   : > { %v3402_v25 = vmul.f32 %v3380_v19, %v3380_v19 }
 0x144   : > { %v389_v27 = vpop.xlane.xlu1 %388  ;;  %v3312_v28 = vpop.xlane.xlu0 %382 }
 0x148   : > { %v3316_v30 = vpop.xlane.xlu1 %392  ;;  %v3318_v34 = vpop.xlane.xlu0 %386 }
 0x14c   : > { %v418_v44 = vpop.xlane.xlu1 %417  ;;  %v3336_v45 = vpop.xlane.xlu0 %390 }
 0x14d   : > { %v473_v51 = vmul.f32 0.02, %v418_v44 }
 0x14f   : > { %v511_v62 = vsub.f32 %v473_v51, %v492_v50 }
 0x150   : > { %v422_v6 = vpop.xlane.xlu1 %421  ;;  %v416_v7 = vpop.xlane.xlu0 %415 }
 0x151   : > { %v530_v10 = vmax.f32 %v511_v62, 0.0  ;;  %v475_v11 = vmul.f32 0.02, %v422_v6  ;;  %v472_v12 = vmul.f32 0.02, %v416_v7  ;;  %v3386_v6 = vmul.f32 %v3364_v5, %v3364_v5 }
 0x153   : > { %v549_v44 = vadd.f32 1e-05, %v530_v10  ;;  %v513_v50 = vsub.f32 %v475_v11, %v494_v46  ;;  %v510_v51 = vsub.f32 %v472_v12, %v491_v38  ;;  %v3394_v38 = vmul.f32 %v3378_v18, %v3378_v18 }
 0x154   : > { %v426_v2 = vpop.xlane.xlu1 %425  ;;  %v420_v23 = vpop.xlane.xlu0 %419  ;;  %v3398_v11 = vmul.f32 0.02, %v389_v27 }
 0x155   : > { %2927 = vrsqrt.f32 %v549_v44  ;;  %v532_v24 = vmax.f32 %v513_v50, 0.0  ;;  %v529_v9 = vmax.f32 %v510_v51, 0.0  ;;  %v477_v10 = vmul.f32 0.02, %v426_v2 }
 0x156   : > { %v474_v12 = vmul.f32 0.02, %v420_v23  ;;  %v3408_v50 = vmul.f32 %v3390_v14, %v3390_v14  ;;  %v3411_v51 = vmul.f32 0.02, %v3312_v28 }
 0x157   : > { %v551_v7 = vadd.f32 1e-05, %v532_v24  ;;  %v548_v62 = vadd.f32 1e-05, %v529_v9  ;;  %v515_v44 = vsub.f32 %v477_v10, %v496_v54  ;;  %v3417_v9 = vmul.f32 %v3398_v11, %v3398_v11 }
 0x158   : > { %v512_v27 = vsub.f32 %v474_v12, %v493_v60  ;;  %v430_v46 = vpop.xlane.xlu1 %429  ;;  %v424_v23 = vpop.xlane.xlu0 %423  ;;  %v3420_v10 = vmul.f32 0.02, %v3316_v30 }
 0x159   : > { %2929 = vrsqrt.f32 %v551_v7  ;;  %v534_v61 = vmax.f32 %v515_v44, 0.0  ;;  %v479_v58 = vmul.f32 0.02, %v430_v46  ;;  %v476_v41 = vmul.f32 0.02, %v424_v23 }
 0x15a   : > { %2931 = vrsqrt.f32 %v548_v62  ;;  %v531_v24 = vmax.f32 %v512_v27, 0.0  ;;  %4519 = vst [vmem:[#allocation3_spill] sm:$0xff] %v3420_v10  ;;  %v3426_v46 = vmul.f32 %v3411_v51, %v3411_v51  ;;  %v3429_v44 = vmul.f32 0.02, %v3318_v34 }
 0x15b   : > { %v553_v28 = vadd.f32 1e-05, %v534_v61  ;;  %v517_v60 = vsub.f32 %v479_v58, %v498_v1  ;;  %v514_v12 = vsub.f32 %v476_v41, %v495_v3  ;;  %v3434_v58 = vmul.f32 0.02, %v3336_v45 }
 0x15c   : > { %v550_v23 = vadd.f32 1e-05, %v531_v24  ;;  %v434_v2 = vpop.xlane.xlu1 %433  ;;  %v428_v62 = vpop.xlane.xlu0 %427  ;;  %v3438_v34 = vmul.f32 %v3420_v10, %v3420_v10  ;;  %v3450_v45 = vmul.f32 %v3429_v44, %v3429_v44 }
 0x15d   : > { %2933 = vrsqrt.f32 %v553_v28  ;;  %v536_v27 = vmax.f32 %v517_v60, 0.0  ;;  %v533_v30 = vmax.f32 %v514_v12, 0.0  ;;  %v481_v54 = vmul.f32 0.02, %v434_v2  ;;  %4520 = vst [vmem:[#allocation4_spill] sm:$0xff] %v3434_v58 }
 0x15e   : > { %2935 = vrsqrt.f32 %v550_v23  ;;  %v478_v61 = vmul.f32 0.02, %v428_v62  ;;  %v3446_v2 = vld [vmem:[%s4513_s2 + $0x5] ss:$0 sm:$0xff] }
 0x15f   : > { %v2928_v1 = vpop.eup %2927  ;;  %v552_v24 = vadd.f32 1e-05, %v533_v30  ;;  %v519_v28 = vsub.f32 %v481_v54, %v3370_v13  ;;  %v555_v60 = vadd.f32 1e-05, %v536_v27  ;;  %v3456_v30 = vld [vmem:[%s4513_s2 + $0x6] ss:$0 sm:$0xff]  ;;  %v4521_v27 = vsub.f32 %v3168_v39, %v3320_v35 }
 0x160   : > { %v516_v12 = vsub.f32 %v478_v61, %v3376_v17  ;;  %v438_v23 = vpop.xlane.xlu1 %437  ;;  %v432_v62 = vpop.xlane.xlu0 %431  ;;  %v606_v13 = vmul.f32 %v2928_v1, %v587_v53  ;;  %v3465_v17 = vmul.f32 %v3434_v58, %v3434_v58 }
 0x161   : > { %v538_v3 = vmax.f32 %v519_v28, 0.0  ;;  %v483_v7 = vmul.f32 0.02, %v438_v23  ;;  %v480_v41 = vmul.f32 0.02, %v432_v62  ;;  %2937 = vrsqrt.f32 %v552_v24 }
 0x162   : > { %v535_v61 = vmax.f32 %v516_v12, 0.0  ;;  %v629_v49 = vmul.f32 %v3446_v2, %v606_v13  ;;  %2939 = vrsqrt.f32 %v555_v60 }
 0x163   : > { %v2930_v10 = vpop.eup %2929  ;;  %v557_v40 = vadd.f32 1e-05, %v538_v3  ;;  %v521_v20 = vsub.f32 %v483_v7, %v3386_v6  ;;  %v518_v53 = vsub.f32 %v480_v41, %v3394_v38  ;;  %v4522_v6 = vsub.f32 %v3160_v31, %v3314_v29 }
 0x164   : > { %v2932_v1 = vpop.eup %2931  ;;  %v554_v28 = vadd.f32 1e-05, %v535_v61  ;;  %v442_v23 = vpop.xlane.xlu1 %441  ;;  %v652_v54 = vadd.f32 %v3456_v30, %v629_v49  ;;  %v608_v12 = vmul.f32 %v2930_v10, %v4521_v27  ;;  %v4523_v31 = vsub.f32 %v3178_v47, %v3324_v37 }
 0x165   : > { %v436_v62 = vpop.xlane.xlu0 %435  ;;  %2941 = vrsqrt.f32 %v557_v40  ;;  %v540_v13 = vmax.f32 %v521_v20, 0.0  ;;  %v537_v32 = vmax.f32 %v518_v53, 0.0  ;;  %v485_v24 = vmul.f32 0.02, %v442_v23 }
 0x166   : > { %2943 = vrsqrt.f32 %v554_v28  ;;  %v482_v3 = vmul.f32 0.02, %v436_v62  ;;  %v605_v38 = vmul.f32 %v2932_v1, %v4522_v6  ;;  %v671_v7 = vmax.f32 %v652_v54, 0.0 }
 0x167   : > { %v2934_v41 = vpop.eup %2933  ;;  %v559_v60 = vadd.f32 1e-05, %v540_v13  ;;  %v556_v61 = vadd.f32 1e-05, %v537_v32  ;;  %v523_v49 = vsub.f32 %v485_v24, %v3402_v25  ;;  %v631_v58 = vmul.f32 %v3446_v2, %v608_v12 }
 0x168   : > { %v2936_v39 = vpop.eup %2935  ;;  %v520_v35 = vsub.f32 %v482_v3, %v3408_v50  ;;  %v446_v10 = vpop.xlane.xlu1 %445  ;;  %v628_v40 = vmul.f32 %v3446_v2, %v605_v38  ;;  %v690_v20 = vmul.f32 %v671_v7, %v671_v7  ;;  %v610_v29 = vmul.f32 %v2934_v41, %v4523_v31 }
 0x169   : > { %v440_v27 = vpop.xlane.xlu0 %439  ;;  %2945 = vrsqrt.f32 %v559_v60  ;;  %v542_v54 = vmax.f32 %v523_v49, 0.0  ;;  %v487_v53 = vmul.f32 0.02, %v446_v10  ;;  %v4524_v12 = vsub.f32 %v3180_v48, %v3326_v21 }
 0x16a   : > { %v484_v32 = vmul.f32 0.02, %v440_v27  ;;  %2947 = vrsqrt.f32 %v556_v61  ;;  %v539_v25 = vmax.f32 %v520_v35, 0.0  ;;  %v651_v1 = vadd.f32 %v3456_v30, %v628_v40 }
 0x16b   : > { %v709_v28 = vmul.f32 %v690_v20, %v671_v7  ;;  %v561_v23 = vadd.f32 1e-05, %v542_v54  ;;  %v525_v50 = vsub.f32 %v487_v53, %v3417_v9  ;;  %v607_v13 = vmul.f32 %v2936_v39, %v4524_v12  ;;  %v2938_v41 = vpop.eup %2937 }
 0x16c   : > { %v522_v62 = vsub.f32 %v484_v32, %v3426_v46  ;;  %v558_v47 = vadd.f32 1e-05, %v539_v25  ;;  %v448_v37 = vpop.xlane.xlu1 %447  ;;  %v670_v3 = vmax.f32 %v651_v1, 0.0  ;;  %v654_v6 = vadd.f32 %v3456_v30, %v631_v58  ;;  %v2940_v9 = vpop.eup %2939 }
 0x16d   : > { %v444_v24 = vpop.xlane.xlu0 %443  ;;  %v633_v38 = vmul.f32 %v3446_v2, %v610_v29  ;;  %2949 = vrsqrt.f32 %v561_v23  ;;  %v544_v7 = vmax.f32 %v525_v50, 0.0  ;;  %v488_v61 = vmul.f32 0.02, %v448_v37 }
 0x16e   : > { %v541_v60 = vmax.f32 %v522_v62, 0.0  ;;  %2951 = vrsqrt.f32 %v558_v47  ;;  %v486_v46 = vmul.f32 0.02, %v444_v24  ;;  %v689_v49 = vmul.f32 %v670_v3, %v670_v3 }
 0x16f   : > { %v630_v48 = vmul.f32 %v3446_v2, %v607_v13  ;;  %v2942_v21 = vpop.eup %2941  ;;  %v563_v39 = vadd.f32 1e-05, %v544_v7  ;;  %v526_v10 = vsub.f32 %v488_v61, %v3465_v17  ;;  %v673_v27 = vmax.f32 %v654_v6, 0.0 }
 0x170   : > { %v560_v35 = vadd.f32 1e-05, %v541_v60  ;;  %v2944_v58 = vpop.eup %2943  ;;  %v524_v40 = vsub.f32 %v486_v46, %v3450_v45  ;;  %v452_v20 = vpop.xlane.xlu1 %451  ;;  %v708_v29 = vmul.f32 %v689_v49, %v670_v3  ;;  %v4525_v53 = vsub.f32 %v3185_v52, %v3334_v43 }
 0x171   : > { %v395_v31 = vpop.xlane.xlu0 %394  ;;  %v653_v54 = vadd.f32 %v3456_v30, %v630_v48  ;;  %2953 = vrsqrt.f32 %v563_v39  ;;  %v545_v25 = vmax.f32 %v526_v10, 0.0  ;;  %v490_v1 = vmul.f32 0.02, %v452_v20 }
 0x172   : > { %v609_v32 = vmul.f32 %v2938_v41, %v4525_v53  ;;  %v3501_v23 = vmul.f32 0.02, %v395_v31  ;;  %2955 = vrsqrt.f32 %v560_v35  ;;  %v543_v17 = vmax.f32 %v524_v40, 0.0 }
 0x173   : > { %v744_v50 = vpack.c.bf16 %v709_v28, %v708_v29  ;;  %v672_v62 = vmax.f32 %v653_v54, 0.0  ;;  %v2946_v12 = vpop.eup %2945  ;;  %v564_v45 = vadd.f32 1e-05, %v545_v25  ;;  %v692_v37 = vmul.f32 %v673_v27, %v673_v27 }
 0x174   : > { %v509_v13 = vmul.f32 %v3501_v23, %v3501_v23  ;;  %v604_v47 = vsub.f32 %v3287_v59, %v3501_v23  ;;  %v2948_v52 = vpop.eup %2947  ;;  %v562_v43 = vadd.f32 1e-05, %v543_v17  ;;  %v632_v6 = vmul.f32 %v3446_v2, %v609_v32 }
 0x175   : > { %2784 = vmatprep.mubr.bf16.mxu0 %v744_v50  ;;  %v450_v24 = vpop.xlane.xlu0 %449  ;;  %v691_v3 = vmul.f32 %v672_v62, %v672_v62  ;;  %v656_v41 = vadd.f32 %v3456_v30, %v633_v38  ;;  %2957 = vrsqrt.f32 %v564_v45  ;;  %v711_v60 = vmul.f32 %v692_v37, %v673_v27 }
 0x176   : > { %v528_v28 = vsub.f32 %v490_v1, %v509_v13  ;;  %v489_v7 = vmul.f32 0.02, %v450_v24  ;;  %2959 = vrsqrt.f32 %v562_v43  ;;  %v655_v46 = vadd.f32 %v3456_v30, %v632_v6 }
 0x177   : > { %v710_v61 = vmul.f32 %v691_v3, %v672_v62  ;;  %v675_v49 = vmax.f32 %v656_v41, 0.0  ;;  %v2950_v48 = vpop.eup %2949  ;;  %v4526_v10 = vsub.f32 %v3200_v0, %v3350_v57  ;;  %v4527_v38 = vsub.f32 %v3190_v56, %v3332_v42 }
 0x178   : > { %v547_v39 = vmax.f32 %v528_v28, 0.0  ;;  %v527_v35 = vsub.f32 %v489_v7, %v3438_v34  ;;  %v2952_v31 = vpop.eup %2951  ;;  %v674_v27 = vmax.f32 %v655_v46, 0.0  ;;  %v4528_v53 = vsub.f32 %v3205_v4, %v3378_v18 }
 0x179   : > { %v611_v40 = vmul.f32 %v2944_v58, %v4526_v10  ;;  %v612_v20 = vmul.f32 %v2940_v9, %v4527_v38  ;;  %v745_v29 = vpack.c.bf16 %v711_v60, %v710_v61  ;;  %v694_v54 = vmul.f32 %v675_v49, %v675_v49 }
 0x17a   : > { %v613_v32 = vmul.f32 %v2948_v52, %v4528_v53  ;;  %v566_v25 = vadd.f32 1e-05, %v547_v39  ;;  %v546_v1 = vmax.f32 %v527_v35, 0.0  ;;  %v693_v0 = vmul.f32 %v674_v27, %v674_v27 }
 0x17b   : > { %v634_v34 = vmul.f32 %v3446_v2, %v611_v40  ;;  %v635_v17 = vmul.f32 %v3446_v2, %v612_v20  ;;  %2785 = vmatmul.mubr.bf16.vlgmr.msra.gmra.mrb[0].mxu0 %v745_v29  ;;  %v713_v57 = vmul.f32 %v694_v54, %v675_v49  ;;  %v4529_v56 = vsub.f32 %v3198_v63, %v3348_v55  ;;  %v2954_v58 = vpop.eup %2953 }
 0x17c   : > { %v636_v9 = vmul.f32 %v3446_v2, %v613_v32  ;;  %2961 = vrsqrt.f32 %v566_v25  ;;  %v565_v50 = vadd.f32 1e-05, %v546_v1  ;;  %v2956_v62 = vpop.eup %2955  ;;  %v712_v45 = vmul.f32 %v693_v0, %v674_v27 }
 0x17d   : > { %v614_v42 = vmul.f32 %v2942_v21, %v4529_v56  ;;  %v657_v4 = vadd.f32 %v3456_v30, %v634_v34  ;;  %v658_v18 = vadd.f32 %v3456_v30, %v635_v17  ;;  %v4530_v52 = vsub.f32 %v3220_v16, %v3390_v14 }
 0x17e   : > { %v659_v37 = vadd.f32 %v3456_v30, %v636_v9  ;;  %2963 = vrsqrt.f32 %v565_v50  ;;  %v4531_v43 = vsub.f32 %v3210_v8, %v3364_v5  ;;  %v746_v3 = vpack.c.bf16 %v713_v57, %v712_v45 }
 0x17f   : > { %v637_v13 = vmul.f32 %v3446_v2, %v614_v42  ;;  %v615_v63 = vmul.f32 %v2952_v31, %v4530_v52  ;;  %v676_v55 = vmax.f32 %v657_v4, 0.0  ;;  %v677_v21 = vmax.f32 %v658_v18, 0.0  ;;  %v2958_v7 = vpop.eup %2957  ;;  %v4536_v42 = vld [vmem:[#allocation4_spill] sm:$0xff]  ;;  %v4539_v52 = vld [vmem:[#allocation3_spill] sm:$0xff] }
 0x180   : > { %v616_v24 = vmul.f32 %v2946_v12, %v4531_v43  ;;  %v678_v41 = vmax.f32 %v659_v37, 0.0  ;;  %v4532_v16 = vsub.f32 %v3225_v22, %v3411_v51  ;;  %v2960_v49 = vpop.eup %2959  ;;  %2788 = vmatprep.mubr.bf16.mxu0 %v746_v3  ;;  %v4533_v12 = vsub.f32 %v3218_v15, %v3380_v19 }
 0x181   : > { %v660_v6 = vadd.f32 %v3456_v30, %v637_v13  ;;  %v638_v28 = vmul.f32 %v3446_v2, %v615_v63  ;;  %v695_v60 = vmul.f32 %v676_v55, %v676_v55  ;;  %v696_v61 = vmul.f32 %v677_v21, %v677_v21 }
 0x182   : > { %v639_v46 = vmul.f32 %v3446_v2, %v616_v24  ;;  %v617_v14 = vmul.f32 %v2956_v62, %v4532_v16  ;;  %v697_v8 = vmul.f32 %v678_v41, %v678_v41  ;;  %v618_v35 = vmul.f32 %v2950_v48, %v4533_v12 }
 0x183   : > { %v679_v39 = vmax.f32 %v660_v6, 0.0  ;;  %v661_v5 = vadd.f32 %v3456_v30, %v638_v28  ;;  %v714_v10 = vmul.f32 %v695_v60, %v676_v55  ;;  %v715_v40 = vmul.f32 %v696_v61, %v677_v21 }
 0x184   : > { %v662_v38 = vadd.f32 %v3456_v30, %v639_v46  ;;  %v640_v20 = vmul.f32 %v3446_v2, %v617_v14  ;;  %v716_v29 = vmul.f32 %v697_v8, %v678_v41  ;;  %v641_v51 = vmul.f32 %v3446_v2, %v618_v35 }
 0x185   : > { %v698_v31 = vmul.f32 %v679_v39, %v679_v39  ;;  %v680_v22 = vmax.f32 %v661_v5, 0.0  ;;  %v747_v27 = vpack.c.bf16 %v715_v40, %v714_v10  ;;  %v4534_v32 = vsub.f32 %v3239_v33, %v3429_v44 }
 0x186   : > { %v681_v54 = vmax.f32 %v662_v38, 0.0  ;;  %v663_v53 = vadd.f32 %v3456_v30, %v640_v20  ;;  %v664_v25 = vadd.f32 %v3456_v30, %v641_v51  ;;  %v4535_v1 = vsub.f32 %v3230_v26, %v3398_v11  ;;  %v2962_v17 = vpop.eup %2961 }
 0x187   : > { %v619_v15 = vmul.f32 %v2960_v49, %v4534_v32  ;;  %v717_v19 = vmul.f32 %v698_v31, %v679_v39  ;;  %v699_v48 = vmul.f32 %v680_v22, %v680_v22  ;;  %2789 = vmatmul.mubr.bf16.gmra.mrb[4].mxu0 %v747_v27  ;;  %v4537_v9 = vsub.f32 %v3246_v36, %v4536_v42  ;;  %v4538_v36 = vld [vmem:[#allocation2_spill] sm:$0xff] }
 0x188   : > { %v620_v34 = vmul.f32 %v2954_v58, %v4535_v1  ;;  %v700_v0 = vmul.f32 %v681_v54, %v681_v54  ;;  %v682_v57 = vmax.f32 %v663_v53, 0.0  ;;  %v623_v33 = vmul.f32 %v2962_v17, %v604_v47  ;;  %v2964_v62 = vpop.eup %2963 }
 0x189   : > { %v642_v56 = vmul.f32 %v3446_v2, %v619_v15  ;;  %v621_v50 = vmul.f32 %v2958_v7, %v4537_v9  ;;  %v748_v44 = vpack.c.bf16 %v717_v19, %v716_v29  ;;  %v718_v4 = vmul.f32 %v699_v48, %v680_v22 }
 0x18a   : > { %v683_v18 = vmax.f32 %v664_v25, 0.0  ;;  %v719_v26 = vmul.f32 %v700_v0, %v681_v54  ;;  %v701_v11 = vmul.f32 %v682_v57, %v682_v57  ;;  %v643_v58 = vmul.f32 %v3446_v2, %v620_v34 }
 0x18b   : > { %v665_v45 = vadd.f32 %v3456_v30, %v642_v56  ;;  %v646_v13 = vmul.f32 %v3446_v2, %v623_v33  ;;  %2792 = vmatprep.mubr.bf16.mxu0 %v748_v44  ;;  %v4540_v63 = vsub.f32 %v4538_v36, %v4539_v52  ;;  %v644_v59 = vmul.f32 %v3446_v2, %v621_v50 }
 0x18c   : > { %v702_v37 = vmul.f32 %v683_v18, %v683_v18  ;;  %v749_v23 = vpack.c.bf16 %v719_v26, %v718_v4  ;;  %v720_v47 = vmul.f32 %v701_v11, %v682_v57  ;;  %v666_v21 = vadd.f32 %v3456_v30, %v643_v58 }
 0x18d   : > { %v622_v55 = vmul.f32 %v2964_v62, %v4540_v63  ;;  %v684_v43 = vmax.f32 %v665_v45, 0.0  ;;  %v667_v6 = vadd.f32 %v3456_v30, %v644_v59  ;;  %v669_v7 = vadd.f32 %v3456_v30, %v646_v13 }
 0x18e   : > { %v721_v24 = vmul.f32 %v702_v37, %v683_v18  ;;  %v685_v41 = vmax.f32 %v666_v21, 0.0 }
 0x18f   : > { %v645_v3 = vmul.f32 %v3446_v2, %v622_v55  ;;  %v703_v28 = vmul.f32 %v684_v43, %v684_v43  ;;  %v686_v46 = vmax.f32 %v667_v6, 0.0  ;;  %2793 = vmatmul.mubr.bf16.gmra.mrb[8].mxu0 %v749_v23  ;;  %v688_v5 = vmax.f32 %v669_v7, 0.0 }
 0x190   : > { %v750_v60 = vpack.c.bf16 %v721_v24, %v720_v47  ;;  %v704_v16 = vmul.f32 %v685_v41, %v685_v41 }
 0x191   : > { %v668_v61 = vadd.f32 %v3456_v30, %v645_v3  ;;  %v722_v14 = vmul.f32 %v703_v28, %v684_v43  ;;  %v705_v39 = vmul.f32 %v686_v46, %v686_v46  ;;  %v707_v40 = vmul.f32 %v688_v5, %v688_v5  ;;  %v3579_v30 = vld [vmem:[%s4513_s2 + $0x2] ss:$0 sm:$0xff] }
 0x192   : > { %2796 = vmatprep.mubr.bf16.mxu0 %v750_v60  ;;  %v723_v8 = vmul.f32 %v704_v16, %v685_v41 }
 0x193   : > { %v687_v49 = vmax.f32 %v668_v61, 0.0  ;;  %v724_v35 = vmul.f32 %v705_v39, %v686_v46  ;;  %v726_v20 = vmul.f32 %v707_v40, %v688_v5  ;;  %v2911_v5 = vld [vmem:[%s4512_s1 + $0x40] sm:$0xff]  }
 0x194   : > { %v751_v2 = vpack.c.bf16 %v723_v8, %v722_v14  ;;  %2804 = vmatprep.subr.bf16.mxu1 %v2911_v5 }
 0x195   : > { %v706_v12 = vmul.f32 %v687_v49, %v687_v49  ;;  %v753_v31 = vpack.c.bf16 %v726_v20, %v726_v20  ;;  %2805 = vmatpush3.bf16.msra.mxu1 %v2911_v5  ;;  %v2913_v20 = vld [vmem:[%s4512_s1 + $0x50] sm:$0xff]  }
 0x197   : > { %v725_v10 = vmul.f32 %v706_v12, %v687_v49  ;;  %2797 = vmatmul.mubr.bf16.gmra.mrb[12].mxu0 %v751_v2  ;;  %v2912_v2 = vld [vmem:[%s4512_s1 + $0x48] sm:$0xff]  }
 0x198   : > { %2806 = vmatprep.subr.bf16.mxu1 %v2912_v2 }
 0x199   : > { %v752_v38 = vpack.c.bf16 %v725_v10, %v724_v35  ;;  %2807 = vmatpush3.bf16.msra.mxu1 %v2912_v2 }
 0x19a   : > { %2808 = vmatprep.subr.bf16.mxu1 %v2913_v20 }
 0x19b   : > { %2800 = vmatprep.mubr.bf16.mxu0 %v752_v38 }
 0x19d   : > { %2809 = vmatpush3.bf16.msra.mxu1 %v2913_v20 }
 0x19f   : > { %2801 = vmatmul.mubr.bf16.gmra.mrb[16].mxu0 %v753_v31 }
 0x24e   : > { %v2786_v29 = vpop.f32.mrb[0].mxu0 }
 0x24f   : > { %v849_v22 = vadd.f32 %v2786_v29, %v3579_v30  ;;  %v840_v51 = vpop.f32.mrb[1].mxu0 }
 0x250   : > { %v2787_v27 = vpop.f32.mrb[2].mxu0  ;;  %v841_v53 = vadd.f32 %v3579_v30, %v840_v51 }
 0x251   : > { %v3582_v54 = vmax.f32 %v849_v22, 0.0  ;;  %v852_v32 = vadd.f32 %v2787_v27, %v3579_v30  ;;  %v843_v15 = vpop.f32.mrb[3].mxu0  ;;  %v2914_v27 = vld [vmem:[%s4512_s1 + $0x58] sm:$0xff]  }
 0x252   : > { %v844_v48 = vadd.f32 %v3579_v30, %v843_v15  ;;  %v3590_v25 = vmax.f32 %v841_v53, 0.0  ;;  %2810 = vmatprep.subr.bf16.mxu1 %v2914_v27 }
 0x253   : > { %v3586_v19 = vmax.f32 %v852_v32, 0.0  ;;  %943 = vadd.xlane.f32.xlu0 %v3582_v54  ;;  %v979_v17 = vmul.f32 %v3582_v54, %v3582_v54  ;;  %2811 = vmatpush3.bf16.msra.mxu1 %v2914_v27 }
 0x254   : > { %v3593_v1 = vmax.f32 %v844_v48, 0.0  ;;  %v977_v50 = vmul.f32 %v3590_v25, %v3590_v25  ;;  %v2915_v48 = vld [vmem:[%s4512_s1 + $0x60] sm:$0xff]  }
 0x255   : > { %945 = vadd.xlane.f32.xlu1 %v3586_v19  ;;  %v980_v56 = vmul.f32 %v3586_v19, %v3586_v19  ;;  %2812 = vmatprep.subr.bf16.mxu1 %v2915_v48 }
 0x256   : > { %v978_v44 = vmul.f32 %v3593_v1, %v3593_v1 }
 0x257   : > { %939 = vadd.xlane.f32.xlu0 %v3590_v25  ;;  %2813 = vmatpush3.bf16.msra.mxu1 %v2915_v48 }
 0x259   : > { %941 = vadd.xlane.f32.xlu1 %v3593_v1 }
 0x25a   : > { %v2790_v34 = vpop.f32.mrb[4].mxu0 }
 0x25b   : > { %v856_v0 = vpop.f32.mrb[5].mxu0  ;;  %1000 = vadd.xlane.f32.xlu0 %v979_v17  ;;  %v865_v9 = vadd.f32 %v2790_v34, %v3579_v30 }
 0x25c   : > { %v2791_v57 = vpop.f32.mrb[6].mxu0  ;;  %v857_v18 = vadd.f32 %v3579_v30, %v856_v0 }
 0x25d   : > { %v859_v42 = vpop.f32.mrb[7].mxu0  ;;  %1002 = vadd.xlane.f32.xlu1 %v980_v56  ;;  %v868_v33 = vadd.f32 %v2791_v57, %v3579_v30  ;;  %v3607_v4 = vmax.f32 %v865_v9, 0.0  ;;  %v2917_v56 = vld [vmem:[%s4512_s1 + $0x70] sm:$0xff]  }
 0x25e   : > { %v860_v58 = vadd.f32 %v3579_v30, %v859_v42  ;;  %v3614_v37 = vmax.f32 %v857_v18, 0.0 }
 0x25f   : > { %996 = vadd.xlane.f32.xlu0 %v977_v50  ;;  %v3610_v11 = vmax.f32 %v868_v33, 0.0  ;;  %v983_v63 = vmul.f32 %v3607_v4, %v3607_v4  ;;  %v2918_v50 = vld [vmem:[%s4512_s1 + $0x78] sm:$0xff]  }
 0x260   : > { %v3617_v36 = vmax.f32 %v860_v58, 0.0  ;;  %v981_v43 = vmul.f32 %v3614_v37, %v3614_v37 }
 0x261   : > { %998 = vadd.xlane.f32.xlu1 %v978_v44  ;;  %v984_v23 = vmul.f32 %v3610_v11, %v3610_v11 }
 0x262   : > { %v2794_v62 = vpop.f32.mrb[8].mxu0  ;;  %v982_v3 = vmul.f32 %v3617_v36, %v3617_v36 }
 0x263   : > { %v872_v26 = vpop.f32.mrb[9].mxu0  ;;  %951 = vadd.xlane.f32.xlu0 %v3607_v4  ;;  %v881_v21 = vadd.f32 %v2794_v62, %v3579_v30 }
 0x264   : > { %v2795_v45 = vpop.f32.mrb[10].mxu0  ;;  %v873_v41 = vadd.f32 %v3579_v30, %v872_v26 }
 0x265   : > { %v875_v13 = vpop.f32.mrb[11].mxu0  ;;  %953 = vadd.xlane.f32.xlu1 %v3610_v11  ;;  %v884_v24 = vadd.f32 %v2795_v45, %v3579_v30  ;;  %v3631_v6 = vmax.f32 %v881_v21, 0.0 }
 0x266   : > { %v876_v46 = vadd.f32 %v3579_v30, %v875_v13  ;;  %v3640_v39 = vmax.f32 %v873_v41, 0.0 }
 0x267   : > { %947 = vadd.xlane.f32.xlu0 %v3614_v37  ;;  %v3635_v61 = vmax.f32 %v884_v24, 0.0  ;;  %v987_v35 = vmul.f32 %v3631_v6, %v3631_v6 }
 0x268   : > { %v3647_v12 = vmax.f32 %v876_v46, 0.0  ;;  %v985_v38 = vmul.f32 %v3640_v39, %v3640_v39 }
 0x269   : > { %949 = vadd.xlane.f32.xlu1 %v3617_v36  ;;  %v988_v10 = vmul.f32 %v3635_v61, %v3635_v61 }
 0x26a   : > { %v2798_v52 = vpop.f32.mrb[12].mxu0  ;;  %v986_v29 = vmul.f32 %v3647_v12, %v3647_v12 }
 0x26b   : > { %v888_v55 = vpop.f32.mrb[13].mxu0  ;;  %1008 = vadd.xlane.f32.xlu0 %v983_v63  ;;  %v897_v40 = vadd.f32 %v2798_v52, %v3579_v30 }
 0x26c   : > { %v2799_v59 = vpop.f32.mrb[14].mxu0  ;;  %v889_v51 = vadd.f32 %v3579_v30, %v888_v55 }
 0x26d   : > { %v891_v47 = vpop.f32.mrb[15].mxu0  ;;  %1010 = vadd.xlane.f32.xlu1 %v984_v23  ;;  %v900_v31 = vadd.f32 %v2799_v59, %v3579_v30  ;;  %v3667_v22 = vmax.f32 %v897_v40, 0.0 }
 0x26e   : > { %v892_v32 = vadd.f32 %v3579_v30, %v891_v47  ;;  %v3677_v15 = vmax.f32 %v889_v51, 0.0 }
 0x26f   : > { %1004 = vadd.xlane.f32.xlu0 %v981_v43  ;;  %v3673_v53 = vmax.f32 %v900_v31, 0.0  ;;  %v991_v17 = vmul.f32 %v3667_v22, %v3667_v22 }
 0x270   : > { %v3683_v34 = vmax.f32 %v892_v32, 0.0  ;;  %v989_v57 = vmul.f32 %v3677_v15, %v3677_v15 }
 0x271   : > { %1006 = vadd.xlane.f32.xlu1 %v982_v3  ;;  %v992_v0 = vmul.f32 %v3673_v53, %v3673_v53 }
 0x272   : > { %v2802_v28 = vpop.f32.mrb[16].mxu0  ;;  %v990_v42 = vmul.f32 %v3683_v34, %v3683_v34 }
 0x273   : > { %v913_v7 = vadd.f32 %v2802_v28, %v3579_v30  ;;  %v904_v60 = vpop.f32.mrb[17].mxu0  ;;  %959 = vadd.xlane.f32.xlu0 %v3631_v6 }
 0x274   : > { %v905_v16 = vadd.f32 %v3579_v30, %v904_v60  ;;  %v2803_v14 = vpop.f32.mrb[18].mxu0 }
 0x275   : > { %v907_v49 = vpop.f32.mrb[19].mxu0  ;;  %961 = vadd.xlane.f32.xlu1 %v3635_v61  ;;  %v3701_v9 = vmax.f32 %v913_v7, 0.0 }
 0x276   : > { %v908_v8 = vadd.f32 %v3579_v30, %v907_v49  ;;  %v2916_v30 = vld [vmem:[%s4512_s1 + $0x68] sm:$0xff]   ;;  %v3706_v33 = vmax.f32 %v905_v16, 0.0 }
 0x277   : > { %955 = vadd.xlane.f32.xlu0 %v3640_v39  ;;  %2814 = vmatprep.subr.bf16.mxu1 %v2916_v30  ;;  %v995_v26 = vmul.f32 %v3701_v9, %v3701_v9 }
 0x278   : > { %2815 = vmatpush3.bf16.msra.mxu1 %v2916_v30  ;;  %v3708_v44 = vmax.f32 %v908_v8, 0.0  ;;  %v993_v18 = vmul.f32 %v3706_v33, %v3706_v33 }
 0x279   : > { %957 = vadd.xlane.f32.xlu1 %v3647_v12  ;;  %2816 = vmatprep.subr.bf16.mxu1 %v2917_v56 }
 0x27a   : > { %v994_v62 = vmul.f32 %v3708_v44, %v3708_v44 }
 0x27b   : > { %1016 = vadd.xlane.f32.xlu0 %v987_v35 }
 0x27c   : > { %2817 = vmatpush3.bf16.msra.mxu1 %v2917_v56 }
 0x27d   : > { %1018 = vadd.xlane.f32.xlu1 %v988_v10  ;;  %2818 = vmatprep.subr.bf16.mxu1 %v2918_v50 }
 0x27f   : > { %1012 = vadd.xlane.f32.xlu0 %v985_v38 }
 0x280   : > { %2819 = vmatpush3.bf16.msra.mxu1 %v2918_v50 }
 0x281   : > { %1014 = vadd.xlane.f32.xlu1 %v986_v29 }
 0x283   : > { %967 = vadd.xlane.f32.xlu0 %v3667_v22 }
 0x285   : > { %969 = vadd.xlane.f32.xlu1 %v3673_v53 }
 0x287   : > { %963 = vadd.xlane.f32.xlu0 %v3677_v15 }
 0x289   : > { %965 = vadd.xlane.f32.xlu1 %v3683_v34 }
 0x28b   : > { %1024 = vadd.xlane.f32.xlu0 %v991_v17 }
 0x28d   : > { %1026 = vadd.xlane.f32.xlu1 %v992_v0 }
 0x28f   : > { %1020 = vadd.xlane.f32.xlu0 %v989_v57 }
 0x291   : > { %1022 = vadd.xlane.f32.xlu1 %v990_v42 }
 0x293   : > { %975 = vadd.xlane.f32.xlu0 %v3701_v9 }
 0x295   : > { %973 = vadd.xlane.f32.xlu1 %v3708_v44 }
 0x297   : > { %971 = vadd.xlane.f32.xlu0 %v3706_v33 }
 0x299   : > { %1028 = vadd.xlane.f32.xlu1 %v993_v18 }
 0x29b   : > { %1030 = vadd.xlane.f32.xlu0 %v994_v62 }
 0x29d   : > { %1032 = vadd.xlane.f32.xlu1 %v995_v26 }
 0x2e0   : > { %v944_v58 = vpop.xlane.xlu0 %943 }
 0x2e1   : > { %v1036_v52 = vmul.f32 0.02, %v944_v58 }
 0x2e2   : > { %v946_v45 = vpop.xlane.xlu1 %945 }
 0x2e3   : > { %v1037_v55 = vmul.f32 0.02, %v946_v45  ;;  %v1074_v23 = vmul.f32 %v1036_v52, %v1036_v52  ;;  %v1169_v18 = vsub.f32 %v3582_v54, %v1036_v52 }
 0x2e4   : > { %v940_v13 = vpop.xlane.xlu0 %939 }
 0x2e5   : > { %v3719_v47 = vmul.f32 0.02, %v940_v13  ;;  %v1075_v3 = vmul.f32 %v1037_v55, %v1037_v55 }
 0x2e6   : > { %v942_v63 = vpop.xlane.xlu1 %941 }
 0x2e7   : > { %v3721_v43 = vmul.f32 0.02, %v942_v63  ;;  %v1072_v60 = vmul.f32 %v3719_v47, %v3719_v47 }
 0x2e8   : > { %v1001_v59 = vpop.xlane.xlu0 %1000 }
 0x2e9   : > { %v1055_v21 = vmul.f32 0.02, %v1001_v59  ;;  %v1073_v49 = vmul.f32 %v3721_v43, %v3721_v43  ;;  %v3743_v59 = vld [vmem:[%s4513_s2 + $0x7] ss:$0 sm:$0xff] }
 0x2ea   : > { %v1003_v24 = vpop.xlane.xlu1 %1002 }
 0x2eb   : > { %v1093_v41 = vsub.f32 %v1055_v21, %v1074_v23  ;;  %v1056_v28 = vmul.f32 0.02, %v1003_v24  ;;  %v1170_v23 = vsub.f32 %v3586_v19, %v1037_v55  ;;  %v3755_v19 = vld [vmem:[%s4513_s2 + $0x8] ss:$0 sm:$0xff] }
 0x2ec   : > { %v997_v7 = vpop.xlane.xlu0 %996 }
 0x2ed   : > { %v1112_v46 = vmax.f32 %v1093_v41, 0.0  ;;  %v1094_v16 = vsub.f32 %v1056_v28, %v1075_v3  ;;  %v1053_v14 = vmul.f32 0.02, %v997_v7  ;;  %v1167_v7 = vsub.f32 %v3590_v25, %v3719_v47 }
 0x2ee   : > { %v999_v8 = vpop.xlane.xlu1 %998  ;;  %v1168_v25 = vsub.f32 %v3593_v1, %v3721_v43 }
 0x2ef   : > { %v1131_v5 = vadd.f32 1e-05, %v1112_v46  ;;  %v1113_v2 = vmax.f32 %v1094_v16, 0.0  ;;  %v1091_v35 = vsub.f32 %v1053_v14, %v1072_v60  ;;  %v1054_v10 = vmul.f32 0.02, %v999_v8 }
 0x2f0   : > { %v952_v40 = vpop.xlane.xlu0 %951 }
 0x2f1   : > { %2965 = vrsqrt.f32 %v1131_v5  ;;  %v1132_v38 = vadd.f32 1e-05, %v1113_v2  ;;  %v1110_v20 = vmax.f32 %v1091_v35, 0.0  ;;  %v1092_v31 = vsub.f32 %v1054_v10, %v1073_v49 }
 0x2f2   : > { %v954_v29 = vpop.xlane.xlu1 %953  ;;  %v3727_v30 = vmul.f32 0.02, %v952_v40 }
 0x2f3   : > { %2967 = vrsqrt.f32 %v1132_v38  ;;  %v1129_v51 = vadd.f32 1e-05, %v1110_v20  ;;  %v1111_v27 = vmax.f32 %v1092_v31, 0.0  ;;  %v3729_v0 = vmul.f32 0.02, %v954_v29 }
 0x2f4   : > { %v948_v32 = vpop.xlane.xlu0 %947  ;;  %v1078_v56 = vmul.f32 %v3727_v30, %v3727_v30 }
 0x2f5   : > { %2969 = vrsqrt.f32 %v1129_v51  ;;  %v1130_v48 = vadd.f32 1e-05, %v1111_v27  ;;  %v3733_v42 = vmul.f32 0.02, %v948_v32  ;;  %v1079_v45 = vmul.f32 %v3729_v0, %v3729_v0 }
 0x2f6   : > { %v950_v17 = vpop.xlane.xlu1 %949 }
 0x2f7   : > { %2971 = vrsqrt.f32 %v1130_v48  ;;  %v3736_v62 = vmul.f32 0.02, %v950_v17  ;;  %v1076_v54 = vmul.f32 %v3733_v42, %v3733_v42 }
 0x2f8   : > { %v1009_v57 = vpop.xlane.xlu0 %1008 }
 0x2f9   : > { %v1059_v50 = vmul.f32 0.02, %v1009_v57  ;;  %v1077_v60 = vmul.f32 %v3736_v62, %v3736_v62 }
 0x2fa   : > { %v1011_v26 = vpop.xlane.xlu1 %1010 }
 0x2fb   : > { %v2966_v58 = vpop.eup %2965  ;;  %v1097_v13 = vsub.f32 %v1059_v50, %v1078_v56  ;;  %v1060_v63 = vmul.f32 0.02, %v1011_v26 }
 0x2fc   : > { %v1005_v21 = vpop.xlane.xlu0 %1004  ;;  %v1188_v24 = vmul.f32 %v2966_v58, %v1169_v18 }
 0x2fd   : > { %v2968_v3 = vpop.eup %2967  ;;  %v1116_v52 = vmax.f32 %v1097_v13, 0.0  ;;  %v1098_v41 = vsub.f32 %v1060_v63, %v1079_v45  ;;  %v1057_v28 = vmul.f32 0.02, %v1005_v21 }
 0x2fe   : > { %v1007_v46 = vpop.xlane.xlu1 %1006  ;;  %v1189_v55 = vmul.f32 %v2968_v3, %v1170_v23  ;;  %v1211_v16 = vmul.f32 %v3743_v59, %v1188_v24  ;;  %v1173_v24 = vsub.f32 %v3607_v4, %v3727_v30  ;;  %v1174_v3 = vsub.f32 %v3610_v11, %v3729_v0 }
 0x2ff   : > { %v2970_v14 = vpop.eup %2969  ;;  %v1135_v49 = vadd.f32 1e-05, %v1116_v52  ;;  %v1117_v8 = vmax.f32 %v1098_v41, 0.0  ;;  %v1095_v5 = vsub.f32 %v1057_v28, %v1076_v54  ;;  %v1058_v2 = vmul.f32 0.02, %v1007_v46 }
 0x300   : > { %v960_v47 = vpop.xlane.xlu0 %959  ;;  %v1186_v35 = vmul.f32 %v2970_v14, %v1167_v7  ;;  %v1212_v10 = vmul.f32 %v3743_v59, %v1189_v55  ;;  %v1234_v32 = vadd.f32 %v3755_v19, %v1211_v16  ;;  %v1171_v55 = vsub.f32 %v3614_v37, %v3733_v42 }
 0x301   : > { %v2972_v40 = vpop.eup %2971  ;;  %2973 = vrsqrt.f32 %v1135_v49  ;;  %v1136_v38 = vadd.f32 1e-05, %v1117_v8  ;;  %v1114_v20 = vmax.f32 %v1095_v5, 0.0  ;;  %v1096_v31 = vsub.f32 %v1058_v2, %v1077_v60 }
 0x302   : > { %v962_v29 = vpop.xlane.xlu1 %961  ;;  %v1187_v51 = vmul.f32 %v2972_v40, %v1168_v25  ;;  %v1209_v27 = vmul.f32 %v3743_v59, %v1186_v35  ;;  %v1235_v1 = vadd.f32 %v3755_v19, %v1212_v10  ;;  %v3766_v18 = vmul.f32 0.02, %v960_v47 }
 0x303   : > { %2975 = vrsqrt.f32 %v1136_v38  ;;  %v1133_v48 = vadd.f32 1e-05, %v1114_v20  ;;  %v1115_v17 = vmax.f32 %v1096_v31, 0.0  ;;  %v3768_v26 = vmul.f32 0.02, %v962_v29 }
 0x304   : > { %v956_v43 = vpop.xlane.xlu0 %955  ;;  %v1210_v57 = vmul.f32 %v3743_v59, %v1187_v51  ;;  %v1232_v56 = vadd.f32 %v3755_v19, %v1209_v27  ;;  %v1253_v63 = vmax.f32 %v1234_v32, 0.0  ;;  %v1254_v21 = vmax.f32 %v1235_v1, 0.0 }
 0x305   : > { %2977 = vrsqrt.f32 %v1133_v48  ;;  %v1134_v50 = vadd.f32 1e-05, %v1115_v17  ;;  %v3771_v23 = vmul.f32 0.02, %v956_v43  ;;  %v1082_v28 = vmul.f32 %v3766_v18, %v3766_v18 }
 0x306   : > { %v958_v58 = vpop.xlane.xlu1 %957  ;;  %v1233_v45 = vadd.f32 %v3755_v19, %v1210_v57  ;;  %v1251_v13 = vmax.f32 %v1232_v56, 0.0  ;;  %v1272_v46 = vmul.f32 %v1253_v63, %v1253_v63  ;;  %v1083_v16 = vmul.f32 %v3768_v26, %v3768_v26 }
 0x307   : > { %2979 = vrsqrt.f32 %v1134_v50  ;;  %v3779_v7 = vmul.f32 0.02, %v958_v58  ;;  %v1273_v14 = vmul.f32 %v1254_v21, %v1254_v21  ;;  %v1080_v0 = vmul.f32 %v3771_v23, %v3771_v23 }
 0x308   : > { %v1017_v54 = vpop.xlane.xlu0 %1016  ;;  %v1252_v52 = vmax.f32 %v1233_v45, 0.0  ;;  %v1270_v41 = vmul.f32 %v1251_v13, %v1251_v13  ;;  %v1291_v47 = vmul.f32 %v1272_v46, %v1253_v63  ;;  %v1172_v56 = vsub.f32 %v3617_v36, %v3736_v62 }
 0x309   : > { %v1063_v60 = vmul.f32 0.02, %v1017_v54  ;;  %v1292_v35 = vmul.f32 %v1273_v14, %v1254_v21  ;;  %v1081_v37 = vmul.f32 %v3779_v7, %v3779_v7 }
 0x30a   : > { %v1019_v4 = vpop.xlane.xlu1 %1018  ;;  %v1271_v30 = vmul.f32 %v1252_v52, %v1252_v52  ;;  %v1289_v5 = vmul.f32 %v1270_v41, %v1251_v13 }
 0x30b   : > { %v2974_v11 = vpop.eup %2973  ;;  %v1101_v49 = vsub.f32 %v1063_v60, %v1082_v28  ;;  %v1064_v8 = vmul.f32 0.02, %v1019_v4  ;;  %v1327_v51 = vpack.c.bf16 %v1292_v35, %v1291_v47 }
 0x30c   : > { %v1013_v2 = vpop.xlane.xlu0 %1012  ;;  %v1290_v25 = vmul.f32 %v1271_v30, %v1252_v52  ;;  %v1192_v10 = vmul.f32 %v2974_v11, %v1173_v24 }
 0x30d   : > { %v2976_v40 = vpop.eup %2975  ;;  %v1120_v42 = vmax.f32 %v1101_v49, 0.0  ;;  %v1102_v38 = vsub.f32 %v1064_v8, %v1083_v16  ;;  %v1061_v20 = vmul.f32 0.02, %v1013_v2  ;;  %v1177_v2 = vsub.f32 %v3631_v6, %v3766_v18 }
 0x30e   : > { %v1015_v31 = vpop.xlane.xlu1 %1014  ;;  %v1326_v29 = vpack.c.bf16 %v1290_v25, %v1289_v5  ;;  %v1193_v27 = vmul.f32 %v2976_v40, %v1174_v3  ;;  %v1215_v32 = vmul.f32 %v3743_v59, %v1192_v10  ;;  %v1178_v25 = vsub.f32 %v3635_v61, %v3768_v26 }
 0x30f   : > { %v2978_v48 = vpop.eup %2977  ;;  %v1139_v17 = vadd.f32 1e-05, %v1120_v42  ;;  %v1121_v1 = vmax.f32 %v1102_v38, 0.0  ;;  %v1099_v43 = vsub.f32 %v1061_v20, %v1080_v0  ;;  %v1062_v57 = vmul.f32 0.02, %v1015_v31 }
 0x310   : > { %2820 = vmatprep.mubr.bf16.mxu1 %v1326_v29  ;;  %v968_v50 = vpop.xlane.xlu0 %967  ;;  %v1190_v58 = vmul.f32 %v2978_v48, %v1171_v55  ;;  %v1216_v45 = vmul.f32 %v3743_v59, %v1193_v27  ;;  %v1238_v41 = vadd.f32 %v3755_v19, %v1215_v32  ;;  %v1175_v20 = vsub.f32 %v3640_v39, %v3771_v23 }
 0x311   : > { %v2980_v13 = vpop.eup %2979  ;;  %2981 = vrsqrt.f32 %v1139_v17  ;;  %v1140_v63 = vadd.f32 1e-05, %v1121_v1  ;;  %v1118_v21 = vmax.f32 %v1099_v43, 0.0  ;;  %v1100_v24 = vsub.f32 %v1062_v57, %v1081_v37  ;;  %2821 = vmatmul.mubr.bf16.vlgmr.msra.gmra.mrb[0].mxu1 %v1327_v51 }
 0x312   : > { %v970_v3 = vpop.xlane.xlu1 %969  ;;  %v1191_v54 = vmul.f32 %v2980_v13, %v1172_v56  ;;  %v1213_v52 = vmul.f32 %v3743_v59, %v1190_v58  ;;  %v1239_v62 = vadd.f32 %v3755_v19, %v1216_v45  ;;  %v3798_v4 = vmul.f32 0.02, %v968_v50 }
 0x313   : > { %2983 = vrsqrt.f32 %v1140_v63  ;;  %v1137_v28 = vadd.f32 1e-05, %v1118_v21  ;;  %v1119_v36 = vmax.f32 %v1100_v24, 0.0  ;;  %v3800_v30 = vmul.f32 0.02, %v970_v3 }
 0x314   : > { %v964_v60 = vpop.xlane.xlu0 %963  ;;  %v1214_v46 = vmul.f32 %v3743_v59, %v1191_v54  ;;  %v1236_v55 = vadd.f32 %v3755_v19, %v1213_v52  ;;  %v1257_v49 = vmax.f32 %v1238_v41, 0.0  ;;  %v1258_v5 = vmax.f32 %v1239_v62, 0.0 }
 0x315   : > { %2985 = vrsqrt.f32 %v1137_v28  ;;  %v1138_v16 = vadd.f32 1e-05, %v1119_v36  ;;  %v3803_v8 = vmul.f32 0.02, %v964_v60  ;;  %v1086_v40 = vmul.f32 %v3798_v4, %v3798_v4 }
 0x316   : > { %v966_v14 = vpop.xlane.xlu1 %965  ;;  %v1237_v11 = vadd.f32 %v3755_v19, %v1214_v46  ;;  %v1255_v0 = vmax.f32 %v1236_v55, 0.0  ;;  %v1276_v38 = vmul.f32 %v1257_v49, %v1257_v49  ;;  %v1087_v31 = vmul.f32 %v3800_v30, %v3800_v30 }
 0x317   : > { %2987 = vrsqrt.f32 %v1138_v16  ;;  %v3811_v37 = vmul.f32 0.02, %v966_v14  ;;  %v1277_v29 = vmul.f32 %v1258_v5, %v1258_v5  ;;  %v1084_v26 = vmul.f32 %v3803_v8, %v3803_v8 }
 0x318   : > { %v1025_v47 = vpop.xlane.xlu0 %1024  ;;  %v1256_v35 = vmax.f32 %v1237_v11, 0.0  ;;  %v1274_v10 = vmul.f32 %v1255_v0, %v1255_v0  ;;  %v1295_v1 = vmul.f32 %v1276_v38, %v1257_v49  ;;  %v1176_v36 = vsub.f32 %v3647_v12, %v3779_v7 }
 0x319   : > { %v1067_v42 = vmul.f32 0.02, %v1025_v47  ;;  %v1296_v43 = vmul.f32 %v1277_v29, %v1258_v5  ;;  %v1085_v39 = vmul.f32 %v3811_v37, %v3811_v37 }
 0x31a   : > { %v1027_v6 = vpop.xlane.xlu1 %1026  ;;  %v1275_v18 = vmul.f32 %v1256_v35, %v1256_v35  ;;  %v1293_v32 = vmul.f32 %v1274_v10, %v1255_v0 }
 0x31b   : > { %v2982_v61 = vpop.eup %2981  ;;  %v1105_v51 = vsub.f32 %v1067_v42, %v1086_v40  ;;  %v1068_v27 = vmul.f32 0.02, %v1027_v6  ;;  %v1329_v63 = vpack.c.bf16 %v1296_v43, %v1295_v1 }
 0x31c   : > { %v1021_v48 = vpop.xlane.xlu0 %1020  ;;  %v1294_v17 = vmul.f32 %v1275_v18, %v1256_v35  ;;  %v1196_v57 = vmul.f32 %v2982_v61, %v1177_v2 }
 0x31d   : > { %v2984_v56 = vpop.eup %2983  ;;  %v1124_v23 = vmax.f32 %v1105_v51, 0.0  ;;  %v1106_v50 = vsub.f32 %v1068_v27, %v1087_v31  ;;  %v1065_v58 = vmul.f32 0.02, %v1021_v48 }
 0x31e   : > { %v1023_v45 = vpop.xlane.xlu1 %1022  ;;  %v1328_v13 = vpack.c.bf16 %v1294_v17, %v1293_v32  ;;  %v1197_v21 = vmul.f32 %v2984_v56, %v1178_v25  ;;  %v1219_v24 = vmul.f32 %v3743_v59, %v1196_v57  ;;  %v1181_v56 = vsub.f32 %v3667_v22, %v3798_v4 }
 0x31f   : > { %v2986_v3 = vpop.eup %2985  ;;  %v1143_v54 = vadd.f32 1e-05, %v1124_v23  ;;  %v1125_v52 = vmax.f32 %v1106_v50, 0.0  ;;  %v1103_v41 = vsub.f32 %v1065_v58, %v1084_v26  ;;  %v1066_v28 = vmul.f32 0.02, %v1023_v45 }
 0x320   : > { %2824 = vmatprep.mubr.bf16.mxu1 %v1328_v13  ;;  %v976_v62 = vpop.xlane.xlu0 %975  ;;  %v1194_v60 = vmul.f32 %v2986_v3, %v1175_v20  ;;  %v1220_v46 = vmul.f32 %v3743_v59, %v1197_v21  ;;  %v1242_v2 = vadd.f32 %v3755_v19, %v1219_v24  ;;  %v1179_v22 = vsub.f32 %v3677_v15, %v3803_v8 }
 0x321   : > { %v2988_v55 = vpop.eup %2987  ;;  %2989 = vrsqrt.f32 %v1143_v54  ;;  %v1144_v16 = vadd.f32 1e-05, %v1125_v52  ;;  %v1122_v14 = vmax.f32 %v1103_v41, 0.0  ;;  %v1104_v11 = vsub.f32 %v1066_v28, %v1085_v39  ;;  %2825 = vmatmul.mubr.bf16.gmra.mrb[4].mxu1 %v1329_v63 }
 0x322   : > { %v974_v0 = vpop.xlane.xlu1 %973  ;;  %v1195_v49 = vmul.f32 %v2988_v55, %v1176_v36  ;;  %v1217_v5 = vmul.f32 %v3743_v59, %v1194_v60  ;;  %v1243_v7 = vadd.f32 %v3755_v19, %v1220_v46  ;;  %v1261_v18 = vmax.f32 %v1242_v2, 0.0 }
 0x323   : > { %2991 = vrsqrt.f32 %v1144_v16  ;;  %v1141_v25 = vadd.f32 1e-05, %v1122_v14  ;;  %v1123_v12 = vmax.f32 %v1104_v11, 0.0  ;;  %v3830_v42 = vmul.f32 0.02, %v974_v0 }
 0x324   : > { %v972_v47 = vpop.xlane.xlu0 %971  ;;  %v1218_v35 = vmul.f32 %v3743_v59, %v1195_v49  ;;  %v1240_v10 = vadd.f32 %v3755_v19, %v1217_v5  ;;  %v3835_v29 = vmul.f32 0.02, %v976_v62  ;;  %v1262_v26 = vmax.f32 %v1243_v7, 0.0 }
 0x325   : > { %2993 = vrsqrt.f32 %v1141_v25  ;;  %v1142_v40 = vadd.f32 1e-05, %v1123_v12  ;;  %v3832_v38 = vmul.f32 0.02, %v972_v47  ;;  %v1089_v17 = vmul.f32 %v3830_v42, %v3830_v42 }
 0x326   : > { %v1029_v20 = vpop.xlane.xlu1 %1028  ;;  %v1241_v31 = vadd.f32 %v3755_v19, %v1218_v35  ;;  %v1259_v6 = vmax.f32 %v1240_v10, 0.0  ;;  %v1280_v43 = vmul.f32 %v1261_v18, %v1261_v18  ;;  %v1281_v57 = vmul.f32 %v1262_v26, %v1262_v26 }
 0x327   : > { %2995 = vrsqrt.f32 %v1142_v40  ;;  %v1069_v61 = vmul.f32 0.02, %v1029_v20  ;;  %v1088_v51 = vmul.f32 %v3832_v38, %v3832_v38  ;;  %v1182_v39 = vsub.f32 %v3673_v53, %v3800_v30 }
 0x328   : > { %v1031_v27 = vpop.xlane.xlu0 %1030  ;;  %v1260_v32 = vmax.f32 %v1241_v31, 0.0  ;;  %v1278_v48 = vmul.f32 %v1259_v6, %v1259_v6  ;;  %v1090_v13 = vmul.f32 %v3835_v29, %v3835_v29  ;;  %v1300_v24 = vmul.f32 %v1281_v57, %v1262_v26 }
 0x329   : > { %v1070_v1 = vmul.f32 0.02, %v1031_v27  ;;  %v1107_v23 = vsub.f32 %v1069_v61, %v1088_v51  ;;  %v1299_v30 = vmul.f32 %v1280_v43, %v1261_v18  ;;  %v1180_v0 = vsub.f32 %v3683_v34, %v3811_v37 }
 0x32a   : > { %v1033_v50 = vpop.xlane.xlu1 %1032  ;;  %v1279_v58 = vmul.f32 %v1260_v32, %v1260_v32  ;;  %v1297_v54 = vmul.f32 %v1278_v48, %v1259_v6  ;;  %v1183_v18 = vsub.f32 %v3706_v33, %v3832_v38  ;;  %v1184_v51 = vsub.f32 %v3708_v44, %v3830_v42 }
 0x32b   : > { %v2990_v45 = vpop.eup %2989  ;;  %v1108_v63 = vsub.f32 %v1070_v1, %v1089_v17  ;;  %v1071_v21 = vmul.f32 0.02, %v1033_v50  ;;  %v1126_v3 = vmax.f32 %v1107_v23, 0.0  ;;  %v1331_v11 = vpack.c.bf16 %v1300_v24, %v1299_v30 }
 0x32c   : > { %v1298_v52 = vmul.f32 %v1279_v58, %v1260_v32  ;;  %v1200_v41 = vmul.f32 %v2990_v45, %v1181_v56  ;;  %v1185_v1 = vsub.f32 %v3701_v9, %v3835_v29 }
 0x32d   : > { %v2992_v28 = vpop.eup %2991  ;;  %v1127_v4 = vmax.f32 %v1108_v63, 0.0  ;;  %v1109_v53 = vsub.f32 %v1071_v21, %v1090_v13  ;;  %v1145_v36 = vadd.f32 1e-05, %v1126_v3 }
 0x32e   : > { %v1330_v62 = vpack.c.bf16 %v1298_v52, %v1297_v54  ;;  %v1201_v60 = vmul.f32 %v2992_v28, %v1182_v39  ;;  %v1223_v46 = vmul.f32 %v3743_v59, %v1200_v41 }
 0x32f   : > { %v2994_v55 = vpop.eup %2993  ;;  %v1146_v16 = vadd.f32 1e-05, %v1127_v4  ;;  %v1128_v14 = vmax.f32 %v1109_v53, 0.0  ;;  %2997 = vrsqrt.f32 %v1145_v36 }
 0x330   : > { %2828 = vmatprep.mubr.bf16.mxu1 %v1330_v62  ;;  %v1198_v49 = vmul.f32 %v2994_v55, %v1179_v22  ;;  %v1224_v15 = vmul.f32 %v3743_v59, %v1201_v60  ;;  %v1246_v2 = vadd.f32 %v3755_v19, %v1223_v46 }
 0x331   : > { %v2996_v8 = vpop.eup %2995  ;;  %2999 = vrsqrt.f32 %v1146_v16  ;;  %v1147_v5 = vadd.f32 1e-05, %v1128_v14  ;;  %2829 = vmatmul.mubr.bf16.gmra.mrb[8].mxu1 %v1331_v11 }
 0x332   : > { %v1199_v25 = vmul.f32 %v2996_v8, %v1180_v0  ;;  %v1221_v12 = vmul.f32 %v3743_v59, %v1198_v49  ;;  %v1247_v7 = vadd.f32 %v3755_v19, %v1224_v15  ;;  %v1265_v35 = vmax.f32 %v1246_v2, 0.0 }
 0x333   : > { %3001 = vrsqrt.f32 %v1147_v5 }
 0x334   : > { %v1222_v47 = vmul.f32 %v3743_v59, %v1199_v25  ;;  %v1244_v34 = vadd.f32 %v3755_v19, %v1221_v12  ;;  %v1266_v37 = vmax.f32 %v1247_v7, 0.0  ;;  %v1284_v61 = vmul.f32 %v1265_v35, %v1265_v35 }
 0x336   : > { %v1245_v10 = vadd.f32 %v3755_v19, %v1222_v47  ;;  %v1263_v40 = vmax.f32 %v1244_v34, 0.0  ;;  %v1285_v20 = vmul.f32 %v1266_v37, %v1266_v37  ;;  %v1303_v23 = vmul.f32 %v1284_v61, %v1265_v35 }
 0x338   : > { %v1264_v31 = vmax.f32 %v1245_v10, 0.0  ;;  %v1282_v6 = vmul.f32 %v1263_v40, %v1263_v40  ;;  %v1304_v48 = vmul.f32 %v1285_v20, %v1266_v37 }
 0x339   : > { %v2998_v26 = vpop.eup %2997 }
 0x33a   : > { %v1283_v27 = vmul.f32 %v1264_v31, %v1264_v31  ;;  %v1202_v17 = vmul.f32 %v2998_v26, %v1183_v18  ;;  %v1301_v43 = vmul.f32 %v1282_v6, %v1263_v40  ;;  %v1333_v45 = vpack.c.bf16 %v1304_v48, %v1303_v23 }
 0x33b   : > { %v3000_v32 = vpop.eup %2999 }
 0x33c   : > { %v1302_v57 = vmul.f32 %v1283_v27, %v1264_v31  ;;  %v1203_v56 = vmul.f32 %v3000_v32, %v1184_v51  ;;  %v1225_v50 = vmul.f32 %v3743_v59, %v1202_v17 }
 0x33d   : > { %v3002_v39 = vpop.eup %3001 }
 0x33e   : > { %v1332_v33 = vpack.c.bf16 %v1302_v57, %v1301_v43  ;;  %v1226_v38 = vmul.f32 %v3743_v59, %v1203_v56  ;;  %v1204_v58 = vmul.f32 %v3002_v39, %v1185_v1  ;;  %v1248_v44 = vadd.f32 %v3755_v19, %v1225_v50 }
 0x340   : > { %2832 = vmatprep.mubr.bf16.mxu1 %v1332_v33  ;;  %v1249_v42 = vadd.f32 %v3755_v19, %v1226_v38  ;;  %v1227_v13 = vmul.f32 %v3743_v59, %v1204_v58  ;;  %v1267_v9 = vmax.f32 %v1248_v44, 0.0  ;;  %v3874_v59 = vld [vmem:[%s4513_s2 + $0x3] ss:$0 sm:$0xff] }
 0x341   : > { %2833 = vmatmul.mubr.bf16.gmra.mrb[12].mxu1 %v1333_v45  ;;  %v2919_v33 = vld [vmem:[%s4512_s1 + $0x80] sm:$0xff]   ;;  %v2920_v45 = vld [vmem:[%s4512_s1 + $0x88] sm:$0xff]  }
 0x342   : > { %v1268_v29 = vmax.f32 %v1249_v42, 0.0  ;;  %v1250_v63 = vadd.f32 %v3755_v19, %v1227_v13  ;;  %v1286_v21 = vmul.f32 %v1267_v9, %v1267_v9  ;;  %2840 = vmatprep.subr.bf16.mxu0 %v2919_v33  ;;  %2876 = vmatprep.subr.bf16.mxu1 %v2919_v33  ;;  %v2921_v42 = vld [vmem:[%s4512_s1 + $0x90] sm:$0xff]  }
 0x343   : > { %2841 = vmatpush3.bf16.msra.mxu0 %v2919_v33  ;;  %2884 = vmatpush3.bf16.msra.mxu1 %v2919_v33 }
 0x344   : > { %v1287_v24 = vmul.f32 %v1268_v29, %v1268_v29  ;;  %v1269_v3 = vmax.f32 %v1250_v63, 0.0  ;;  %v1305_v54 = vmul.f32 %v1286_v21, %v1267_v9  ;;  %2842 = vmatprep.subr.bf16.mxu0 %v2920_v45  ;;  %2877 = vmatprep.subr.bf16.mxu1 %v2920_v45 }
 0x346   : > { %v1306_v52 = vmul.f32 %v1287_v24, %v1268_v29  ;;  %v1288_v41 = vmul.f32 %v1269_v3, %v1269_v3 }
 0x347   : > { %2843 = vmatpush3.bf16.msra.mxu0 %v2920_v45  ;;  %2885 = vmatpush3.bf16.msra.mxu1 %v2920_v45 }
 0x348   : > { %v1334_v28 = vpack.c.bf16 %v1306_v52, %v1305_v54  ;;  %v1307_v22 = vmul.f32 %v1288_v41, %v1269_v3  ;;  %2844 = vmatprep.subr.bf16.mxu0 %v2921_v42  ;;  %2878 = vmatprep.subr.bf16.mxu1 %v2921_v42  ;;  %v2922_v52 = vld [vmem:[%s4512_s1 + $0x98] sm:$0xff]  }
 0x34a   : > { %2836 = vmatprep.mubr.bf16.mxu1 %v1334_v28  ;;  %v1335_v4 = vpack.c.bf16 %v1307_v22, %v1307_v22 }
 0x34b   : > { %2845 = vmatpush3.bf16.msra.mxu0 %v2921_v42  ;;  %2886 = vmatpush3.bf16.msra.mxu1 %v2921_v42 }
 0x34c   : > { %2837 = vmatmul.mubr.bf16.gmra.mrb[16].mxu1 %v1335_v4  ;;  %2846 = vmatprep.subr.bf16.mxu0 %v2922_v52  ;;  %v2923_v4 = vld [vmem:[%s4512_s1 + $0xa0] sm:$0xff]  }
 0x34d   : > { %2879 = vmatprep.subr.bf16.mxu1 %v2922_v52 }
 0x34f   : > { %2847 = vmatpush3.bf16.msra.mxu0 %v2922_v52  ;;  %2887 = vmatpush3.bf16.msra.mxu1 %v2922_v52 }
 0x350   : > { %2848 = vmatprep.subr.bf16.mxu0 %v2923_v4  ;;  %2880 = vmatprep.subr.bf16.mxu1 %v2923_v4 }
 0x353   : > { %2849 = vmatpush3.bf16.msra.mxu0 %v2923_v4  ;;  %2888 = vmatpush3.bf16.msra.mxu1 %v2923_v4 }
 0x3e4   : > { %v2822_v53 = vpop.f32.mrb[0].mxu1 }
 0x3e5   : > { %v1431_v30 = vadd.f32 %v2822_v53, %v3874_v59  ;;  %v1422_v19 = vpop.f32.mrb[1].mxu1 }
 0x3e6   : > { %v2823_v36 = vpop.f32.mrb[2].mxu1  ;;  %v1423_v60 = vadd.f32 %v3874_v59, %v1422_v19 }
 0x3e7   : > { %v3877_v62 = vmax.f32 %v1431_v30, 0.0  ;;  %v1434_v46 = vadd.f32 %v2823_v36, %v3874_v59  ;;  %v1425_v55 = vpop.f32.mrb[3].mxu1  ;;  %v2924_v30 = vld [vmem:[%s4512_s1 + $0xa8] sm:$0xff]  }
 0x3e8   : > { %v1426_v14 = vadd.f32 %v3874_v59, %v1425_v55  ;;  %v3885_v11 = vmax.f32 %v1423_v60, 0.0  ;;  %2850 = vmatprep.subr.bf16.mxu0 %v2924_v30  ;;  %2881 = vmatprep.subr.bf16.mxu1 %v2924_v30 }
 0x3e9   : > { %v3881_v16 = vmax.f32 %v1434_v46, 0.0  ;;  %1525 = vadd.xlane.f32.xlu0 %v3877_v62  ;;  %v1561_v49 = vmul.f32 %v3877_v62, %v3877_v62  ;;  %2851 = vmatpush3.bf16.msra.mxu0 %v2924_v30 }
 0x3ea   : > { %v3888_v0 = vmax.f32 %v1426_v14, 0.0  ;;  %v1559_v8 = vmul.f32 %v3885_v11, %v3885_v11  ;;  %2889 = vmatpush3.bf16.msra.mxu1 %v2924_v30 }
 0x3eb   : > { %1527 = vadd.xlane.f32.xlu1 %v3881_v16  ;;  %v1562_v15 = vmul.f32 %v3881_v16, %v3881_v16 }
 0x3ec   : > { %v1560_v12 = vmul.f32 %v3888_v0, %v3888_v0 }
 0x3ed   : > { %1521 = vadd.xlane.f32.xlu0 %v3885_v11 }
 0x3ef   : > { %1523 = vadd.xlane.f32.xlu1 %v3888_v0 }
 0x3f1   : > { %1582 = vadd.xlane.f32.xlu0 %v1561_v49 }
 0x3f3   : > { %1584 = vadd.xlane.f32.xlu1 %v1562_v15 }
 0x3f4   : > { %v2826_v5 = vpop.f32.mrb[4].mxu1 }
 0x3f5   : > { %v1447_v2 = vadd.f32 %v2826_v5, %v3874_v59  ;;  %1578 = vadd.xlane.f32.xlu0 %v1559_v8  ;;  %v1438_v25 = vpop.f32.mrb[5].mxu1 }
 0x3f6   : > { %v2827_v7 = vpop.f32.mrb[6].mxu1  ;;  %v1439_v34 = vadd.f32 %v3874_v59, %v1438_v25 }
 0x3f7   : > { %v3901_v47 = vmax.f32 %v1447_v2, 0.0  ;;  %v1450_v37 = vadd.f32 %v2827_v7, %v3874_v59  ;;  %1580 = vadd.xlane.f32.xlu1 %v1560_v12  ;;  %v1441_v35 = vpop.f32.mrb[7].mxu1  ;;  %v2925_v2 = vld [vmem:[%s4512_s1 + $0xb0] sm:$0xff]  }
 0x3f8   : > { %v1442_v40 = vadd.f32 %v3874_v59, %v1441_v35  ;;  %v3909_v20 = vmax.f32 %v1439_v34, 0.0  ;;  %2852 = vmatprep.subr.bf16.mxu0 %v2925_v2  ;;  %2882 = vmatprep.subr.bf16.mxu1 %v2925_v2 }
 0x3f9   : > { %v3905_v10 = vmax.f32 %v1450_v37, 0.0  ;;  %1533 = vadd.xlane.f32.xlu0 %v3901_v47  ;;  %v1565_v6 = vmul.f32 %v3901_v47, %v3901_v47  ;;  %2853 = vmatpush3.bf16.msra.mxu0 %v2925_v2 }
 0x3fa   : > { %v3912_v31 = vmax.f32 %v1442_v40, 0.0  ;;  %v1563_v61 = vmul.f32 %v3909_v20, %v3909_v20  ;;  %2890 = vmatpush3.bf16.msra.mxu1 %v2925_v2 }
 0x3fb   : > { %1535 = vadd.xlane.f32.xlu1 %v3905_v10  ;;  %v1566_v18 = vmul.f32 %v3905_v10, %v3905_v10 }
 0x3fc   : > { %v1564_v32 = vmul.f32 %v3912_v31, %v3912_v31 }
 0x3fd   : > { %1529 = vadd.xlane.f32.xlu0 %v3909_v20 }
 0x3ff   : > { %1531 = vadd.xlane.f32.xlu1 %v3912_v31 }
 0x401   : > { %1590 = vadd.xlane.f32.xlu0 %v1565_v6 }
 0x403   : > { %1592 = vadd.xlane.f32.xlu1 %v1566_v18 }
 0x404   : > { %v2830_v26 = vpop.f32.mrb[8].mxu1 }
 0x405   : > { %v1463_v51 = vadd.f32 %v2830_v26, %v3874_v59  ;;  %1586 = vadd.xlane.f32.xlu0 %v1563_v61  ;;  %v1454_v27 = vpop.f32.mrb[9].mxu1 }
 0x406   : > { %v2831_v48 = vpop.f32.mrb[10].mxu1  ;;  %v1455_v1 = vadd.f32 %v3874_v59, %v1454_v27 }
 0x407   : > { %v3925_v17 = vmax.f32 %v1463_v51, 0.0  ;;  %v1466_v43 = vadd.f32 %v2831_v48, %v3874_v59  ;;  %1588 = vadd.xlane.f32.xlu1 %v1564_v32  ;;  %v1457_v57 = vpop.f32.mrb[11].mxu1 }
 0x408   : > { %v1458_v56 = vadd.f32 %v3874_v59, %v1457_v57  ;;  %v3933_v23 = vmax.f32 %v1455_v1, 0.0 }
 0x409   : > { %v3930_v39 = vmax.f32 %v1466_v43, 0.0  ;;  %1541 = vadd.xlane.f32.xlu0 %v3925_v17  ;;  %v1569_v38 = vmul.f32 %v3925_v17, %v3925_v17 }
 0x40a   : > { %v3935_v50 = vmax.f32 %v1458_v56, 0.0  ;;  %v1567_v29 = vmul.f32 %v3933_v23, %v3933_v23 }
 0x40b   : > { %1543 = vadd.xlane.f32.xlu1 %v3930_v39  ;;  %v1570_v6 = vmul.f32 %v3930_v39, %v3930_v39 }
 0x40c   : > { %v1568_v58 = vmul.f32 %v3935_v50, %v3935_v50 }
 0x40d   : > { %1537 = vadd.xlane.f32.xlu0 %v3933_v23 }
 0x40f   : > { %1598 = vadd.xlane.f32.xlu1 %v1569_v38 }
 0x411   : > { %1596 = vadd.xlane.f32.xlu0 %v1568_v58 }
 0x413   : > { %1539 = vadd.xlane.f32.xlu1 %v3935_v50 }
 0x414   : > { %v2834_v44 = vpop.f32.mrb[12].mxu1 }
 0x415   : > { %v1479_v13 = vadd.f32 %v2834_v44, %v3874_v59  ;;  %v1470_v9 = vpop.f32.mrb[13].mxu1 }
 0x416   : > { %v2835_v63 = vpop.f32.mrb[14].mxu1  ;;  %v1471_v24 = vadd.f32 %v3874_v59, %v1470_v9 }
 0x417   : > { %v3956_v21 = vmax.f32 %v1479_v13, 0.0  ;;  %v1482_v3 = vadd.f32 %v2835_v63, %v3874_v59  ;;  %1594 = vadd.xlane.f32.xlu1 %v1567_v29  ;;  %v1473_v54 = vpop.f32.mrb[15].mxu1 }
 0x418   : > { %v1474_v28 = vadd.f32 %v3874_v59, %v1473_v54  ;;  %v3967_v22 = vmax.f32 %v1471_v24, 0.0 }
 0x419   : > { %v3963_v41 = vmax.f32 %v1482_v3, 0.0  ;;  %1549 = vadd.xlane.f32.xlu0 %v3956_v21  ;;  %v1573_v36 = vmul.f32 %v3956_v21, %v3956_v21 }
 0x41a   : > { %v3973_v53 = vmax.f32 %v1474_v28, 0.0  ;;  %v1571_v5 = vmul.f32 %v3967_v22, %v3967_v22 }
 0x41b   : > { %1551 = vadd.xlane.f32.xlu1 %v3963_v41  ;;  %v1574_v49 = vmul.f32 %v3963_v41, %v3963_v41 }
 0x41c   : > { %v1572_v25 = vmul.f32 %v3973_v53, %v3973_v53 }
 0x41d   : > { %1545 = vadd.xlane.f32.xlu0 %v3967_v22 }
 0x41f   : > { %1547 = vadd.xlane.f32.xlu1 %v3973_v53  ;;  %v2838_v19 = vpop.f32.mrb[16].mxu1 }
 0x420   : > { %v1495_v60 = vadd.f32 %v2838_v19, %v3874_v59  ;;  %v1486_v46 = vpop.f32.mrb[17].mxu1 }
 0x421   : > { %v1487_v55 = vadd.f32 %v3874_v59, %v1486_v46  ;;  %1606 = vadd.xlane.f32.xlu0 %v1573_v36  ;;  %v2839_v14 = vpop.f32.mrb[18].mxu1 }
 0x422   : > { %v1489_v15 = vpop.f32.mrb[19].mxu1  ;;  %v3994_v12 = vmax.f32 %v1495_v60, 0.0 }
 0x423   : > { %v1490_v8 = vadd.f32 %v3874_v59, %v1489_v15  ;;  %1608 = vadd.xlane.f32.xlu1 %v1574_v49  ;;  %v2926_v59 = vld [vmem:[%s4512_s1 + $0xb8] sm:$0xff]   ;;  %v3999_v7 = vmax.f32 %v1487_v55, 0.0 }
 0x424   : > { %2854 = vmatprep.subr.bf16.mxu0 %v2926_v59  ;;  %2883 = vmatprep.subr.bf16.mxu1 %v2926_v59  ;;  %v1577_v40 = vmul.f32 %v3994_v12, %v3994_v12 }
 0x425   : > { %1602 = vadd.xlane.f32.xlu0 %v1571_v5  ;;  %v4001_v34 = vmax.f32 %v1490_v8, 0.0  ;;  %2855 = vmatpush3.bf16.msra.mxu0 %v2926_v59  ;;  %v1575_v37 = vmul.f32 %v3999_v7, %v3999_v7 }
 0x426   : > { %2891 = vmatpush3.bf16.msra.mxu1 %v2926_v59 }
 0x427   : > { %1604 = vadd.xlane.f32.xlu1 %v1572_v25  ;;  %v1576_v35 = vmul.f32 %v4001_v34, %v4001_v34 }
 0x429   : > { %1557 = vadd.xlane.f32.xlu0 %v3994_v12 }
 0x42b   : > { %1555 = vadd.xlane.f32.xlu1 %v4001_v34 }
 0x42d   : > { %1553 = vadd.xlane.f32.xlu0 %v3999_v7 }
 0x42f   : > { %1610 = vadd.xlane.f32.xlu1 %v1575_v37 }
 0x431   : > { %1612 = vadd.xlane.f32.xlu0 %v1576_v35 }
 0x433   : > { %1614 = vadd.xlane.f32.xlu1 %v1577_v40 }
 0x435   : > { %1600 = vadd.xlane.f32.xlu0 %v1570_v6 }
 0x476   : > { %v1526_v18 = vpop.xlane.xlu0 %1525 }
 0x477   : > { %v1618_v51 = vmul.f32 0.02, %v1526_v18 }
 0x478   : > { %v1528_v61 = vpop.xlane.xlu1 %1527 }
 0x479   : > { %v1619_v32 = vmul.f32 0.02, %v1528_v61  ;;  %v1656_v1 = vmul.f32 %v1618_v51, %v1618_v51  ;;  %v1751_v35 = vsub.f32 %v3877_v62, %v1618_v51  ;;  %v4036_v61 = vld [vmem:[%s4513_s2 + $0x9] ss:$0 sm:$0xff] }
 0x47a   : > { %v1522_v26 = vpop.xlane.xlu0 %1521 }
 0x47b   : > { %v4014_v43 = vmul.f32 0.02, %v1522_v26  ;;  %v1657_v38 = vmul.f32 %v1619_v32, %v1619_v32 }
 0x47c   : > { %v1524_v27 = vpop.xlane.xlu1 %1523 }
 0x47d   : > { %v4016_v56 = vmul.f32 0.02, %v1524_v27  ;;  %v1654_v42 = vmul.f32 %v4014_v43, %v4014_v43 }
 0x47e   : > { %v1583_v48 = vpop.xlane.xlu0 %1582 }
 0x47f   : > { %v1637_v57 = vmul.f32 0.02, %v1583_v48  ;;  %v1655_v63 = vmul.f32 %v4016_v56, %v4016_v56 }
 0x480   : > { %v1585_v33 = vpop.xlane.xlu1 %1584 }
 0x481   : > { %v1675_v58 = vsub.f32 %v1637_v57, %v1656_v1  ;;  %v1638_v45 = vmul.f32 0.02, %v1585_v33  ;;  %v1752_v1 = vsub.f32 %v3881_v16, %v1619_v32  ;;  %v4051_v16 = vld [vmem:[%s4513_s2 + $0xa] ss:$0 sm:$0xff] }
 0x482   : > { %v1579_v44 = vpop.xlane.xlu0 %1578 }
 0x483   : > { %v1694_v13 = vmax.f32 %v1675_v58, 0.0  ;;  %v1676_v9 = vsub.f32 %v1638_v45, %v1657_v38  ;;  %v1635_v29 = vmul.f32 0.02, %v1579_v44  ;;  %v1749_v44 = vsub.f32 %v3885_v11, %v4014_v43 }
 0x484   : > { %v1581_v24 = vpop.xlane.xlu1 %1580  ;;  %v1750_v11 = vsub.f32 %v3888_v0, %v4016_v56 }
 0x485   : > { %v1713_v3 = vadd.f32 1e-05, %v1694_v13  ;;  %v1695_v54 = vmax.f32 %v1676_v9, 0.0  ;;  %v1673_v52 = vsub.f32 %v1635_v29, %v1654_v42  ;;  %v1636_v28 = vmul.f32 0.02, %v1581_v24 }
 0x486   : > { %v1534_v4 = vpop.xlane.xlu0 %1533 }
 0x487   : > { %3003 = vrsqrt.f32 %v1713_v3  ;;  %v1714_v30 = vadd.f32 1e-05, %v1695_v54  ;;  %v1692_v19 = vmax.f32 %v1673_v52, 0.0  ;;  %v1674_v36 = vsub.f32 %v1636_v28, %v1655_v63 }
 0x488   : > { %v1536_v60 = vpop.xlane.xlu1 %1535  ;;  %v4022_v15 = vmul.f32 0.02, %v1534_v4 }
 0x489   : > { %3005 = vrsqrt.f32 %v1714_v30  ;;  %v1711_v46 = vadd.f32 1e-05, %v1692_v19  ;;  %v1693_v55 = vmax.f32 %v1674_v36, 0.0  ;;  %v4024_v5 = vmul.f32 0.02, %v1536_v60 }
 0x48a   : > { %v1530_v14 = vpop.xlane.xlu0 %1529  ;;  %v1660_v25 = vmul.f32 %v4022_v15, %v4022_v15 }
 0x48b   : > { %3007 = vrsqrt.f32 %v1711_v46  ;;  %v1712_v49 = vadd.f32 1e-05, %v1693_v55  ;;  %v4028_v59 = vmul.f32 0.02, %v1530_v14  ;;  %v1661_v26 = vmul.f32 %v4024_v5, %v4024_v5 }
 0x48c   : > { %v1532_v8 = vpop.xlane.xlu1 %1531 }
 0x48d   : > { %3009 = vrsqrt.f32 %v1712_v49  ;;  %v4031_v40 = vmul.f32 0.02, %v1532_v8  ;;  %v1658_v62 = vmul.f32 %v4028_v59, %v4028_v59 }
 0x48e   : > { %v1591_v2 = vpop.xlane.xlu0 %1590 }
 0x48f   : > { %v1641_v37 = vmul.f32 0.02, %v1591_v2  ;;  %v1659_v9 = vmul.f32 %v4031_v40, %v4031_v40 }
 0x490   : > { %v1593_v6 = vpop.xlane.xlu1 %1592 }
 0x491   : > { %v3004_v18 = vpop.eup %3003  ;;  %v1679_v27 = vsub.f32 %v1641_v37, %v1660_v25  ;;  %v1642_v48 = vmul.f32 0.02, %v1593_v6 }
 0x492   : > { %v1770_v57 = vmul.f32 %v3004_v18, %v1751_v35  ;;  %v1587_v33 = vpop.xlane.xlu0 %1586 }
 0x493   : > { %v3006_v38 = vpop.eup %3005  ;;  %v1698_v51 = vmax.f32 %v1679_v27, 0.0  ;;  %v1680_v58 = vsub.f32 %v1642_v48, %v1661_v26  ;;  %v1639_v45 = vmul.f32 0.02, %v1587_v33 }
 0x494   : > { %v1793_v42 = vmul.f32 %v4036_v61, %v1770_v57  ;;  %v1771_v13 = vmul.f32 %v3006_v38, %v1752_v1  ;;  %v1589_v29 = vpop.xlane.xlu1 %1588  ;;  %v1755_v38 = vsub.f32 %v3901_v47, %v4022_v15 }
 0x495   : > { %v3008_v32 = vpop.eup %3007  ;;  %v1717_v63 = vadd.f32 1e-05, %v1698_v51  ;;  %v1699_v24 = vmax.f32 %v1680_v58, 0.0  ;;  %v1677_v3 = vsub.f32 %v1639_v45, %v1658_v62  ;;  %v1640_v54 = vmul.f32 0.02, %v1589_v29 }
 0x496   : > { %v1794_v43 = vmul.f32 %v4036_v61, %v1771_v13  ;;  %v4056_v52 = vpop.xlane.xlu0 %1541  ;;  %v1768_v28 = vmul.f32 %v3008_v32, %v1749_v44  ;;  %v1816_v14 = vadd.f32 %v4051_v16, %v1793_v42 }
 0x497   : > { %v3010_v4 = vpop.eup %3009  ;;  %3011 = vrsqrt.f32 %v1717_v63  ;;  %v1718_v30 = vadd.f32 1e-05, %v1699_v24  ;;  %v1696_v19 = vmax.f32 %v1677_v3, 0.0  ;;  %v1678_v36 = vsub.f32 %v1640_v54, %v1659_v9 }
 0x498   : > { %v4058_v60 = vpop.xlane.xlu1 %1543  ;;  %v1769_v46 = vmul.f32 %v3010_v4, %v1750_v11  ;;  %v1791_v55 = vmul.f32 %v4036_v61, %v1768_v28  ;;  %v1817_v56 = vadd.f32 %v4051_v16, %v1794_v43  ;;  %v1835_v26 = vmax.f32 %v1816_v14, 0.0 }
 0x499   : > { %3013 = vrsqrt.f32 %v1718_v30  ;;  %v1715_v49 = vadd.f32 1e-05, %v1696_v19  ;;  %v1697_v0 = vmax.f32 %v1678_v36, 0.0  ;;  %v1756_v9 = vsub.f32 %v3905_v10, %v4024_v5 }
 0x49a   : > { %v1538_v8 = vpop.xlane.xlu0 %1537  ;;  %v1792_v2 = vmul.f32 %v4036_v61, %v1769_v46  ;;  %v1814_v25 = vadd.f32 %v4051_v16, %v1791_v55  ;;  %v1836_v27 = vmax.f32 %v1817_v56, 0.0  ;;  %v1854_v57 = vmul.f32 %v1835_v26, %v1835_v26 }
 0x49b   : > { %3015 = vrsqrt.f32 %v1715_v49  ;;  %v1716_v37 = vadd.f32 1e-05, %v1697_v0  ;;  %v4070_v44 = vmul.f32 0.02, %v1538_v8  ;;  %v1753_v54 = vsub.f32 %v3909_v20, %v4028_v59 }
 0x49c   : > { %v4065_v35 = vpop.xlane.xlu1 %1598  ;;  %v1815_v6 = vadd.f32 %v4051_v16, %v1792_v2  ;;  %v1833_v18 = vmax.f32 %v1814_v25, 0.0  ;;  %v1855_v33 = vmul.f32 %v1836_v27, %v1836_v27  ;;  %v1873_v15 = vmul.f32 %v1854_v57, %v1835_v26 }
 0x49d   : > { %3017 = vrsqrt.f32 %v1716_v37  ;;  %v1662_v10 = vmul.f32 %v4070_v44, %v4070_v44  ;;  %v1754_v46 = vsub.f32 %v3912_v31, %v4031_v40 }
 0x49e   : > { %v1834_v48 = vmax.f32 %v1815_v6, 0.0  ;;  %v1852_v1 = vmul.f32 %v1833_v18, %v1833_v18  ;;  %v1597_v62 = vpop.xlane.xlu0 %1596  ;;  %v1874_v13 = vmul.f32 %v1855_v33, %v1836_v27  ;;  %v4094_v33 = vmul.f32 0.02, %v4056_v52 }
 0x49f   : > { %v1644_v3 = vmul.f32 0.02, %v1597_v62 }
 0x4a0   : > { %v1540_v51 = vpop.xlane.xlu1 %1539  ;;  %v1853_v58 = vmul.f32 %v1834_v48, %v1834_v48  ;;  %v1871_v29 = vmul.f32 %v1852_v1, %v1833_v18  ;;  %v1909_v36 = vpack.c.bf16 %v1874_v13, %v1873_v15 }
 0x4a1   : > { %v3012_v45 = vpop.eup %3011  ;;  %v4072_v42 = vmul.f32 0.02, %v1540_v51 }
 0x4a2   : > { %v1872_v32 = vmul.f32 %v1853_v58, %v1834_v48  ;;  %v1774_v63 = vmul.f32 %v3012_v45, %v1755_v38  ;;  %v1645_v58 = vmul.f32 0.02, %v4065_v35 }
 0x4a3   : > { %v3014_v24 = vpop.eup %3013  ;;  %v1663_v47 = vmul.f32 %v4072_v42, %v4072_v42 }
 0x4a4   : > { %v1595_v11 = vpop.xlane.xlu1 %1594  ;;  %v1908_v43 = vpack.c.bf16 %v1872_v32, %v1871_v29  ;;  %v1775_v28 = vmul.f32 %v3014_v24, %v1756_v9  ;;  %v1797_v4 = vmul.f32 %v4036_v61, %v1774_v63 }
 0x4a5   : > { %v3016_v30 = vpop.eup %3015  ;;  %v1682_v5 = vsub.f32 %v1644_v3, %v1663_v47  ;;  %v1643_v19 = vmul.f32 0.02, %v1595_v11  ;;  %v1664_v47 = vmul.f32 %v4094_v33, %v4094_v33 }
 0x4a6   : > { %2856 = vmatprep.mubr.bf16.mxu0 %v1908_v43  ;;  %v1550_v55 = vpop.xlane.xlu0 %1549  ;;  %v1772_v14 = vmul.f32 %v3016_v30, %v1753_v54  ;;  %v1798_v20 = vmul.f32 %v4036_v61, %v1775_v28  ;;  %v1820_v59 = vadd.f32 %v4051_v16, %v1797_v4 }
 0x4a7   : > { %v3018_v49 = vpop.eup %3017  ;;  %v1701_v0 = vmax.f32 %v1682_v5, 0.0  ;;  %v1681_v56 = vsub.f32 %v1643_v19, %v1662_v10  ;;  %2857 = vmatmul.mubr.bf16.vlgmr.msra.gmra.mrb[20].mxu0 %v1909_v36  ;;  %v4091_v57 = vmul.f32 0.02, %v1550_v55  ;;  %v1683_v30 = vsub.f32 %v1645_v58, %v1664_v47 }
 0x4a8   : > { %v1552_v8 = vpop.xlane.xlu1 %1551  ;;  %v1773_v2 = vmul.f32 %v3018_v49, %v1754_v46  ;;  %v1795_v25 = vmul.f32 %v4036_v61, %v1772_v14  ;;  %v1821_v37 = vadd.f32 %v4051_v16, %v1798_v20  ;;  %v1839_v27 = vmax.f32 %v1820_v59, 0.0 }
 0x4a9   : > { %v1720_v6 = vadd.f32 1e-05, %v1701_v0  ;;  %v1700_v18 = vmax.f32 %v1681_v56, 0.0  ;;  %v4098_v45 = vmul.f32 0.02, %v1552_v8  ;;  %v1668_v24 = vmul.f32 %v4091_v57, %v4091_v57 }
 0x4aa   : > { %v1546_v31 = vpop.xlane.xlu0 %1545  ;;  %v1796_v40 = vmul.f32 %v4036_v61, %v1773_v2  ;;  %v1818_v26 = vadd.f32 %v4051_v16, %v1795_v25  ;;  %v1840_v48 = vmax.f32 %v1821_v37, 0.0  ;;  %v1858_v32 = vmul.f32 %v1839_v27, %v1839_v27 }
 0x4ab   : > { %3019 = vrsqrt.f32 %v1720_v6  ;;  %v1719_v1 = vadd.f32 1e-05, %v1700_v18  ;;  %v4102_v3 = vmul.f32 0.02, %v1546_v31  ;;  %v1669_v43 = vmul.f32 %v4098_v45, %v4098_v45 }
 0x4ac   : > { %v1548_v38 = vpop.xlane.xlu1 %1547  ;;  %v1819_v62 = vadd.f32 %v4051_v16, %v1796_v40  ;;  %v1837_v51 = vmax.f32 %v1818_v26, 0.0  ;;  %v1859_v63 = vmul.f32 %v1840_v48, %v1840_v48  ;;  %v1877_v36 = vmul.f32 %v1858_v32, %v1839_v27 }
 0x4ad   : > { %3021 = vrsqrt.f32 %v1719_v1  ;;  %v4106_v15 = vmul.f32 0.02, %v1548_v38  ;;  %v1666_v46 = vmul.f32 %v4102_v3, %v4102_v3  ;;  %v1758_v59 = vsub.f32 %v3935_v50, %v4072_v42 }
 0x4ae   : > { %v1607_v13 = vpop.xlane.xlu0 %1606  ;;  %v1838_v9 = vmax.f32 %v1819_v62, 0.0  ;;  %v1856_v29 = vmul.f32 %v1837_v51, %v1837_v51  ;;  %v1878_v11 = vmul.f32 %v1859_v63, %v1840_v48  ;;  %v1757_v31 = vsub.f32 %v3933_v23, %v4070_v44 }
 0x4af   : > { %v1649_v52 = vmul.f32 0.02, %v1607_v13  ;;  %v1667_v49 = vmul.f32 %v4106_v15, %v4106_v15  ;;  %v1702_v40 = vmax.f32 %v1683_v30, 0.0 }
 0x4b0   : > { %v1609_v35 = vpop.xlane.xlu1 %1608  ;;  %v1857_v54 = vmul.f32 %v1838_v9, %v1838_v9  ;;  %v1875_v5 = vmul.f32 %v1856_v29, %v1837_v51  ;;  %v1911_v8 = vpack.c.bf16 %v1878_v11, %v1877_v36  ;;  %v1763_v36 = vsub.f32 %v3956_v21, %v4091_v57 }
 0x4b1   : > { %v1687_v28 = vsub.f32 %v1649_v52, %v1668_v24  ;;  %v1650_v4 = vmul.f32 0.02, %v1609_v35  ;;  %v4124_v24 = vmul.f32 0.02, %v4058_v60  ;;  %v1761_v21 = vsub.f32 %v3967_v22, %v4102_v3 }
 0x4b2   : > { %v1603_v10 = vpop.xlane.xlu0 %1602  ;;  %v1876_v19 = vmul.f32 %v1857_v54, %v1838_v9  ;;  %v1721_v9 = vadd.f32 1e-05, %v1702_v40 }
 0x4b3   : > { %v1706_v55 = vmax.f32 %v1687_v28, 0.0  ;;  %v1688_v14 = vsub.f32 %v1650_v4, %v1669_v43  ;;  %v1647_v20 = vmul.f32 0.02, %v1603_v10 }
 0x4b4   : > { %v1605_v0 = vpop.xlane.xlu1 %1604  ;;  %v1910_v56 = vpack.c.bf16 %v1876_v19, %v1875_v5  ;;  %v1665_v19 = vmul.f32 %v4124_v24, %v4124_v24 }
 0x4b5   : > { %v3020_v2 = vpop.eup %3019  ;;  %v1725_v25 = vadd.f32 1e-05, %v1706_v55  ;;  %v1707_v37 = vmax.f32 %v1688_v14, 0.0  ;;  %v1685_v6 = vsub.f32 %v1647_v20, %v1666_v46  ;;  %v1648_v18 = vmul.f32 0.02, %v1605_v0 }
 0x4b6   : > { %v1777_v26 = vmul.f32 %v3020_v2, %v1758_v59  ;;  %2860 = vmatprep.mubr.bf16.mxu0 %v1910_v56  ;;  %v1558_v27 = vpop.xlane.xlu0 %1557  ;;  %v1764_v59 = vsub.f32 %v3963_v41, %v4098_v45 }
 0x4b7   : > { %v3022_v48 = vpop.eup %3021  ;;  %3023 = vrsqrt.f32 %v1725_v25  ;;  %v1726_v50 = vadd.f32 1e-05, %v1707_v37  ;;  %v1704_v42 = vmax.f32 %v1685_v6, 0.0  ;;  %v1686_v1 = vsub.f32 %v1648_v18, %v1667_v49  ;;  %2861 = vmatmul.mubr.bf16.gmra.mrb[24].mxu0 %v1911_v8 }
 0x4b8   : > { %v1800_v38 = vmul.f32 %v4036_v61, %v1777_v26  ;;  %v1556_v62 = vpop.xlane.xlu1 %1555  ;;  %v1776_v51 = vmul.f32 %v3022_v48, %v1757_v31  ;;  %v4129_v11 = vmul.f32 0.02, %v1558_v27 }
 0x4b9   : > { %3025 = vrsqrt.f32 %v1726_v50  ;;  %v1723_v58 = vadd.f32 1e-05, %v1704_v42  ;;  %v1705_v13 = vmax.f32 %v1686_v1, 0.0  ;;  %v4121_v63 = vmul.f32 0.02, %v1556_v62 }
 0x4ba   : > { %v1554_v29 = vpop.xlane.xlu0 %1553  ;;  %v1799_v23 = vmul.f32 %v4036_v61, %v1776_v51  ;;  %v1823_v44 = vadd.f32 %v4051_v16, %v1800_v38  ;;  %v1672_v49 = vmul.f32 %v4129_v11, %v4129_v11  ;;  %v1762_v38 = vsub.f32 %v3973_v53, %v4106_v15 }
 0x4bb   : > { %3027 = vrsqrt.f32 %v1723_v58  ;;  %v1724_v32 = vadd.f32 1e-05, %v1705_v13  ;;  %v4126_v52 = vmul.f32 0.02, %v1554_v29  ;;  %v1671_v60 = vmul.f32 %v4121_v63, %v4121_v63 }
 0x4bc   : > { %v1611_v47 = vpop.xlane.xlu1 %1610  ;;  %v1822_v35 = vadd.f32 %v4051_v16, %v1799_v23  ;;  %v1842_v54 = vmax.f32 %v1823_v44, 0.0  ;;  %v1759_v53 = vsub.f32 %v3925_v17, %v4094_v33 }
 0x4bd   : > { %3029 = vrsqrt.f32 %v1724_v32  ;;  %v1651_v43 = vmul.f32 0.02, %v1611_v47  ;;  %v1670_v28 = vmul.f32 %v4126_v52, %v4126_v52 }
 0x4be   : > { %3031 = vrsqrt.f32 %v1721_v9  ;;  %v1613_v4 = vpop.xlane.xlu0 %1612  ;;  %v1841_v30 = vmax.f32 %v1822_v35, 0.0  ;;  %v1861_v10 = vmul.f32 %v1842_v54, %v1842_v54 }
 0x4bf   : > { %v1652_v5 = vmul.f32 0.02, %v1613_v4  ;;  %v1689_v46 = vsub.f32 %v1651_v43, %v1670_v28 }
 0x4c0   : > { %v1615_v55 = vpop.xlane.xlu1 %1614  ;;  %v1860_v14 = vmul.f32 %v1841_v30, %v1841_v30  ;;  %v1880_v6 = vmul.f32 %v1861_v10, %v1842_v54 }
 0x4c1   : > { %v3024_v20 = vpop.eup %3023  ;;  %v1690_v0 = vsub.f32 %v1652_v5, %v1671_v60  ;;  %v1653_v56 = vmul.f32 0.02, %v1615_v55  ;;  %v1708_v2 = vmax.f32 %v1689_v46, 0.0  ;;  %v1765_v5 = vsub.f32 %v3999_v7, %v4126_v52 }
 0x4c2   : > { %v1782_v8 = vmul.f32 %v3024_v20, %v1763_v36  ;;  %v1601_v25 = vpop.xlane.xlu0 %1600  ;;  %v1879_v37 = vmul.f32 %v1860_v14, %v1841_v30  ;;  %v1766_v36 = vsub.f32 %v4001_v34, %v4121_v63 }
 0x4c3   : > { %v3026_v18 = vpop.eup %3025  ;;  %v1709_v57 = vmax.f32 %v1690_v0, 0.0  ;;  %v1691_v31 = vsub.f32 %v1653_v56, %v1672_v49  ;;  %v1646_v40 = vmul.f32 0.02, %v1601_v25  ;;  %v1727_v45 = vadd.f32 1e-05, %v1708_v2 }
 0x4c4   : > { %v1805_v26 = vmul.f32 %v4036_v61, %v1782_v8  ;;  %v1783_v41 = vmul.f32 %v3026_v18, %v1764_v59  ;;  %v1912_v27 = vpack.c.bf16 %v1880_v6, %v1879_v37  ;;  %v1767_v59 = vsub.f32 %v3994_v12, %v4129_v11 }
 0x4c5   : > { %v3028_v48 = vpop.eup %3027  ;;  %v1728_v50 = vadd.f32 1e-05, %v1709_v57  ;;  %v1710_v42 = vmax.f32 %v1691_v31, 0.0  ;;  %v1684_v1 = vsub.f32 %v1646_v40, %v1665_v19  ;;  %3033 = vrsqrt.f32 %v1727_v45 }
 0x4c6   : > { %v1806_v62 = vmul.f32 %v4036_v61, %v1783_v41  ;;  %2864 = vmatprep.mubr.bf16.mxu0 %v1912_v27  ;;  %v1780_v22 = vmul.f32 %v3028_v48, %v1761_v21  ;;  %v1828_v13 = vadd.f32 %v4051_v16, %v1805_v26  ;;  %v1760_v25 = vsub.f32 %v3930_v39, %v4124_v24 }
 0x4c7   : > { %v3030_v3 = vpop.eup %3029  ;;  %3035 = vrsqrt.f32 %v1728_v50  ;;  %v1729_v51 = vadd.f32 1e-05, %v1710_v42  ;;  %v1703_v58 = vmax.f32 %v1684_v1, 0.0 }
 0x4c8   : > { %v3032_v9 = vpop.eup %3031  ;;  %v1781_v29 = vmul.f32 %v3030_v3, %v1762_v38  ;;  %v1803_v23 = vmul.f32 %v4036_v61, %v1780_v22  ;;  %v1829_v44 = vadd.f32 %v4051_v16, %v1806_v62  ;;  %v1847_v54 = vmax.f32 %v1828_v13, 0.0 }
 0x4c9   : > { %3037 = vrsqrt.f32 %v1729_v51  ;;  %v1722_v15 = vadd.f32 1e-05, %v1703_v58  ;;  %v1778_v43 = vmul.f32 %v3032_v9, %v1759_v53 }
 0x4ca   : > { %v1804_v32 = vmul.f32 %v4036_v61, %v1781_v29  ;;  %v1826_v47 = vadd.f32 %v4051_v16, %v1803_v23  ;;  %v1848_v35 = vmax.f32 %v1829_v44, 0.0  ;;  %v1866_v17 = vmul.f32 %v1847_v54, %v1847_v54 }
 0x4cb   : > { %3039 = vrsqrt.f32 %v1722_v15  ;;  %v1801_v33 = vmul.f32 %v4036_v61, %v1778_v43 }
 0x4cc   : > { %v1827_v28 = vadd.f32 %v4051_v16, %v1804_v32  ;;  %v1845_v4 = vmax.f32 %v1826_v47, 0.0  ;;  %v1867_v30 = vmul.f32 %v1848_v35, %v1848_v35  ;;  %v1885_v2 = vmul.f32 %v1866_v17, %v1847_v54 }
 0x4cd   : > { %v1824_v52 = vadd.f32 %v4051_v16, %v1801_v33 }
 0x4ce   : > { %v1846_v10 = vmax.f32 %v1827_v28, 0.0  ;;  %v1864_v60 = vmul.f32 %v1845_v4, %v1845_v4  ;;  %v1886_v14 = vmul.f32 %v1867_v30, %v1848_v35 }
 0x4cf   : > { %v3034_v19 = vpop.eup %3033  ;;  %v1843_v40 = vmax.f32 %v1824_v52, 0.0 }
 0x4d0   : > { %v1865_v46 = vmul.f32 %v1846_v10, %v1846_v10  ;;  %v1784_v20 = vmul.f32 %v3034_v19, %v1765_v5  ;;  %v1883_v49 = vmul.f32 %v1864_v60, %v1845_v4  ;;  %v1915_v18 = vpack.c.bf16 %v1886_v14, %v1885_v2 }
 0x4d1   : > { %v3036_v55 = vpop.eup %3035  ;;  %v1862_v50 = vmul.f32 %v1843_v40, %v1843_v40 }
 0x4d2   : > { %v1884_v0 = vmul.f32 %v1865_v46, %v1846_v10  ;;  %v1785_v56 = vmul.f32 %v3036_v55, %v1766_v36  ;;  %v1807_v7 = vmul.f32 %v4036_v61, %v1784_v20 }
 0x4d3   : > { %v3038_v8 = vpop.eup %3037  ;;  %v1881_v13 = vmul.f32 %v1862_v50, %v1843_v40 }
 0x4d4   : > { %v1914_v34 = vpack.c.bf16 %v1884_v0, %v1883_v49  ;;  %v1808_v63 = vmul.f32 %v4036_v61, %v1785_v56  ;;  %v1786_v37 = vmul.f32 %v3038_v8, %v1767_v59  ;;  %v1830_v12 = vadd.f32 %v4051_v16, %v1807_v7 }
 0x4d5   : > { %v3040_v6 = vpop.eup %3039 }
 0x4d6   : > { %2868 = vmatprep.mubr.bf16.mxu1 %v1914_v34  ;;  %v1831_v11 = vadd.f32 %v4051_v16, %v1808_v63  ;;  %v1809_v21 = vmul.f32 %v4036_v61, %v1786_v37  ;;  %v1779_v57 = vmul.f32 %v3040_v6, %v1760_v25  ;;  %v1849_v31 = vmax.f32 %v1830_v12, 0.0 }
 0x4d7   : > { %2869 = vmatmul.mubr.bf16.vlgmr.msra.gmra.mrb[20].mxu1 %v1915_v18 }
 0x4d8   : > { %v1850_v26 = vmax.f32 %v1831_v11, 0.0  ;;  %v1832_v39 = vadd.f32 %v4051_v16, %v1809_v21  ;;  %v1802_v24 = vmul.f32 %v4036_v61, %v1779_v57  ;;  %v1868_v41 = vmul.f32 %v1849_v31, %v1849_v31  ;;  %v4178_v61 = vld [vmem:[%s4513_s2 + $0x4] ss:$0 sm:$0xff] }
 0x4da   : > { %v1869_v45 = vmul.f32 %v1850_v26, %v1850_v26  ;;  %v1851_v27 = vmax.f32 %v1832_v39, 0.0  ;;  %v1825_v48 = vadd.f32 %v4051_v16, %v1802_v24  ;;  %v1887_v42 = vmul.f32 %v1868_v41, %v1849_v31 }
 0x4dc   : > { %v1888_v1 = vmul.f32 %v1869_v45, %v1850_v26  ;;  %v1870_v38 = vmul.f32 %v1851_v27, %v1851_v27  ;;  %v1844_v62 = vmax.f32 %v1825_v48, 0.0 }
 0x4de   : > { %v1916_v22 = vpack.c.bf16 %v1888_v1, %v1887_v42  ;;  %v1889_v3 = vmul.f32 %v1870_v38, %v1851_v27  ;;  %v1863_v51 = vmul.f32 %v1844_v62, %v1844_v62 }
 0x4e0   : > { %2872 = vmatprep.mubr.bf16.mxu1 %v1916_v22  ;;  %v1917_v58 = vpack.c.bf16 %v1889_v3, %v1889_v3  ;;  %v1882_v9 = vmul.f32 %v1863_v51, %v1844_v62 }
 0x4e2   : > { %2873 = vmatmul.mubr.bf16.gmra.mrb[24].mxu1 %v1917_v58  ;;  %v1913_v29 = vpack.c.bf16 %v1882_v9, %v1881_v13 }
 0x4e4   : > { %2865 = vmatmul.mubr.bf16.gmra.mrb[28].mxu0 %v1913_v29 }
 0x57a   : > { %v2858_v16 = vpop.f32.mrb[20].mxu0 }
 0x57b   : > { %v2013_v23 = vadd.f32 %v2858_v16, %v4178_v61  ;;  %v2004_v44 = vpop.f32.mrb[21].mxu0 }
 0x57c   : > { %v2859_v53 = vpop.f32.mrb[22].mxu0  ;;  %v2005_v32 = vadd.f32 %v4178_v61, %v2004_v44 }
 0x57d   : > { %v4181_v15 = vmax.f32 %v2013_v23, 0.0  ;;  %v2016_v47 = vadd.f32 %v2859_v53, %v4178_v61  ;;  %v2007_v35 = vpop.f32.mrb[23].mxu0 }
 0x57e   : > { %v4188_v43 = vmax.f32 %v2005_v32, 0.0  ;;  %v2008_v28 = vadd.f32 %v4178_v61, %v2007_v35 }
 0x57f   : > { %v4185_v54 = vmax.f32 %v2016_v47, 0.0  ;;  %2107 = vadd.xlane.f32.xlu0 %v4181_v15  ;;  %v2143_v4 = vmul.f32 %v4181_v15, %v4181_v15 }
 0x580   : > { %v4195_v30 = vmax.f32 %v2008_v28, 0.0  ;;  %v2141_v19 = vmul.f32 %v4188_v43, %v4188_v43 }
 0x581   : > { %2109 = vadd.xlane.f32.xlu1 %v4185_v54  ;;  %v2144_v10 = vmul.f32 %v4185_v54, %v4185_v54 }
 0x582   : > { %v2142_v60 = vmul.f32 %v4195_v30, %v4195_v30 }
 0x583   : > { %2103 = vadd.xlane.f32.xlu0 %v4188_v43 }
 0x585   : > { %2164 = vadd.xlane.f32.xlu1 %v2143_v4 }
 0x587   : > { %2166 = vadd.xlane.f32.xlu0 %v2144_v10 }
 0x589   : > { %2105 = vadd.xlane.f32.xlu1 %v4195_v30 }
 0x58a   : > { %v2862_v5 = vpop.f32.mrb[24].mxu0 }
 0x58b   : > { %v2029_v17 = vadd.f32 %v2862_v5, %v4178_v61  ;;  %2162 = vadd.xlane.f32.xlu0 %v2142_v60  ;;  %v2020_v33 = vpop.f32.mrb[25].mxu0 }
 0x58c   : > { %v2863_v36 = vpop.f32.mrb[26].mxu0  ;;  %v2021_v55 = vadd.f32 %v4178_v61, %v2020_v33 }
 0x58d   : > { %v4205_v46 = vmax.f32 %v2029_v17, 0.0  ;;  %v2032_v14 = vadd.f32 %v2863_v36, %v4178_v61  ;;  %2160 = vadd.xlane.f32.xlu1 %v2141_v19  ;;  %v2023_v20 = vpop.f32.mrb[27].mxu0 }
 0x58e   : > { %v4212_v49 = vmax.f32 %v2021_v55, 0.0  ;;  %v2024_v0 = vadd.f32 %v4178_v61, %v2023_v20 }
 0x58f   : > { %v4209_v59 = vmax.f32 %v2032_v14, 0.0  ;;  %2115 = vadd.xlane.f32.xlu0 %v4205_v46  ;;  %v2147_v56 = vmul.f32 %v4205_v46, %v4205_v46 }
 0x590   : > { %v4219_v8 = vmax.f32 %v2024_v0, 0.0  ;;  %v2145_v52 = vmul.f32 %v4212_v49, %v4212_v49 }
 0x591   : > { %2117 = vadd.xlane.f32.xlu1 %v4209_v59  ;;  %v2148_v2 = vmul.f32 %v4209_v59, %v4209_v59 }
 0x592   : > { %v2146_v7 = vmul.f32 %v4219_v8, %v4219_v8 }
 0x593   : > { %2111 = vadd.xlane.f32.xlu0 %v4212_v49 }
 0x595   : > { %2172 = vadd.xlane.f32.xlu1 %v2147_v56 }
 0x597   : > { %2174 = vadd.xlane.f32.xlu0 %v2148_v2 }
 0x599   : > { %2113 = vadd.xlane.f32.xlu1 %v4219_v8 }
 0x59b   : > { %2170 = vadd.xlane.f32.xlu0 %v2146_v7 }
 0x59d   : > { %2168 = vadd.xlane.f32.xlu1 %v2145_v52 }
 0x5aa   : > { %v2870_v25 = vpop.f32.mrb[20].mxu1 }
 0x5ab   : > { %v2061_v34 = vadd.f32 %v2870_v25, %v4178_v61  ;;  %v2052_v63 = vpop.f32.mrb[21].mxu1 }
 0x5ac   : > { %v2053_v37 = vadd.f32 %v4178_v61, %v2052_v63  ;;  %v2871_v6 = vpop.f32.mrb[22].mxu1 }
 0x5ad   : > { %v2064_v18 = vadd.f32 %v2871_v6, %v4178_v61  ;;  %v2055_v12 = vpop.f32.mrb[23].mxu1 }
 0x5ae   : > { %v2056_v11 = vadd.f32 %v4178_v61, %v2055_v12  ;;  %v4264_v23 = vmax.f32 %v2053_v37, 0.0 }
 0x5af   : > { %v4261_v16 = vmax.f32 %v2064_v18, 0.0 }
 0x5b0   : > { %v4270_v53 = vmax.f32 %v2056_v11, 0.0  ;;  %v2153_v35 = vmul.f32 %v4264_v23, %v4264_v23 }
 0x5b1   : > { %v2156_v32 = vmul.f32 %v4261_v16, %v4261_v16 }
 0x5b2   : > { %v2154_v47 = vmul.f32 %v4270_v53, %v4270_v53 }
 0x5b5   : > { %v2874_v21 = vpop.f32.mrb[24].mxu1 }
 0x5b6   : > { %v2077_v57 = vadd.f32 %v2874_v21, %v4178_v61  ;;  %v2068_v31 = vpop.f32.mrb[25].mxu1 }
 0x5b7   : > { %v2069_v40 = vadd.f32 %v4178_v61, %v2068_v31  ;;  %v2866_v26 = vpop.f32.mrb[28].mxu0  ;;  %v2875_v39 = vpop.f32.mrb[26].mxu1 }
 0x5b8   : > { %v2045_v24 = vadd.f32 %v2866_v26, %v4178_v61  ;;  %v2036_v41 = vpop.f32.mrb[29].mxu0  ;;  %v2071_v45 = vpop.f32.mrb[27].mxu1  ;;  %v4279_v28 = vmax.f32 %v2077_v57, 0.0 }
 0x5b9   : > { %v2037_v27 = vadd.f32 %v4178_v61, %v2036_v41  ;;  %v2072_v48 = vadd.f32 %v4178_v61, %v2071_v45  ;;  %v2867_v50 = vpop.f32.mrb[30].mxu0  ;;  %v4281_v4 = vmax.f32 %v2069_v40, 0.0 }
 0x5ba   : > { %v4237_v42 = vmax.f32 %v2045_v24, 0.0  ;;  %v2048_v1 = vadd.f32 %v2867_v50, %v4178_v61  ;;  %v2039_v38 = vpop.f32.mrb[31].mxu0  ;;  %v2159_v17 = vmul.f32 %v4279_v28, %v4279_v28 }
 0x5bb   : > { %v2040_v62 = vadd.f32 %v4178_v61, %v2039_v38  ;;  %v4244_v3 = vmax.f32 %v2037_v27, 0.0  ;;  %v4259_v61 = vmax.f32 %v2061_v34, 0.0  ;;  %v4283_v10 = vmax.f32 %v2072_v48, 0.0 }
 0x5bc   : > { %v4241_v22 = vmax.f32 %v2048_v1, 0.0  ;;  %2123 = vadd.xlane.f32.xlu0 %v4237_v42  ;;  %v2151_v51 = vmul.f32 %v4237_v42, %v4237_v42  ;;  %v2157_v60 = vmul.f32 %v4281_v4, %v4281_v4 }
 0x5bd   : > { %v4250_v58 = vmax.f32 %v2040_v62, 0.0  ;;  %v2149_v29 = vmul.f32 %v4244_v3, %v4244_v3  ;;  %v2155_v44 = vmul.f32 %v4259_v61, %v4259_v61  ;;  %v2158_v5 = vmul.f32 %v4283_v10, %v4283_v10 }
 0x5be   : > { %2125 = vadd.xlane.f32.xlu1 %v4241_v22  ;;  %v2152_v13 = vmul.f32 %v4241_v22, %v4241_v22 }
 0x5bf   : > { %v2150_v9 = vmul.f32 %v4250_v58, %v4250_v58 }
 0x5c0   : > { %2119 = vadd.xlane.f32.xlu0 %v4244_v3 }
 0x5c2   : > { %2180 = vadd.xlane.f32.xlu1 %v2151_v51 }
 0x5c4   : > { %2182 = vadd.xlane.f32.xlu0 %v2152_v13 }
 0x5c6   : > { %2121 = vadd.xlane.f32.xlu1 %v4250_v58 }
 0x5c8   : > { %2178 = vadd.xlane.f32.xlu0 %v2150_v9 }
 0x5ca   : > { %2176 = vadd.xlane.f32.xlu1 %v2149_v29 }
 0x5cc   : > { %2131 = vadd.xlane.f32.xlu0 %v4259_v61 }
 0x5ce   : > { %2133 = vadd.xlane.f32.xlu1 %v4261_v16 }
 0x5d0   : > { %2127 = vadd.xlane.f32.xlu0 %v4264_v23 }
 0x5d2   : > { %2188 = vadd.xlane.f32.xlu1 %v2155_v44 }
 0x5d4   : > { %2190 = vadd.xlane.f32.xlu0 %v2156_v32 }
 0x5d6   : > { %2129 = vadd.xlane.f32.xlu1 %v4270_v53 }
 0x5d8   : > { %2186 = vadd.xlane.f32.xlu0 %v2154_v47 }
 0x5da   : > { %2184 = vadd.xlane.f32.xlu1 %v2153_v35 }
 0x5dc   : > { %2139 = vadd.xlane.f32.xlu0 %v4279_v28 }
 0x5de   : > { %2137 = vadd.xlane.f32.xlu1 %v4283_v10 }
 0x5e0   : > { %2135 = vadd.xlane.f32.xlu0 %v4281_v4 }
 0x5e2   : > { %2192 = vadd.xlane.f32.xlu1 %v2157_v60 }
 0x5e4   : > { %2194 = vadd.xlane.f32.xlu0 %v2158_v5 }
 0x5e6   : > { %2196 = vadd.xlane.f32.xlu1 %v2159_v17 }
 0x60c   : > { %v2108_v33 = vpop.xlane.xlu0 %2107 }
 0x60d   : > { %v2200_v36 = vmul.f32 0.02, %v2108_v33 }
 0x60e   : > { %v2110_v19 = vpop.xlane.xlu1 %2109 }
 0x60f   : > { %v2201_v14 = vmul.f32 0.02, %v2110_v19  ;;  %v2238_v0 = vmul.f32 %v2200_v36, %v2200_v36  ;;  %v2333_v47 = vsub.f32 %v4181_v15, %v2200_v36  ;;  %v4314_v19 = vld [vmem:[%s4513_s2 + $0xb] ss:$0 sm:$0xff] }
 0x610   : > { %v2104_v55 = vpop.xlane.xlu0 %2103 }
 0x611   : > { %v2239_v7 = vmul.f32 %v2201_v14, %v2201_v14  ;;  %v4294_v63 = vmul.f32 0.02, %v2104_v55  ;;  %v2334_v55 = vsub.f32 %v4185_v54, %v2201_v14 }
 0x612   : > { %v2165_v20 = vpop.xlane.xlu1 %2164 }
 0x613   : > { %v2219_v56 = vmul.f32 0.02, %v2165_v20  ;;  %v2236_v26 = vmul.f32 %v4294_v63, %v4294_v63 }
 0x614   : > { %v2167_v2 = vpop.xlane.xlu0 %2166 }
 0x615   : > { %v2257_v52 = vsub.f32 %v2219_v56, %v2238_v0  ;;  %v2220_v25 = vmul.f32 0.02, %v2167_v2  ;;  %v4320_v0 = vld [vmem:[%s4513_s2 + $0xc] ss:$0 sm:$0xff] }
 0x616   : > { %v2106_v34 = vpop.xlane.xlu1 %2105 }
 0x617   : > { %v2276_v37 = vmax.f32 %v2257_v52, 0.0  ;;  %v2258_v6 = vsub.f32 %v2220_v25, %v2239_v7  ;;  %v4296_v18 = vmul.f32 0.02, %v2106_v34 }
 0x618   : > { %v2163_v12 = vpop.xlane.xlu0 %2162 }
 0x619   : > { %v2295_v11 = vadd.f32 1e-05, %v2276_v37  ;;  %v2277_v21 = vmax.f32 %v2258_v6, 0.0  ;;  %v2237_v57 = vmul.f32 %v4296_v18, %v4296_v18  ;;  %v2218_v31 = vmul.f32 0.02, %v2163_v12 }
 0x61a   : > { %v2161_v40 = vpop.xlane.xlu1 %2160  ;;  %v2332_v12 = vsub.f32 %v4195_v30, %v4296_v18 }
 0x61b   : > { %3041 = vrsqrt.f32 %v2295_v11  ;;  %v2296_v39 = vadd.f32 1e-05, %v2277_v21  ;;  %v2217_v24 = vmul.f32 0.02, %v2161_v40  ;;  %v2256_v41 = vsub.f32 %v2218_v31, %v2237_v57 }
 0x61c   : > { %v2116_v45 = vpop.xlane.xlu0 %2115 }
 0x61d   : > { %3043 = vrsqrt.f32 %v2296_v39  ;;  %v2255_v27 = vsub.f32 %v2217_v24, %v2236_v26  ;;  %v2275_v48 = vmax.f32 %v2256_v41, 0.0  ;;  %v4302_v38 = vmul.f32 0.02, %v2116_v45 }
 0x61e   : > { %v2118_v50 = vpop.xlane.xlu1 %2117  ;;  %v2331_v41 = vsub.f32 %v4188_v43, %v4294_v63 }
 0x61f   : > { %v2274_v1 = vmax.f32 %v2255_v27, 0.0  ;;  %v2294_v62 = vadd.f32 1e-05, %v2275_v48  ;;  %v4304_v9 = vmul.f32 0.02, %v2118_v50  ;;  %v2242_v44 = vmul.f32 %v4302_v38, %v4302_v38 }
 0x620   : > { %v2112_v51 = vpop.xlane.xlu0 %2111 }
 0x621   : > { %v2293_v13 = vadd.f32 1e-05, %v2274_v1  ;;  %3045 = vrsqrt.f32 %v2294_v62  ;;  %v2243_v5 = vmul.f32 %v4304_v9, %v4304_v9  ;;  %v4322_v56 = vmul.f32 0.02, %v2112_v51 }
 0x622   : > { %v2173_v29 = vpop.xlane.xlu1 %2172 }
 0x623   : > { %3047 = vrsqrt.f32 %v2293_v13  ;;  %v2223_v32 = vmul.f32 0.02, %v2173_v29  ;;  %v2240_v40 = vmul.f32 %v4322_v56, %v4322_v56 }
 0x624   : > { %v2175_v35 = vpop.xlane.xlu0 %2174 }
 0x625   : > { %v3042_v60 = vpop.eup %3041  ;;  %v2261_v17 = vsub.f32 %v2223_v32, %v2242_v44  ;;  %v2224_v33 = vmul.f32 0.02, %v2175_v35  ;;  %v4341_v44 = vld [vmem:[%s4513_s2 + $0xd] ss:$0 sm:$0xff] }
 0x626   : > { %v2114_v20 = vpop.xlane.xlu1 %2113  ;;  %v2352_v15 = vmul.f32 %v3042_v60, %v2333_v47 }
 0x627   : > { %v3044_v36 = vpop.eup %3043  ;;  %v2280_v2 = vmax.f32 %v2261_v17, 0.0  ;;  %v2262_v7 = vsub.f32 %v2224_v33, %v2243_v5  ;;  %v4324_v52 = vmul.f32 0.02, %v2114_v20 }
 0x628   : > { %v2171_v25 = vpop.xlane.xlu0 %2170  ;;  %v2375_v34 = vmul.f32 %v4314_v19, %v2352_v15  ;;  %v2353_v37 = vmul.f32 %v3044_v36, %v2334_v55  ;;  %v2337_v15 = vsub.f32 %v4205_v46, %v4302_v38 }
 0x629   : > { %v2299_v6 = vadd.f32 1e-05, %v2280_v2  ;;  %v2281_v54 = vmax.f32 %v2262_v7, 0.0  ;;  %v2241_v14 = vmul.f32 %v4324_v52, %v4324_v52  ;;  %v2222_v11 = vmul.f32 0.02, %v2171_v25 }
 0x62a   : > { %v2169_v21 = vpop.xlane.xlu1 %2168  ;;  %v2398_v57 = vadd.f32 %v4320_v0, %v2375_v34  ;;  %v2376_v31 = vmul.f32 %v4314_v19, %v2353_v37  ;;  %v2338_v34 = vsub.f32 %v4209_v59, %v4304_v9  ;;  %v2336_v59 = vsub.f32 %v4219_v8, %v4324_v52 }
 0x62b   : > { %3049 = vrsqrt.f32 %v2299_v6  ;;  %v2300_v26 = vadd.f32 1e-05, %v2281_v54  ;;  %v2221_v39 = vmul.f32 0.02, %v2169_v21  ;;  %v3046_v24 = vpop.eup %3045  ;;  %v2260_v45 = vsub.f32 %v2222_v11, %v2241_v14 }
 0x62c   : > { %v2417_v27 = vmax.f32 %v2398_v57, 0.0  ;;  %v2399_v30 = vadd.f32 %v4320_v0, %v2376_v31  ;;  %v2351_v50 = vmul.f32 %v3046_v24, %v2332_v12 }
 0x62d   : > { %v3048_v18 = vpop.eup %3047  ;;  %3051 = vrsqrt.f32 %v2300_v26  ;;  %v2259_v48 = vsub.f32 %v2221_v39, %v2240_v40  ;;  %v2279_v1 = vmax.f32 %v2260_v45, 0.0  ;;  %v2335_v40 = vsub.f32 %v4212_v49, %v4322_v56 }
 0x62e   : > { %v2436_v62 = vmul.f32 %v2417_v27, %v2417_v27  ;;  %v2418_v51 = vmax.f32 %v2399_v30, 0.0  ;;  %v2350_v13 = vmul.f32 %v3048_v18, %v2331_v41  ;;  %v2374_v43 = vmul.f32 %v4314_v19, %v2351_v50 }
 0x62f   : > { %v2278_v29 = vmax.f32 %v2259_v48, 0.0  ;;  %v2298_v63 = vadd.f32 1e-05, %v2279_v1 }
 0x630   : > { %v2455_v32 = vmul.f32 %v2436_v62, %v2417_v27  ;;  %v2437_v47 = vmul.f32 %v2418_v51, %v2418_v51  ;;  %v2373_v35 = vmul.f32 %v4314_v19, %v2350_v13  ;;  %v2397_v5 = vadd.f32 %v4320_v0, %v2374_v43 }
 0x631   : > { %v2297_v60 = vadd.f32 1e-05, %v2278_v29  ;;  %3053 = vrsqrt.f32 %v2298_v63 }
 0x632   : > { %v2479_v17 = vmul.f32 %v4341_v44, %v2455_v32  ;;  %v2456_v33 = vmul.f32 %v2437_v47, %v2418_v51  ;;  %v2396_v55 = vadd.f32 %v4320_v0, %v2373_v35  ;;  %v2416_v20 = vmax.f32 %v2397_v5, 0.0 }
 0x633   : > { %3055 = vrsqrt.f32 %v2297_v60 }
 0x634   : > { %2500 = vadd.xlane.f32.xlu0 %v2479_v17  ;;  %v2480_v36 = vmul.f32 %v4341_v44, %v2456_v33  ;;  %v2415_v2 = vmax.f32 %v2396_v55, 0.0  ;;  %v2435_v25 = vmul.f32 %v2416_v20, %v2416_v20 }
 0x635   : > { %v3050_v7 = vpop.eup %3049 }
 0x636   : > { %2502 = vadd.xlane.f32.xlu1 %v2480_v36  ;;  %v2434_v37 = vmul.f32 %v2415_v2, %v2415_v2  ;;  %v2356_v6 = vmul.f32 %v3050_v7, %v2337_v15  ;;  %v2454_v14 = vmul.f32 %v2435_v25, %v2416_v20 }
 0x637   : > { %v3052_v54 = vpop.eup %3051 }
 0x638   : > { %v2453_v12 = vmul.f32 %v2434_v37, %v2415_v2  ;;  %v2379_v11 = vmul.f32 %v4314_v19, %v2356_v6  ;;  %v2357_v21 = vmul.f32 %v3052_v54, %v2338_v34  ;;  %v2478_v46 = vmul.f32 %v4341_v44, %v2454_v14 }
 0x63a   : > { %v2477_v38 = vmul.f32 %v4341_v44, %v2453_v12  ;;  %v2402_v57 = vadd.f32 %v4320_v0, %v2379_v11  ;;  %v2380_v31 = vmul.f32 %v4314_v19, %v2357_v21  ;;  %2498 = vadd.xlane.f32.xlu1 %v2478_v46 }
 0x63b   : > { %v3054_v9 = vpop.eup %3053 }
 0x63c   : > { %2496 = vadd.xlane.f32.xlu0 %v2477_v38  ;;  %v2421_v26 = vmax.f32 %v2402_v57, 0.0  ;;  %v2403_v39 = vadd.f32 %v4320_v0, %v2380_v31  ;;  %v2355_v41 = vmul.f32 %v3054_v9, %v2336_v59 }
 0x63d   : > { %v3056_v24 = vpop.eup %3055 }
 0x63e   : > { %v2440_v45 = vmul.f32 %v2421_v26, %v2421_v26  ;;  %v2422_v27 = vmax.f32 %v2403_v39, 0.0  ;;  %v2354_v30 = vmul.f32 %v3056_v24, %v2335_v40  ;;  %v2378_v18 = vmul.f32 %v4314_v19, %v2355_v41 }
 0x640   : > { %v2459_v48 = vmul.f32 %v2440_v45, %v2421_v26  ;;  %v2441_v50 = vmul.f32 %v2422_v27, %v2422_v27  ;;  %v2377_v8 = vmul.f32 %v4314_v19, %v2354_v30  ;;  %v2401_v52 = vadd.f32 %v4320_v0, %v2378_v18 }
 0x642   : > { %v2483_v1 = vmul.f32 %v4341_v44, %v2459_v48  ;;  %v2460_v49 = vmul.f32 %v2441_v50, %v2422_v27  ;;  %v2400_v56 = vadd.f32 %v4320_v0, %v2377_v8  ;;  %v2420_v62 = vmax.f32 %v2401_v52, 0.0 }
 0x644   : > { %2508 = vadd.xlane.f32.xlu0 %v2483_v1  ;;  %v2484_v51 = vmul.f32 %v4341_v44, %v2460_v49  ;;  %v2419_v13 = vmax.f32 %v2400_v56, 0.0  ;;  %v2439_v29 = vmul.f32 %v2420_v62, %v2420_v62 }
 0x646   : > { %2510 = vadd.xlane.f32.xlu1 %v2484_v51  ;;  %v2438_v43 = vmul.f32 %v2419_v13, %v2419_v13  ;;  %v2458_v63 = vmul.f32 %v2439_v29, %v2420_v62 }
 0x648   : > { %v2457_v32 = vmul.f32 %v2438_v43, %v2419_v13  ;;  %v2482_v35 = vmul.f32 %v4341_v44, %v2458_v63 }
 0x649   : > { %v2124_v47 = vpop.xlane.xlu0 %2123 }
 0x64a   : > { %v2481_v60 = vmul.f32 %v4341_v44, %v2457_v32  ;;  %2506 = vadd.xlane.f32.xlu1 %v2482_v35  ;;  %v2208_v17 = vmul.f32 0.02, %v2124_v47 }
 0x64b   : > { %v2126_v5 = vpop.xlane.xlu1 %2125 }
 0x64c   : > { %2504 = vadd.xlane.f32.xlu0 %v2481_v60  ;;  %v2209_v55 = vmul.f32 0.02, %v2126_v5  ;;  %v2246_v15 = vmul.f32 %v2208_v17, %v2208_v17  ;;  %v2341_v56 = vsub.f32 %v4237_v42, %v2208_v17 }
 0x64d   : > { %v2120_v33 = vpop.xlane.xlu0 %2119 }
 0x64e   : > { %v2247_v7 = vmul.f32 %v2209_v55, %v2209_v55  ;;  %v4371_v6 = vmul.f32 0.02, %v2120_v33  ;;  %v2342_v63 = vsub.f32 %v4241_v22, %v2209_v55 }
 0x64f   : > { %v2181_v20 = vpop.xlane.xlu1 %2180 }
 0x650   : > { %v2227_v36 = vmul.f32 0.02, %v2181_v20  ;;  %v2244_v59 = vmul.f32 %v4371_v6, %v4371_v6 }
 0x651   : > { %v2183_v2 = vpop.xlane.xlu0 %2182 }
 0x652   : > { %v2265_v25 = vsub.f32 %v2227_v36, %v2246_v15  ;;  %v2228_v34 = vmul.f32 0.02, %v2183_v2 }
 0x653   : > { %v2122_v37 = vpop.xlane.xlu1 %2121 }
 0x654   : > { %v2284_v54 = vmax.f32 %v2265_v25, 0.0  ;;  %v2266_v14 = vsub.f32 %v2228_v34, %v2247_v7  ;;  %v4373_v12 = vmul.f32 0.02, %v2122_v37 }
 0x655   : > { %v2179_v11 = vpop.xlane.xlu0 %2178 }
 0x656   : > { %v2303_v21 = vadd.f32 1e-05, %v2284_v54  ;;  %v2285_v46 = vmax.f32 %v2266_v14, 0.0  ;;  %v2245_v38 = vmul.f32 %v4373_v12, %v4373_v12  ;;  %v2226_v57 = vmul.f32 0.02, %v2179_v11 }
 0x657   : > { %v2177_v31 = vpop.xlane.xlu1 %2176  ;;  %v2340_v22 = vsub.f32 %v4250_v58, %v4373_v12  ;;  %v2339_v58 = vsub.f32 %v4244_v3, %v4371_v6 }
 0x658   : > { %3057 = vrsqrt.f32 %v2303_v21  ;;  %v2304_v9 = vadd.f32 1e-05, %v2285_v46  ;;  %v2225_v40 = vmul.f32 0.02, %v2177_v31  ;;  %v2264_v26 = vsub.f32 %v2226_v57, %v2245_v38 }
 0x659   : > { %v2132_v39 = vpop.xlane.xlu0 %2131 }
 0x65a   : > { %3059 = vrsqrt.f32 %v2304_v9  ;;  %v2263_v24 = vsub.f32 %v2225_v40, %v2244_v59  ;;  %v2283_v41 = vmax.f32 %v2264_v26, 0.0  ;;  %v4379_v30 = vmul.f32 0.02, %v2132_v39 }
 0x65b   : > { %v2134_v45 = vpop.xlane.xlu1 %2133 }
 0x65c   : > { %v2282_v27 = vmax.f32 %v2263_v24, 0.0  ;;  %v2302_v18 = vadd.f32 1e-05, %v2283_v41  ;;  %v4381_v8 = vmul.f32 0.02, %v2134_v45  ;;  %v2250_v1 = vmul.f32 %v4379_v30, %v4379_v30 }
 0x65d   : > { %v2128_v48 = vpop.xlane.xlu0 %2127 }
 0x65e   : > { %v2301_v50 = vadd.f32 1e-05, %v2282_v27  ;;  %3061 = vrsqrt.f32 %v2302_v18  ;;  %v2251_v13 = vmul.f32 %v4381_v8, %v4381_v8  ;;  %v4389_v60 = vmul.f32 0.02, %v2128_v48 }
 0x65f   : > { %v2189_v52 = vpop.xlane.xlu1 %2188 }
 0x660   : > { %3063 = vrsqrt.f32 %v2301_v50  ;;  %v2231_v49 = vmul.f32 0.02, %v2189_v52  ;;  %v2248_v54 = vmul.f32 %v4389_v60, %v4389_v60 }
 0x661   : > { %v2191_v62 = vpop.xlane.xlu0 %2190 }
 0x662   : > { %v3058_v51 = vpop.eup %3057  ;;  %v2269_v29 = vsub.f32 %v2231_v49, %v2250_v1  ;;  %v2232_v43 = vmul.f32 0.02, %v2191_v62 }
 0x663   : > { %v2130_v32 = vpop.xlane.xlu1 %2129  ;;  %v2360_v47 = vmul.f32 %v3058_v51, %v2341_v56 }
 0x664   : > { %v3060_v35 = vpop.eup %3059  ;;  %v2288_v5 = vmax.f32 %v2269_v29, 0.0  ;;  %v2270_v33 = vsub.f32 %v2232_v43, %v2251_v13  ;;  %v4391_v20 = vmul.f32 0.02, %v2130_v32 }
 0x665   : > { %v2187_v15 = vpop.xlane.xlu0 %2186  ;;  %v2383_v42 = vmul.f32 %v4314_v19, %v2360_v47  ;;  %v2361_v17 = vmul.f32 %v3060_v35, %v2342_v63  ;;  %v2345_v63 = vsub.f32 %v4259_v61, %v4379_v30 }
 0x666   : > { %v2307_v36 = vadd.f32 1e-05, %v2288_v5  ;;  %v2289_v2 = vmax.f32 %v2270_v33, 0.0  ;;  %v2249_v7 = vmul.f32 %v4391_v20, %v4391_v20  ;;  %v2230_v55 = vmul.f32 0.02, %v2187_v15 }
 0x667   : > { %v2185_v25 = vpop.xlane.xlu1 %2184  ;;  %v2406_v34 = vadd.f32 %v4320_v0, %v2383_v42  ;;  %v2384_v37 = vmul.f32 %v4314_v19, %v2361_v17 }
 0x668   : > { %3065 = vrsqrt.f32 %v2307_v36  ;;  %v2308_v14 = vadd.f32 1e-05, %v2289_v2  ;;  %v2229_v11 = vmul.f32 0.02, %v2185_v25  ;;  %v3062_v21 = vpop.eup %3061  ;;  %v2268_v46 = vsub.f32 %v2230_v55, %v2249_v7 }
 0x669   : > { %v2140_v38 = vpop.xlane.xlu0 %2139  ;;  %v2425_v57 = vmax.f32 %v2406_v34, 0.0  ;;  %v2407_v31 = vadd.f32 %v4320_v0, %v2384_v37  ;;  %v2359_v9 = vmul.f32 %v3062_v21, %v2340_v22  ;;  %v2346_v36 = vsub.f32 %v4261_v16, %v4381_v8 }
 0x66a   : > { %v3064_v59 = vpop.eup %3063  ;;  %3067 = vrsqrt.f32 %v2308_v14  ;;  %v2267_v12 = vsub.f32 %v2229_v11, %v2248_v54  ;;  %v2287_v40 = vmax.f32 %v2268_v46, 0.0  ;;  %v4412_v13 = vmul.f32 0.02, %v2140_v38 }
 0x66b   : > { %v2138_v26 = vpop.xlane.xlu1 %2137  ;;  %v2444_v39 = vmul.f32 %v2425_v57, %v2425_v57  ;;  %v2426_v24 = vmax.f32 %v2407_v31, 0.0  ;;  %v2358_v45 = vmul.f32 %v3064_v59, %v2339_v58  ;;  %v2382_v52 = vmul.f32 %v4314_v19, %v2359_v9 }
 0x66c   : > { %v2286_v41 = vmax.f32 %v2267_v12, 0.0  ;;  %v2306_v27 = vadd.f32 1e-05, %v2287_v40  ;;  %v4406_v49 = vmul.f32 0.02, %v2138_v26  ;;  %v2254_v55 = vmul.f32 %v4412_v13, %v4412_v13 }
 0x66d   : > { %v2136_v18 = vpop.xlane.xlu0 %2135  ;;  %v2463_v48 = vmul.f32 %v2444_v39, %v2425_v57  ;;  %v2445_v50 = vmul.f32 %v2426_v24, %v2426_v24  ;;  %v2405_v51 = vadd.f32 %v4320_v0, %v2382_v52  ;;  %v2381_v5 = vmul.f32 %v4314_v19, %v2358_v45 }
 0x66e   : > { %v2305_v1 = vadd.f32 1e-05, %v2286_v41  ;;  %v4408_v56 = vmul.f32 0.02, %v2136_v18  ;;  %3069 = vrsqrt.f32 %v2306_v27  ;;  %v2253_v15 = vmul.f32 %v4406_v49, %v4406_v49 }
 0x66f   : > { %v2193_v3 = vpop.xlane.xlu1 %2192  ;;  %v2487_v6 = vmul.f32 %v4341_v44, %v2463_v48  ;;  %v2464_v62 = vmul.f32 %v2445_v50, %v2426_v24  ;;  %v2424_v35 = vmax.f32 %v2405_v51, 0.0  ;;  %v2404_v61 = vadd.f32 %v4320_v0, %v2381_v5 }
 0x670   : > { %3071 = vrsqrt.f32 %v2305_v1  ;;  %v2252_v29 = vmul.f32 %v4408_v56, %v4408_v56  ;;  %v2233_v43 = vmul.f32 0.02, %v2193_v3  ;;  %v2344_v58 = vsub.f32 %v4270_v53, %v4391_v20 }
 0x671   : > { %2516 = vadd.xlane.f32.xlu0 %v2487_v6  ;;  %v2195_v32 = vpop.xlane.xlu0 %2194  ;;  %v2488_v47 = vmul.f32 %v4341_v44, %v2464_v62  ;;  %v2443_v7 = vmul.f32 %v2424_v35, %v2424_v35  ;;  %v2423_v14 = vmax.f32 %v2404_v61, 0.0  ;;  %v2343_v26 = vsub.f32 %v4264_v23, %v4389_v60 }
 0x672   : > { %v3066_v33 = vpop.eup %3065  ;;  %v2271_v42 = vsub.f32 %v2233_v43, %v2252_v29  ;;  %v2234_v17 = vmul.f32 0.02, %v2195_v32  ;;  %v2347_v43 = vsub.f32 %v4281_v4, %v4408_v56  ;;  %v2348_v5 = vsub.f32 %v4283_v10, %v4406_v49 }
 0x673   : > { %v2197_v2 = vpop.xlane.xlu1 %2196  ;;  %2518 = vadd.xlane.f32.xlu1 %v2488_v47  ;;  %v2364_v30 = vmul.f32 %v3066_v33, %v2345_v63  ;;  %v2462_v54 = vmul.f32 %v2443_v7, %v2424_v35  ;;  %v2442_v57 = vmul.f32 %v2423_v14, %v2423_v14 }
 0x674   : > { %v3068_v22 = vpop.eup %3067  ;;  %v2290_v25 = vmax.f32 %v2271_v42, 0.0  ;;  %v2272_v34 = vsub.f32 %v2234_v17, %v2253_v15  ;;  %v2235_v37 = vmul.f32 0.02, %v2197_v2 }
 0x675   : > { %v2387_v11 = vmul.f32 %v4314_v19, %v2364_v30  ;;  %v2365_v21 = vmul.f32 %v3068_v22, %v2346_v36  ;;  %v2486_v38 = vmul.f32 %v4341_v44, %v2462_v54  ;;  %v2461_v39 = vmul.f32 %v2442_v57, %v2423_v14 }
 0x676   : > { %v2309_v46 = vadd.f32 1e-05, %v2290_v25  ;;  %v2291_v16 = vmax.f32 %v2272_v34, 0.0  ;;  %v2273_v8 = vsub.f32 %v2235_v37, %v2254_v55  ;;  %v2349_v36 = vsub.f32 %v4279_v28, %v4412_v13 }
 0x677   : > { %v2410_v31 = vadd.f32 %v4320_v0, %v2387_v11  ;;  %v2388_v59 = vmul.f32 %v4314_v19, %v2365_v21  ;;  %2514 = vadd.xlane.f32.xlu1 %v2486_v38  ;;  %v2485_v48 = vmul.f32 %v4341_v44, %v2461_v39 }
 0x678   : > { %3073 = vrsqrt.f32 %v2309_v46  ;;  %v2310_v12 = vadd.f32 1e-05, %v2291_v16  ;;  %v2292_v9 = vmax.f32 %v2273_v8, 0.0  ;;  %v3070_v40 = vpop.eup %3069 }
 0x679   : > { %v2429_v24 = vmax.f32 %v2410_v31, 0.0  ;;  %v2411_v41 = vadd.f32 %v4320_v0, %v2388_v59  ;;  %v2363_v18 = vmul.f32 %v3070_v40, %v2344_v58  ;;  %2512 = vadd.xlane.f32.xlu0 %v2485_v48 }
 0x67a   : > { %v3072_v45 = vpop.eup %3071  ;;  %3075 = vrsqrt.f32 %v2310_v12  ;;  %v2311_v27 = vadd.f32 1e-05, %v2292_v9 }
 0x67b   : > { %v2448_v50 = vmul.f32 %v2429_v24, %v2429_v24  ;;  %v2430_v53 = vmax.f32 %v2411_v41, 0.0  ;;  %v2362_v20 = vmul.f32 %v3072_v45, %v2343_v26  ;;  %v2386_v52 = vmul.f32 %v4314_v19, %v2363_v18 }
 0x67c   : > { %3077 = vrsqrt.f32 %v2311_v27 }
 0x67d   : > { %v2467_v1 = vmul.f32 %v2448_v50, %v2429_v24  ;;  %v2449_v23 = vmul.f32 %v2430_v53, %v2430_v53  ;;  %v2385_v60 = vmul.f32 %v4314_v19, %v2362_v20  ;;  %v2409_v3 = vadd.f32 %v4320_v0, %v2386_v52 }
 0x67f   : > { %v2491_v6 = vmul.f32 %v4341_v44, %v2467_v1  ;;  %v2468_v62 = vmul.f32 %v2449_v23, %v2430_v53  ;;  %v2408_v51 = vadd.f32 %v4320_v0, %v2385_v60  ;;  %v2428_v29 = vmax.f32 %v2409_v3, 0.0 }
 0x681   : > { %2524 = vadd.xlane.f32.xlu0 %v2491_v6  ;;  %v2492_v63 = vmul.f32 %v4341_v44, %v2468_v62  ;;  %v2427_v32 = vmax.f32 %v2408_v51, 0.0  ;;  %v2447_v35 = vmul.f32 %v2428_v29, %v2428_v29 }
 0x682   : > { %v3074_v47 = vpop.eup %3073 }
 0x683   : > { %2526 = vadd.xlane.f32.xlu1 %v2492_v63  ;;  %v2446_v33 = vmul.f32 %v2427_v32, %v2427_v32  ;;  %v2366_v15 = vmul.f32 %v3074_v47, %v2347_v43  ;;  %v2466_v17 = vmul.f32 %v2447_v35, %v2428_v29 }
 0x684   : > { %v3076_v42 = vpop.eup %3075 }
 0x685   : > { %v2465_v2 = vmul.f32 %v2446_v33, %v2427_v32  ;;  %v2389_v4 = vmul.f32 %v4314_v19, %v2366_v15  ;;  %v2367_v56 = vmul.f32 %v3076_v42, %v2348_v5  ;;  %v2490_v61 = vmul.f32 %v4341_v44, %v2466_v17 }
 0x686   : > { %v3078_v7 = vpop.eup %3077 }
 0x687   : > { %v2489_v30 = vmul.f32 %v4341_v44, %v2465_v2  ;;  %v2412_v22 = vadd.f32 %v4320_v0, %v2389_v4  ;;  %v2390_v10 = vmul.f32 %v4314_v19, %v2367_v56  ;;  %v2368_v49 = vmul.f32 %v3078_v7, %v2349_v36  ;;  %2522 = vadd.xlane.f32.xlu1 %v2490_v61 }
 0x689   : > { %2520 = vadd.xlane.f32.xlu0 %v2489_v30  ;;  %v2431_v55 = vmax.f32 %v2412_v22, 0.0  ;;  %v2413_v25 = vadd.f32 %v4320_v0, %v2390_v10  ;;  %v2391_v28 = vmul.f32 %v4314_v19, %v2368_v49  ;;  %v2711_v19 = vld [vmem:[%s4513_s2 + $0xe] ss:$0 sm:$0xff] }
 0x68b   : > { %v2450_v13 = vmul.f32 %v2431_v55, %v2431_v55  ;;  %v2432_v34 = vmax.f32 %v2413_v25, 0.0  ;;  %v2414_v37 = vadd.f32 %v4320_v0, %v2391_v28 }
 0x68d   : > { %v2469_v54 = vmul.f32 %v2450_v13, %v2431_v55  ;;  %v2451_v14 = vmul.f32 %v2432_v34, %v2432_v34  ;;  %v2433_v11 = vmax.f32 %v2414_v37, 0.0 }
 0x68f   : > { %v2493_v21 = vmul.f32 %v4341_v44, %v2469_v54  ;;  %v2470_v46 = vmul.f32 %v2451_v14, %v2432_v34  ;;  %v2452_v16 = vmul.f32 %v2433_v11, %v2433_v11 }
 0x691   : > { %2528 = vadd.xlane.f32.xlu0 %v2493_v21  ;;  %v2494_v8 = vmul.f32 %v4341_v44, %v2470_v46  ;;  %v2471_v38 = vmul.f32 %v2452_v16, %v2433_v11 }
 0x693   : > { %2530 = vadd.xlane.f32.xlu1 %v2494_v8  ;;  %v2495_v57 = vmul.f32 %v4341_v44, %v2471_v38 }
 0x695   : > { %2532 = vadd.xlane.f32.xlu0 %v2495_v57 }
 0x6c1   : > { %v2501_v0 = vpop.xlane.xlu0 %2500 }
 0x6c2   : > { %v2541_v31 = vadd.f32 %v2711_v19, %v2501_v0 }
 0x6c3   : > { %v2503_v44 = vpop.xlane.xlu1 %2502 }
 0x6c4   : > { %2561 = vst.msk [vmem:[%s4468_s27 + $0x10] sm:$0xff] %vm2558_vm0, %v2541_v31  ;;  %v2542_v59 = vadd.f32 %v2711_v19, %v2503_v44 }
 0x6c6   : > { %2562 = vst.msk [vmem:[%s4468_s27 + $0x18] sm:$0xff] %vm2558_vm0, %v2542_v59 }
 0x6c7   : > { %v2499_v58 = vpop.xlane.xlu1 %2498 }
 0x6c8   : > { %v2540_v12 = vadd.f32 %v2711_v19, %v2499_v58 }
 0x6c9   : > { %v2497_v9 = vpop.xlane.xlu0 %2496 }
 0x6ca   : > { %v2539_v40 = vadd.f32 %v2711_v19, %v2497_v9  ;;  %2560 = vst.msk [vmem:[%s4468_s27 + $0x8] sm:$0xff] %vm2558_vm0, %v2540_v12 }
 0x6cc   : > { %2559 = vst.msk [vmem:[%s4468_s27] sm:$0xff] %vm2558_vm0, %v2539_v40 }
 0x6d1   : > { %v2509_v26 = vpop.xlane.xlu0 %2508 }
 0x6d2   : > { %v2545_v39 = vadd.f32 %v2711_v19, %v2509_v26 }
 0x6d3   : > { %v2511_v24 = vpop.xlane.xlu1 %2510 }
 0x6d4   : > { %2565 = vst.msk [vmem:[%s4468_s27 + $0x30] sm:$0xff] %vm2558_vm0, %v2545_v39  ;;  %v2546_v41 = vadd.f32 %v2711_v19, %v2511_v24 }
 0x6d6   : > { %2566 = vst.msk [vmem:[%s4468_s27 + $0x38] sm:$0xff] %vm2558_vm0, %v2546_v41 }
 0x6d7   : > { %v2507_v45 = vpop.xlane.xlu1 %2506 }
 0x6d8   : > { %v2544_v27 = vadd.f32 %v2711_v19, %v2507_v45 }
 0x6d9   : > { %v2505_v18 = vpop.xlane.xlu0 %2504 }
 0x6da   : > { %v2543_v48 = vadd.f32 %v2711_v19, %v2505_v18  ;;  %2564 = vst.msk [vmem:[%s4468_s27 + $0x28] sm:$0xff] %vm2558_vm0, %v2544_v27 }
 0x6dc   : > { %2563 = vst.msk [vmem:[%s4468_s27 + $0x20] sm:$0xff] %vm2558_vm0, %v2543_v48 }
 0x6fe   : > { %v2517_v50 = vpop.xlane.xlu0 %2516 }
 0x6ff   : > { %v2549_v53 = vadd.f32 %v2711_v19, %v2517_v50 }
 0x700   : > { %v2519_v20 = vpop.xlane.xlu1 %2518 }
 0x701   : > { %2569 = vst.msk [vmem:[%s4468_s27 + $0x50] sm:$0xff] %vm2558_vm0, %v2549_v53  ;;  %v2550_v52 = vadd.f32 %v2711_v19, %v2519_v20 }
 0x703   : > { %2570 = vst.msk [vmem:[%s4468_s27 + $0x58] sm:$0xff] %vm2558_vm0, %v2550_v52 }
 0x704   : > { %v2515_v1 = vpop.xlane.xlu1 %2514 }
 0x705   : > { %v2548_v23 = vadd.f32 %v2711_v19, %v2515_v1 }
 0x706   : > { %v2513_v60 = vpop.xlane.xlu0 %2512 }
 0x707   : > { %2568 = vst.msk [vmem:[%s4468_s27 + $0x48] sm:$0xff] %vm2558_vm0, %v2548_v23  ;;  %v2547_v3 = vadd.f32 %v2711_v19, %v2513_v60 }
 0x709   : > { %2567 = vst.msk [vmem:[%s4468_s27 + $0x40] sm:$0xff] %vm2558_vm0, %v2547_v3 }
 0x70e   : > { %v2525_v6 = vpop.xlane.xlu0 %2524 }
 0x70f   : > { %v2553_v62 = vadd.f32 %v2711_v19, %v2525_v6 }
 0x710   : > { %v2527_v51 = vpop.xlane.xlu1 %2526 }
 0x711   : > { %2573 = vst.msk [vmem:[%s4468_s27 + $0x70] sm:$0xff] %vm2558_vm0, %v2553_v62  ;;  %v2554_v29 = vadd.f32 %v2711_v19, %v2527_v51 }
 0x713   : > { %2574 = vst.msk [vmem:[%s4468_s27 + $0x78] sm:$0xff] %vm2558_vm0, %v2554_v29 }
 0x714   : > { %v2523_v43 = vpop.xlane.xlu1 %2522 }
 0x715   : > { %v2552_v63 = vadd.f32 %v2711_v19, %v2523_v43 }
 0x716   : > { %v2521_v32 = vpop.xlane.xlu0 %2520 }
 0x717   : > { %v2551_v47 = vadd.f32 %v2711_v19, %v2521_v32  ;;  %2572 = vst.msk [vmem:[%s4468_s27 + $0x68] sm:$0xff] %vm2558_vm0, %v2552_v63 }
 0x719   : > { %2571 = vst.msk [vmem:[%s4468_s27 + $0x60] sm:$0xff] %vm2558_vm0, %v2551_v47 }
 0x71e   : > { %v2529_v35 = vpop.xlane.xlu0 %2528 }
 0x71f   : > { %v2555_v5 = vadd.f32 %v2711_v19, %v2529_v35 }
 0x720   : > { %v2531_v33 = vpop.xlane.xlu1 %2530 }
 0x721   : > { %2575 = vst.msk [vmem:[%s4468_s27 + $0x80] sm:$0xff] %vm2558_vm0, %v2555_v5  ;;  %v2556_v15 = vadd.f32 %v2711_v19, %v2531_v33 }
 0x722   : > { %v2533_v42 = vpop.xlane.xlu0 %2532 }
 0x723   : > { %2576 = vst.msk [vmem:[%s4468_s27 + $0x88] sm:$0xff] %vm2558_vm0, %v2556_v15  ;;  %v2557_v17 = vadd.f32 %v2711_v19, %v2533_v42 }
 0x725   : > { %2577 = vst.msk [vmem:[%s4468_s27 + $0x90] sm:$0xff] %vm2558_vm0, %v2557_v17 }
 0x726 PF: > { %s13_s12 = sadd.s32 1, %s3085_s12  }
 0x727   : > { %p10_p4 = scmp.ge.s32.totalorder %s13_s12, 4  }
 0x729   :  { %12 = sbr.rel (!%p10_p4) target bundleno = 1 (0x1), region = 64 }

</bundles_post_ra>
